<compile_context>
chip_gen: v7x
topology: tpu7x:2x2x1
jax: 0.10.0
libtpu: 0.0.40
codegen_flags: <defaults>
</compile_context>

<pallas_src>
import functools

import jax
import jax.numpy as jnp
import numpy as np
from jax.experimental import pallas as pl
from jax.experimental.pallas import tpu as pltpu


def _attn_pool_kernel(x_ref, pos_hw_ref, pos_cls_ref, seg_ref, segt_ref,
                      wq_ref, bq_ref, wk_ref, bk_ref, wv_ref, bv_ref,
                      wc_ref, bc_ref, o_ref, *, num_heads: int, head_dim: int):
    # x_ref:      (TB, HW, C)   spatial tokens for TB batch elements
    # pos_hw_ref: (HW, C)       positional embedding rows 1..HW
    # pos_cls_ref:(1, C)        positional embedding row 0 (cls/mean token)
    # seg_ref:    (C, H)        one-hot head membership, seg[c,h]=1 iff c//hd==h
    # segt_ref:   (H, C)        its transpose
    # w*_ref:     (C, C)/(C,Dout) pre-transposed Linear weights (y = x @ W)
    # b*_ref:     (1, C)/(1,Dout) biases (f32)
    # o_ref:      (TB, Dout)
    f32 = jnp.float32
    TB, HW, C = x_ref.shape
    x = x_ref[...].astype(f32)                                   # (TB, HW, C)

    # mean ("cls") token per batch element; spatial tokens get pos rows 1..HW.
    mean_tok = jnp.mean(x, axis=1) + pos_cls_ref[...]            # (TB, C)
    toks = (x + pos_hw_ref[...]).reshape(TB * HW, C)             # (TB*HW, C)

    wdt = wq_ref.dtype

    def proj(a, w_ref, b_ref):
        return jnp.dot(a.astype(wdt), w_ref[...],
                       preferred_element_type=f32) + b_ref[...]

    scale = head_dim ** -0.5
    q     = proj(mean_tok, wq_ref, bq_ref) * scale               # (TB, C)
    k_cls = proj(mean_tok, wk_ref, bk_ref)                       # (TB, C)
    v_cls = proj(mean_tok, wv_ref, bv_ref)                       # (TB, C)
    k_hw  = proj(toks, wk_ref, bk_ref).reshape(TB, HW, C)        # (TB, HW, C)
    v_hw  = proj(toks, wv_ref, bv_ref).reshape(TB, HW, C)        # (TB, HW, C)

    seg  = seg_ref[...]                                          # (C, H)
    segt = segt_ref[...]                                         # (H, C)

    # per-head scores: elementwise q*k, then head-segment sum via one matmul.
    s_hw = jnp.dot((q[:, None, :] * k_hw).reshape(TB * HW, C), seg,
                   preferred_element_type=f32).reshape(TB, HW, num_heads)
    s_cls = jnp.dot(q * k_cls, seg, preferred_element_type=f32)  # (TB, H)

    # softmax over the HW spatial keys plus the cls key (joint, stable).
    m = jnp.maximum(jnp.max(s_hw, axis=1), s_cls)                # (TB, H)
    p_hw = jnp.exp(s_hw - m[:, None, :])                         # (TB, HW, H)
    p_cls = jnp.exp(s_cls - m)                                   # (TB, H)
    denom = jnp.sum(p_hw, axis=1) + p_cls                        # (TB, H)
    inv = pl.reciprocal(denom, approx=True)                      # (TB, H)  (EUP)

    # broadcast per-head probabilities / normalizer back onto the C lanes.
    p_hw_c = jnp.dot(p_hw.reshape(TB * HW, num_heads), segt,
                     preferred_element_type=f32).reshape(TB, HW, C)
    p_cls_c = jnp.dot(p_cls, segt, preferred_element_type=f32)   # (TB, C)
    inv_c = jnp.dot(inv, segt, preferred_element_type=f32)       # (TB, C)

    ctx = (jnp.sum(p_hw_c * v_hw, axis=1) + p_cls_c * v_cls) * inv_c   # (TB, C)

    out = jnp.dot(ctx.astype(wdt), wc_ref[...],
                  preferred_element_type=f32) + bc_ref[...]      # (TB, Dout)
    o_ref[...] = out.astype(o_ref.dtype)


def _choose_batch_tile(B, HW, target_rows=256):
    # Enough rows to fill the MXU M dim (128 already saturates v5e, 256 for
    # v6e/v7x); multiple of 8 for sublane-dense output blocks; capped so the
    # activation block stays small in VMEM.
    tb = pl.cdiv(target_rows, HW)
    tb = max(8, ((tb + 7) // 8) * 8)
    return min(tb, 64)


def attention_pool2d(x_nchw, params, num_heads: int, *,
                     weight_dtype=jnp.float32, target_rows=256):
    """Pallas implementation of AttentionPool2d.forward.

    x_nchw: (B, C, H, W) float32, H == W == spacial_dim.
    Returns (B, output_dim) float32.
    """
    B, C, H, W = x_nchw.shape
    HW = H * W
    head_dim = C // num_heads
    Dout = params["wc"].shape[0]

    TB = _choose_batch_tile(B, HW, target_rows)
    B_pad = pl.cdiv(B, TB) * TB

    # glue: NCHW -> (B, HW, C) token layout (embed dim on the lane axis),
    # batch padded with zeros to a multiple of TB (padded rows are discarded).
    x_tok = jnp.transpose(x_nchw.reshape(B, C, HW), (0, 2, 1)).astype(jnp.float32)
    if B_pad != B:
        x_tok = jnp.pad(x_tok, ((0, B_pad - B), (0, 0), (0, 0)))

    pos = params["pos"].astype(jnp.float32)                  # (HW+1, C)
    pos_cls = pos[0:1]                                       # (1, C)
    pos_hw = pos[1:]                                         # (HW, C)

    # PyTorch Linear is y = x @ W.T + b -> pre-transpose; optionally bf16.
    wq_t = params["wq"].T.astype(weight_dtype)
    wk_t = params["wk"].T.astype(weight_dtype)
    wv_t = params["wv"].T.astype(weight_dtype)
    wc_t = params["wc"].T.astype(weight_dtype)               # (C, Dout)
    bq = params["bq"].reshape(1, C).astype(jnp.float32)
    bk = params["bk"].reshape(1, C).astype(jnp.float32)
    bv = params["bv"].reshape(1, C).astype(jnp.float32)
    bc = params["bc"].reshape(1, Dout).astype(jnp.float32)

    # one-hot head-membership matrix: seg[c, h] = 1 iff c // head_dim == h.
    seg = (jnp.arange(C)[:, None] // head_dim
           == jnp.arange(num_heads)[None, :]).astype(jnp.float32)   # (C, H)
    segt = seg.T                                                     # (H, C)

    kernel = functools.partial(_attn_pool_kernel,
                               num_heads=num_heads, head_dim=head_dim)

    # VMEM budget: actual resident bytes with headroom, capped at 64 MiB so
    # the same configuration also fits v7x's smaller physical VMEM.
    itemsize = jnp.dtype(weight_dtype).itemsize
    resident = (TB * HW * C * 4 + TB * Dout * 4
                + (3 * C * C + C * Dout) * itemsize
                + (HW + 1 + 3) * C * 4 + Dout * 4
                + 2 * C * num_heads * 4)
    vmem_limit = int(min(max(32 * 2**20, 4 * resident), 64 * 2**20))

    full = lambda b: (0, 0)
    out = pl.pallas_call(
        kernel,
        out_shape=jax.ShapeDtypeStruct((B_pad, Dout), jnp.float32),
        grid_spec=pltpu.PrefetchScalarGridSpec(
            num_scalar_prefetch=0,
            grid=(B_pad // TB,),
            in_specs=[
                pl.BlockSpec((TB, HW, C), lambda b: (b, 0, 0)),      # x tokens
                pl.BlockSpec((HW, C), full),                         # pos (spatial)
                pl.BlockSpec((1, C), full),                          # pos (cls)
                pl.BlockSpec((C, num_heads), full),                  # head one-hot
                pl.BlockSpec((num_heads, C), full),                  # its transpose
                pl.BlockSpec((C, C), full), pl.BlockSpec((1, C), full),       # Wq^T, bq
                pl.BlockSpec((C, C), full), pl.BlockSpec((1, C), full),       # Wk^T, bk
                pl.BlockSpec((C, C), full), pl.BlockSpec((1, C), full),       # Wv^T, bv
                pl.BlockSpec((C, Dout), full), pl.BlockSpec((1, Dout), full), # Wc^T, bc
            ],
            out_specs=pl.BlockSpec((TB, Dout), lambda b: (b, 0)),
        ),
        compiler_params=pltpu.CompilerParams(
            dimension_semantics=("parallel",),
            vmem_limit_bytes=vmem_limit),
    )(x_tok, pos_hw, pos_cls, seg, segt,
      wq_t, bq, wk_t, bk, wv_t, bv, wc_t, bc)
    return out[:B]


def attention_pool2d_reference(x_nchw, params, num_heads: int):
    """Pure-JAX reference mirroring the PyTorch forward exactly."""
    B, C, H, W = x_nchw.shape
    HW = H * W
    x = jnp.transpose(x_nchw.reshape(B, C, HW), (2, 0, 1))            # (HW, B, C)
    x = jnp.concatenate([x.mean(axis=0, keepdims=True), x], axis=0)   # (L, B, C)
    x = x + params["pos"][:, None, :]

    q = x[0:1] @ params["wq"].T + params["bq"]                        # (1, B, C)
    k = x @ params["wk"].T + params["bk"]                             # (L, B, C)
    v = x @ params["wv"].T + params["bv"]                             # (L, B, C)

    hd = C // num_heads
    q = q.reshape(1, B, num_heads, hd) * (hd ** -0.5)
    k = k.reshape(-1, B, num_heads, hd)
    v = v.reshape(-1, B, num_heads, hd)
    scores = jnp.einsum("qbhd,kbhd->bhqk", q, k)
    p = jax.nn.softmax(scores, axis=-1)
    o = jnp.einsum("bhqk,kbhd->qbhd", p, v).reshape(1, B, C)
    out = o @ params["wc"].T + params["bc"]                           # (1, B, Dout)
    return out[0]


def init_params(key, spacial_dim: int, embed_dim: int, output_dim: int):
    L = spacial_dim * spacial_dim + 1
    ks = jax.random.split(key, 10)
    s = 1.0 / (embed_dim ** 0.5)
    return {
        "pos": jax.random.normal(ks[0], (L, embed_dim), jnp.float32) * s,
        "wq": jax.random.normal(ks[1], (embed_dim, embed_dim), jnp.float32) * s,
        "bq": jax.random.normal(ks[2], (embed_dim,), jnp.float32) * 0.01,
        "wk": jax.random.normal(ks[3], (embed_dim, embed_dim), jnp.float32) * s,
        "bk": jax.random.normal(ks[4], (embed_dim,), jnp.float32) * 0.01,
        "wv": jax.random.normal(ks[5], (embed_dim, embed_dim), jnp.float32) * s,
        "bv": jax.random.normal(ks[6], (embed_dim,), jnp.float32) * 0.01,
        "wc": jax.random.normal(ks[7], (output_dim, embed_dim), jnp.float32) * s,
        "bc": jax.random.normal(ks[8], (output_dim,), jnp.float32) * 0.01,
    }


if __name__ == "__main__":
    # Small, deterministic config (exercises batch padding and a 2-step grid).
    B, embed_dim, spacial_dim = 12, 128, 8        # input x: (12, 128, 8, 8)
    num_heads, output_dim = 8, 128

    key = jax.random.PRNGKey(0)
    k_x, k_p = jax.random.split(key)
    x = jax.random.normal(k_x, (B, embed_dim, spacial_dim, spacial_dim),
                          jnp.float32)
    params = init_params(k_p, spacial_dim, embed_dim, output_dim)

    ref = jax.block_until_ready(attention_pool2d_reference(x, params, num_heads))

    # f32 weights (tolerance accounts for MXU default-precision matmuls and
    # the approximate EUP reciprocal in the softmax normalization).
    out = jax.block_until_ready(attention_pool2d(x, params, num_heads))
    np.testing.assert_allclose(np.asarray(out), np.asarray(ref),
                               rtol=1e-2, atol=1e-2)
    assert out.shape == (B, output_dim)

    # bf16 weights (halved DMA/VMEM footprint, native bf16 MXU path).
    out_bf16 = jax.block_until_ready(
        attention_pool2d(x, params, num_heads, weight_dtype=jnp.bfloat16))
    np.testing.assert_allclose(np.asarray(out_bf16), np.asarray(ref),
                               rtol=5e-2, atol=5e-2)

    print("KERNEL_OK")
</pallas_src>

<mosaic_0001>
module attributes {stable_mosaic.version = 11 : i64} {
  func.func @_attn_pool_kernel(%arg0: i32, %arg1: memref<8x64x128xf32, #tpu.memory_space<vmem>>, %arg2: memref<64x128xf32, #tpu.memory_space<vmem>>, %arg3: memref<1x128xf32, #tpu.memory_space<vmem>>, %arg4: memref<128x8xf32, #tpu.memory_space<vmem>>, %arg5: memref<8x128xf32, #tpu.memory_space<vmem>>, %arg6: memref<128x128xf32, #tpu.memory_space<vmem>>, %arg7: memref<1x128xf32, #tpu.memory_space<vmem>>, %arg8: memref<128x128xf32, #tpu.memory_space<vmem>>, %arg9: memref<1x128xf32, #tpu.memory_space<vmem>>, %arg10: memref<128x128xf32, #tpu.memory_space<vmem>>, %arg11: memref<1x128xf32, #tpu.memory_space<vmem>>, %arg12: memref<128x128xf32, #tpu.memory_space<vmem>>, %arg13: memref<1x128xf32, #tpu.memory_space<vmem>>, %arg14: memref<8x128xf32, #tpu.memory_space<vmem>>) attributes {dimension_semantics = [#tpu.dimension_semantics<parallel>], iteration_bounds = array<i64: 2>, scalar_prefetch = 0 : i64, scratch_operands = 0 : i64, tpu.core_type = #tpu.core_type<tc>, window_params = [{transform_indices = @transform_0, window_bounds = array<i64: 8, 64, 128>}, {pipeline_mode = #tpu.pipeline_mode<synchronous>, transform_indices = @transform_1, window_bounds = array<i64: 64, 128>}, {pipeline_mode = #tpu.pipeline_mode<synchronous>, transform_indices = @transform_2, window_bounds = array<i64: 1, 128>}, {pipeline_mode = #tpu.pipeline_mode<synchronous>, transform_indices = @transform_3, window_bounds = array<i64: 128, 8>}, {pipeline_mode = #tpu.pipeline_mode<synchronous>, transform_indices = @transform_4, window_bounds = array<i64: 8, 128>}, {pipeline_mode = #tpu.pipeline_mode<synchronous>, transform_indices = @transform_5, window_bounds = array<i64: 128, 128>}, {pipeline_mode = #tpu.pipeline_mode<synchronous>, transform_indices = @transform_6, window_bounds = array<i64: 1, 128>}, {pipeline_mode = #tpu.pipeline_mode<synchronous>, transform_indices = @transform_7, window_bounds = array<i64: 128, 128>}, {pipeline_mode = #tpu.pipeline_mode<synchronous>, transform_indices = @transform_8, window_bounds = array<i64: 1, 128>}, {pipeline_mode = #tpu.pipeline_mode<synchronous>, transform_indices = @transform_9, window_bounds = array<i64: 128, 128>}, {pipeline_mode = #tpu.pipeline_mode<synchronous>, transform_indices = @transform_10, window_bounds = array<i64: 1, 128>}, {pipeline_mode = #tpu.pipeline_mode<synchronous>, transform_indices = @transform_11, window_bounds = array<i64: 128, 128>}, {pipeline_mode = #tpu.pipeline_mode<synchronous>, transform_indices = @transform_12, window_bounds = array<i64: 1, 128>}, {transform_indices = @transform_13, window_bounds = array<i64: 8, 128>}]} {
    %c0 = arith.constant 0 : index
    %c0_0 = arith.constant 0 : index
    %c0_1 = arith.constant 0 : index
    %0 = vector.load %arg1[%c0, %c0_0, %c0_1] : memref<8x64x128xf32, #tpu.memory_space<vmem>>, vector<8x64x128xf32>
    %cst = arith.constant dense<0.000000e+00> : vector<8x128xf32>
    %1 = vector.multi_reduction <add>, %0, %cst [1] : vector<8x64x128xf32> to vector<8x128xf32>
    %cst_2 = arith.constant 6.400000e+01 : f32
    %2 = vector.broadcast %cst_2 : f32 to vector<8x128xf32>
    %3 = arith.divf %1, %2 : vector<8x128xf32>
    %c0_3 = arith.constant 0 : index
    %c0_4 = arith.constant 0 : index
    %4 = vector.load %arg3[%c0_3, %c0_4] : memref<1x128xf32, #tpu.memory_space<vmem>>, vector<1x128xf32>
    %5 = vector.broadcast %4 : vector<1x128xf32> to vector<8x128xf32>
    %6 = arith.addf %3, %5 : vector<8x128xf32>
    %c0_5 = arith.constant 0 : index
    %c0_6 = arith.constant 0 : index
    %7 = vector.load %arg2[%c0_5, %c0_6] : memref<64x128xf32, #tpu.memory_space<vmem>>, vector<64x128xf32>
    %8 = vector.shape_cast %7 : vector<64x128xf32> to vector<1x64x128xf32>
    %9 = vector.broadcast %8 : vector<1x64x128xf32> to vector<8x64x128xf32>
    %10 = arith.addf %0, %9 : vector<8x64x128xf32>
    %11 = vector.shape_cast %10 : vector<8x64x128xf32> to vector<512x128xf32>
    %c0_7 = arith.constant 0 : index
    %c0_8 = arith.constant 0 : index
    %12 = vector.load %arg6[%c0_7, %c0_8] : memref<128x128xf32, #tpu.memory_space<vmem>>, vector<128x128xf32>
    %cst_9 = arith.constant dense<0.000000e+00> : vector<8x128xf32>
    %13 = tpu.matmul %6, %12, %cst_9 {dimension_numbers = #tpu.dot_dimension_numbers<[1], [0], [0], [1], [0, 0, 1, 1], [], []>} : vector<8x128xf32>, vector<128x128xf32>, vector<8x128xf32> -> vector<8x128xf32>
    %c0_10 = arith.constant 0 : index
    %c0_11 = arith.constant 0 : index
    %14 = vector.load %arg7[%c0_10, %c0_11] : memref<1x128xf32, #tpu.memory_space<vmem>>, vector<1x128xf32>
    %15 = vector.broadcast %14 : vector<1x128xf32> to vector<8x128xf32>
    %16 = arith.addf %13, %15 : vector<8x128xf32>
    %cst_12 = arith.constant 2.500000e-01 : f32
    %17 = vector.broadcast %cst_12 : f32 to vector<8x128xf32>
    %18 = arith.mulf %16, %17 : vector<8x128xf32>
    %c0_13 = arith.constant 0 : index
    %c0_14 = arith.constant 0 : index
    %19 = vector.load %arg8[%c0_13, %c0_14] : memref<128x128xf32, #tpu.memory_space<vmem>>, vector<128x128xf32>
    %cst_15 = arith.constant dense<0.000000e+00> : vector<8x128xf32>
    %20 = tpu.matmul %6, %19, %cst_15 {dimension_numbers = #tpu.dot_dimension_numbers<[1], [0], [0], [1], [0, 0, 1, 1], [], []>} : vector<8x128xf32>, vector<128x128xf32>, vector<8x128xf32> -> vector<8x128xf32>
    %c0_16 = arith.constant 0 : index
    %c0_17 = arith.constant 0 : index
    %21 = vector.load %arg9[%c0_16, %c0_17] : memref<1x128xf32, #tpu.memory_space<vmem>>, vector<1x128xf32>
    %22 = vector.broadcast %21 : vector<1x128xf32> to vector<8x128xf32>
    %23 = arith.addf %20, %22 : vector<8x128xf32>
    %c0_18 = arith.constant 0 : index
    %c0_19 = arith.constant 0 : index
    %24 = vector.load %arg10[%c0_18, %c0_19] : memref<128x128xf32, #tpu.memory_space<vmem>>, vector<128x128xf32>
    %cst_20 = arith.constant dense<0.000000e+00> : vector<8x128xf32>
    %25 = tpu.matmul %6, %24, %cst_20 {dimension_numbers = #tpu.dot_dimension_numbers<[1], [0], [0], [1], [0, 0, 1, 1], [], []>} : vector<8x128xf32>, vector<128x128xf32>, vector<8x128xf32> -> vector<8x128xf32>
    %c0_21 = arith.constant 0 : index
    %c0_22 = arith.constant 0 : index
    %26 = vector.load %arg11[%c0_21, %c0_22] : memref<1x128xf32, #tpu.memory_space<vmem>>, vector<1x128xf32>
    %27 = vector.broadcast %26 : vector<1x128xf32> to vector<8x128xf32>
    %28 = arith.addf %25, %27 : vector<8x128xf32>
    %c0_23 = arith.constant 0 : index
    %c0_24 = arith.constant 0 : index
    %29 = vector.load %arg8[%c0_23, %c0_24] : memref<128x128xf32, #tpu.memory_space<vmem>>, vector<128x128xf32>
    %cst_25 = arith.constant dense<0.000000e+00> : vector<512x128xf32>
    %30 = tpu.matmul %11, %29, %cst_25 {dimension_numbers = #tpu.dot_dimension_numbers<[1], [0], [0], [1], [0, 0, 1, 1], [], []>} : vector<512x128xf32>, vector<128x128xf32>, vector<512x128xf32> -> vector<512x128xf32>
    %c0_26 = arith.constant 0 : index
    %c0_27 = arith.constant 0 : index
    %31 = vector.load %arg9[%c0_26, %c0_27] : memref<1x128xf32, #tpu.memory_space<vmem>>, vector<1x128xf32>
    %32 = vector.broadcast %31 : vector<1x128xf32> to vector<512x128xf32>
    %33 = arith.addf %30, %32 : vector<512x128xf32>
    %34 = vector.shape_cast %33 : vector<512x128xf32> to vector<8x64x128xf32>
    %c0_28 = arith.constant 0 : index
    %c0_29 = arith.constant 0 : index
    %35 = vector.load %arg10[%c0_28, %c0_29] : memref<128x128xf32, #tpu.memory_space<vmem>>, vector<128x128xf32>
    %cst_30 = arith.constant dense<0.000000e+00> : vector<512x128xf32>
    %36 = tpu.matmul %11, %35, %cst_30 {dimension_numbers = #tpu.dot_dimension_numbers<[1], [0], [0], [1], [0, 0, 1, 1], [], []>} : vector<512x128xf32>, vector<128x128xf32>, vector<512x128xf32> -> vector<512x128xf32>
    %c0_31 = arith.constant 0 : index
    %c0_32 = arith.constant 0 : index
    %37 = vector.load %arg11[%c0_31, %c0_32] : memref<1x128xf32, #tpu.memory_space<vmem>>, vector<1x128xf32>
    %38 = vector.broadcast %37 : vector<1x128xf32> to vector<512x128xf32>
    %39 = arith.addf %36, %38 : vector<512x128xf32>
    %40 = vector.shape_cast %39 : vector<512x128xf32> to vector<8x64x128xf32>
    %c0_33 = arith.constant 0 : index
    %c0_34 = arith.constant 0 : index
    %41 = vector.load %arg4[%c0_33, %c0_34] : memref<128x8xf32, #tpu.memory_space<vmem>>, vector<128x8xf32>
    %c0_35 = arith.constant 0 : index
    %c0_36 = arith.constant 0 : index
    %42 = vector.load %arg5[%c0_35, %c0_36] : memref<8x128xf32, #tpu.memory_space<vmem>>, vector<8x128xf32>
    %43 = vector.shape_cast %18 : vector<8x128xf32> to vector<8x1x128xf32>
    %44 = vector.broadcast %43 : vector<8x1x128xf32> to vector<8x64x128xf32>
    %45 = arith.mulf %44, %34 : vector<8x64x128xf32>
    %46 = vector.shape_cast %45 : vector<8x64x128xf32> to vector<512x128xf32>
    %cst_37 = arith.constant dense<0.000000e+00> : vector<512x8xf32>
    %47 = tpu.matmul %46, %41, %cst_37 {dimension_numbers = #tpu.dot_dimension_numbers<[1], [0], [0], [1], [0, 0, 1, 1], [], []>} : vector<512x128xf32>, vector<128x8xf32>, vector<512x8xf32> -> vector<512x8xf32>
    %48 = vector.shape_cast %47 : vector<512x8xf32> to vector<8x64x8xf32>
    %49 = arith.mulf %18, %23 : vector<8x128xf32>
    %cst_38 = arith.constant dense<0.000000e+00> : vector<8x8xf32>
    %50 = tpu.matmul %49, %41, %cst_38 {dimension_numbers = #tpu.dot_dimension_numbers<[1], [0], [0], [1], [0, 0, 1, 1], [], []>} : vector<8x128xf32>, vector<128x8xf32>, vector<8x8xf32> -> vector<8x8xf32>
    %cst_39 = arith.constant dense<0xFF800000> : vector<8x8xf32>
    %51 = vector.multi_reduction <maximumf>, %48, %cst_39 [1] : vector<8x64x8xf32> to vector<8x8xf32>
    %52 = arith.maximumf %51, %50 : vector<8x8xf32>
    %53 = vector.shape_cast %52 : vector<8x8xf32> to vector<8x1x8xf32>
    %54 = vector.broadcast %53 : vector<8x1x8xf32> to vector<8x64x8xf32>
    %55 = arith.subf %48, %54 : vector<8x64x8xf32>
    %56 = math.exp %55 : vector<8x64x8xf32>
    %57 = arith.subf %50, %52 : vector<8x8xf32>
    %58 = math.exp %57 : vector<8x8xf32>
    %cst_40 = arith.constant dense<0.000000e+00> : vector<8x8xf32>
    %59 = vector.multi_reduction <add>, %56, %cst_40 [1] : vector<8x64x8xf32> to vector<8x8xf32>
    %60 = arith.addf %59, %58 : vector<8x8xf32>
    %61 = tpu.reciprocal %60 {approx = true} : vector<8x8xf32> -> vector<8x8xf32>
    %62 = vector.shape_cast %56 : vector<8x64x8xf32> to vector<512x8xf32>
    %cst_41 = arith.constant dense<0.000000e+00> : vector<512x128xf32>
    %63 = tpu.matmul %62, %42, %cst_41 {dimension_numbers = #tpu.dot_dimension_numbers<[1], [0], [0], [1], [0, 0, 1, 1], [], []>} : vector<512x8xf32>, vector<8x128xf32>, vector<512x128xf32> -> vector<512x128xf32>
    %64 = vector.shape_cast %63 : vector<512x128xf32> to vector<8x64x128xf32>
    %cst_42 = arith.constant dense<0.000000e+00> : vector<8x128xf32>
    %65 = tpu.matmul %58, %42, %cst_42 {dimension_numbers = #tpu.dot_dimension_numbers<[1], [0], [0], [1], [0, 0, 1, 1], [], []>} : vector<8x8xf32>, vector<8x128xf32>, vector<8x128xf32> -> vector<8x128xf32>
    %cst_43 = arith.constant dense<0.000000e+00> : vector<8x128xf32>
    %66 = tpu.matmul %61, %42, %cst_43 {dimension_numbers = #tpu.dot_dimension_numbers<[1], [0], [0], [1], [0, 0, 1, 1], [], []>} : vector<8x8xf32>, vector<8x128xf32>, vector<8x128xf32> -> vector<8x128xf32>
    %67 = arith.mulf %64, %40 : vector<8x64x128xf32>
    %cst_44 = arith.constant dense<0.000000e+00> : vector<8x128xf32>
    %68 = vector.multi_reduction <add>, %67, %cst_44 [1] : vector<8x64x128xf32> to vector<8x128xf32>
    %69 = arith.mulf %65, %28 : vector<8x128xf32>
    %70 = arith.addf %68, %69 : vector<8x128xf32>
    %71 = arith.mulf %70, %66 : vector<8x128xf32>
    %c0_45 = arith.constant 0 : index
    %c0_46 = arith.constant 0 : index
    %72 = vector.load %arg12[%c0_45, %c0_46] : memref<128x128xf32, #tpu.memory_space<vmem>>, vector<128x128xf32>
    %cst_47 = arith.constant dense<0.000000e+00> : vector<8x128xf32>
    %73 = tpu.matmul %71, %72, %cst_47 {dimension_numbers = #tpu.dot_dimension_numbers<[1], [0], [0], [1], [0, 0, 1, 1], [], []>} : vector<8x128xf32>, vector<128x128xf32>, vector<8x128xf32> -> vector<8x128xf32>
    %c0_48 = arith.constant 0 : index
    %c0_49 = arith.constant 0 : index
    %74 = vector.load %arg13[%c0_48, %c0_49] : memref<1x128xf32, #tpu.memory_space<vmem>>, vector<1x128xf32>
    %75 = vector.broadcast %74 : vector<1x128xf32> to vector<8x128xf32>
    %76 = arith.addf %73, %75 : vector<8x128xf32>
    %c0_50 = arith.constant 0 : index
    %c0_51 = arith.constant 0 : index
    %77 = vector.load %arg14[%c0_50, %c0_51] : memref<8x128xf32, #tpu.memory_space<vmem>>, vector<8x128xf32>
    tpu.vector_store %arg14[%c0_50, %c0_51], %76 {strides = array<i32>} : memref<8x128xf32, #tpu.memory_space<vmem>>, vector<8x128xf32>,
    return
  }
  func.func @transform_0(%arg0: i32) -> (i32, i32, i32) {
    %c0_i32 = arith.constant 0 : i32
    %c0_i32_0 = arith.constant 0 : i32
    %c0_i32_1 = arith.constant 0 : i32
    return %arg0, %c0_i32, %c0_i32_0 : i32, i32, i32
  }
  func.func @transform_1(%arg0: i32) -> (i32, i32) {
    %c0_i32 = arith.constant 0 : i32
    %c0_i32_0 = arith.constant 0 : i32
    %c0_i32_1 = arith.constant 0 : i32
    return %c0_i32, %c0_i32_0 : i32, i32
  }
  func.func @transform_2(%arg0: i32) -> (i32, i32) {
    %c0_i32 = arith.constant 0 : i32
    %c0_i32_0 = arith.constant 0 : i32
    %c0_i32_1 = arith.constant 0 : i32
    return %c0_i32, %c0_i32_0 : i32, i32
  }
  func.func @transform_3(%arg0: i32) -> (i32, i32) {
    %c0_i32 = arith.constant 0 : i32
    %c0_i32_0 = arith.constant 0 : i32
    %c0_i32_1 = arith.constant 0 : i32
    return %c0_i32, %c0_i32_0 : i32, i32
  }
  func.func @transform_4(%arg0: i32) -> (i32, i32) {
    %c0_i32 = arith.constant 0 : i32
    %c0_i32_0 = arith.constant 0 : i32
    %c0_i32_1 = arith.constant 0 : i32
    return %c0_i32, %c0_i32_0 : i32, i32
  }
  func.func @transform_5(%arg0: i32) -> (i32, i32) {
    %c0_i32 = arith.constant 0 : i32
    %c0_i32_0 = arith.constant 0 : i32
    %c0_i32_1 = arith.constant 0 : i32
    return %c0_i32, %c0_i32_0 : i32, i32
  }
  func.func @transform_6(%arg0: i32) -> (i32, i32) {
    %c0_i32 = arith.constant 0 : i32
    %c0_i32_0 = arith.constant 0 : i32
    %c0_i32_1 = arith.constant 0 : i32
    return %c0_i32, %c0_i32_0 : i32, i32
  }
  func.func @transform_7(%arg0: i32) -> (i32, i32) {
    %c0_i32 = arith.constant 0 : i32
    %c0_i32_0 = arith.constant 0 : i32
    %c0_i32_1 = arith.constant 0 : i32
    return %c0_i32, %c0_i32_0 : i32, i32
  }
  func.func @transform_8(%arg0: i32) -> (i32, i32) {
    %c0_i32 = arith.constant 0 : i32
    %c0_i32_0 = arith.constant 0 : i32
    %c0_i32_1 = arith.constant 0 : i32
    return %c0_i32, %c0_i32_0 : i32, i32
  }
  func.func @transform_9(%arg0: i32) -> (i32, i32) {
    %c0_i32 = arith.constant 0 : i32
    %c0_i32_0 = arith.constant 0 : i32
    %c0_i32_1 = arith.constant 0 : i32
    return %c0_i32, %c0_i32_0 : i32, i32
  }
  func.func @transform_10(%arg0: i32) -> (i32, i32) {
    %c0_i32 = arith.constant 0 : i32
    %c0_i32_0 = arith.constant 0 : i32
    %c0_i32_1 = arith.constant 0 : i32
    return %c0_i32, %c0_i32_0 : i32, i32
  }
  func.func @transform_11(%arg0: i32) -> (i32, i32) {
    %c0_i32 = arith.constant 0 : i32
    %c0_i32_0 = arith.constant 0 : i32
    %c0_i32_1 = arith.constant 0 : i32
    return %c0_i32, %c0_i32_0 : i32, i32
  }
  func.func @transform_12(%arg0: i32) -> (i32, i32) {
    %c0_i32 = arith.constant 0 : i32
    %c0_i32_0 = arith.constant 0 : i32
    %c0_i32_1 = arith.constant 0 : i32
    return %c0_i32, %c0_i32_0 : i32, i32
  }
  func.func @transform_13(%arg0: i32) -> (i32, i32) {
    %c0_i32 = arith.constant 0 : i32
    %c0_i32_0 = arith.constant 0 : i32
    return %arg0, %c0_i32 : i32, i32
  }
}

</mosaic_0001>

<bundles_post_ra>
// kernel: tpu_custom_call.1
= control target key start
LH: loop header
LB: loop body
LE: loop exit
PB: predicated region body
PF: predicated region fallthrough
CT: control target
= control target key end

     0   :  { %s8461_s0 = inlined_call_operand.hbm [shape: f32[16,64,128], index: 0, kind: input, shape index: {}]   ;;  %s8462_s1 = inlined_call_operand.hbm [shape: f32[64,128], index: 1, kind: input, shape index: {}]   ;;  %s8463_s2 = inlined_call_operand.vmem [shape: f32[1,128], index: 2, kind: input, shape index: {}]   ;;  %s8464_s3 = inlined_call_operand.vmem [shape: f32[128,8], index: 3, kind: input, shape index: {}]   ;;  %s8465_s4 = inlined_call_operand.vmem [shape: f32[8,128], index: 4, kind: input, shape index: {}]   ;;  %s8466_s5 = inlined_call_operand.vmem [shape: f32[128,128], index: 5, kind: input, shape index: {}]   ;;  %s8467_s6 = inlined_call_operand.vmem [shape: f32[1,128], index: 6, kind: input, shape index: {}]   ;;  %s8468_s7 = inlined_call_operand.hbm [shape: f32[128,128], index: 7, kind: input, shape index: {}]   ;;  %s8469_s8 = inlined_call_operand.vmem [shape: f32[1,128], index: 8, kind: input, shape index: {}]   ;;  %s8470_s9 = inlined_call_operand.hbm [shape: f32[128,128], index: 9, kind: input, shape index: {}]   ;;  %s8471_s10 = inlined_call_operand.vmem [shape: f32[1,128], index: 10, kind: input, shape index: {}]   ;;  %s8472_s11 = inlined_call_operand.hbm [shape: f32[128,128], index: 11, kind: input, shape index: {}]   ;;  %s8473_s12 = inlined_call_operand.vmem [shape: f32[1,128], index: 12, kind: input, shape index: {}]   ;;  %s8474_s13 = inlined_call_operand.hbm [shape: f32[16,128], index: 13, kind: output, shape index: {}]  }
   0x1   :  { %8534 = sst [smem:[#allocation77_spill]] %s8465_s4 }
   0x2   :  { %8535 = sst [smem:[#allocation78_spill]] %s8469_s8 }
   0x3   :  { %8536 = sst [smem:[#allocation79_spill]] %s8471_s10 }
   0x4   :  { %8537 = sst [smem:[#allocation80_spill]] %s8473_s12 }
   0x5   :  { %8538 = sst [smem:[#allocation81_spill]] %s8474_s13 }
   0x6   :  { %18 = vsyncpa [#allocation3], 0 }
   0x7   :  { %20 = vsyncpa [#allocation3 + $0x1], 0 }
   0x8   :  { %21 = vsyncpa [#allocation6], 0 }
   0x9   :  { %22 = vsyncpa [#allocation9], 0 }
   0xa   :  { %23 = vsyncpa [#allocation4], 0 }
   0xb   :  { %25 = vsyncpa [#allocation4 + $0x1], 0  ;;  %s6246_s25 = smov 0   ;;  %s6248_s26 = smov 0  }
   0xc   :  { %s6250_s27 = smov 0   ;;  %s6252_s28 = smov 0  }
   0xd LB: > { %8539 = sst [smem:[#allocation16_spill]] %s6150_s25  ;;  %s6267_s29 = sadd.s32 4294967295, %s6162_s28   ;;  %s6162_s28 = sphi %s6252_s28, %s8778_s28   ;;  %s6158_s27 = sphi %s6250_s27, %s8777_s27   ;;  %s6154_s26 = sphi %s6248_s26, %s8776_s26   ;;  %s6150_s25 = sphi %s6246_s25, %s8775_s25  }
   0xe   : > { %s4332_s30 = sadd.s32 4294967294, %s6162_s28   ;;  %p51_p0 = scmp.ne.s32.totalorder %s6154_s26, %s6150_s25 }
   0xf   : > { %p8478_p1 = scmp.eq.s32.totalorder %s6267_s29, 0  ;;  %p333_p3 = scmp.eq.s32.totalorder %s4332_s30, 1 }
  0x10   : > { %p4333_p5 = scmp.ge.s32.totalorder %s6162_s28, 1  ;;  %p340_p7 = scmp.lt.s32.totalorder %s6162_s28, 3 }
  0x11   : > { %p6276_p4 = por %p8478_p1, %p51_p0  ;;  %p6281_p6 = por %p333_p3, %p51_p0 }
  0x12   : > { %p6286_p8 = pnand %p4333_p5, %p340_p7  ;;  %s6164_s17 = smov [#allocation5]  }
  0x13   : > { %s8540_s14 = scalar_select %p6276_p4, 1, 0 }
  0x14   : > { %s8541_s15 = scalar_select %p6281_p6, 1, 0 }
  0x15   : > { %s8543_s16 = scalar_select %p6286_p8, 1, 0 }
  0x16   : > { %8542 = sst [smem:[#allocation17_spill]] %s8541_s15  ;;  %s352_s18 = sshll.u32 %s6164_s17, 4  ;;  %s6290_s18 = int_to_ptr.vmem [resolvable:$true] %s352_s18 }
  0x17   : > { %p5726_p9 = pneg %p6286_p8  ;;  %s6165_s20 = smov [#allocation8]  }
  0x18   : > { %s396_s21 = sshll.u32 %s6165_s20, 4  ;;  %s6166_s22 = smov [#allocation7]   ;;  %s6301_s21 = int_to_ptr.vmem [resolvable:$true] %s396_s21 }
  0x19   : > { %p6297_p11 = pnand %p5726_p9, %p8478_p1  ;;  %s6303_s23 = sshll.u32 %s6166_s22, 4  ;;  %s381_s23 = int_to_ptr.vmem [resolvable:$true] %s6303_s23 }
  0x1a   : > { %s5946_s17 = scalar_lea.hbm %s8462_s1, 1024 }
  0x1b   : > { %p5947_p12 = scmp.ne.s32.totalorder %s8462_s1, %s5946_s17  ;;  %p6313_p13 = pneg %p6297_p11 }
  0x1c   : > { %p5953_p5 = scmp.lt.u32.totalorder %s5946_s17, %s8462_s1 }
  0x1d   : > { %p5949_p0 = pnand %p6313_p13, %p5947_p12 }
  0x1f   : > { %p5950_p3 = pneg %p5949_p0 }
  0x21   : > { %p5955_p7 = pnand %p5953_p5, %p5950_p3 }
  0x23   : > { %5958 = shalt.err (!%p5955_p7)
}
  0x24   : > { %s5959_s25 = scalar_lea.vmem %s6290_s18, 1024  ;;  %p5967_p2 = scmp.lt.s32.totalorder %s6290_s18, %s6290_s18 }
  0x25   : > { %p5960_p9 = scmp.ne.s32.totalorder %s6290_s18, %s5959_s25  ;;  %p5968_p6 = scmp.lt.s32.totalorder %s5959_s25, %s5959_s25 }
  0x27   : > { %p5962_p10 = pnand %p5960_p9, %p6313_p13  ;;  %p5969_p12 = por %p5968_p6, %p5967_p2 }
  0x29   : > { %p5963_p1 = pneg %p5962_p10 }
  0x2b   : > { %p5970_p0 = pnand %p5969_p12, %p5963_p1 }
  0x2d   : > { %5973 = shalt.err (!%p5970_p0)
}
  0x2e   : > { %s6167_s15 = smov 128   ;;  %s6168_s24 = smov 8  }
  0x2f   : > { %5729 = dma.hbm_to_vmem [thread:$0]  (!%p6297_p11), %s8462_s1, 1024, %s6290_s18, [#allocation6], %s6167_s15, %s6167_s15, %s6168_s24  }
  0x30   : > { %s5974_s25 = scalar_lea.hbm %s8470_s9, 2048 }
  0x31   : > { %p5975_p1 = scmp.ne.s32.totalorder %s8470_s9, %s5974_s25  ;;  %p5981_p10 = scmp.lt.u32.totalorder %s5974_s25, %s8470_s9 }
  0x33   : > { %p5977_p2 = pnand %p5975_p1, %p6313_p13 }
  0x35   : > { %p5978_p6 = pneg %p5977_p2 }
  0x37   : > { %p5983_p3 = pnand %p5981_p10, %p5978_p6 }
  0x39   : > { %5986 = shalt.err (!%p5983_p3)
}
  0x3a   : > { %s5987_s18 = scalar_lea.vmem %s6301_s21, 2048  ;;  %p5995_p12 = scmp.lt.s32.totalorder %s6301_s21, %s6301_s21 }
  0x3b   : > { %p5988_p5 = scmp.ne.s32.totalorder %s6301_s21, %s5987_s18  ;;  %p5996_p0 = scmp.lt.s32.totalorder %s5987_s18, %s5987_s18 }
  0x3d   : > { %p5990_p7 = pnand %p5988_p5, %p6313_p13  ;;  %p5997_p1 = por %p5996_p0, %p5995_p12 }
  0x3f   : > { %p5991_p9 = pneg %p5990_p7 }
  0x41   : > { %p5998_p2 = pnand %p5997_p1, %p5991_p9 }
  0x43   : > { %6001 = shalt.err (!%p5998_p2)
}
  0x44   : > { %5735 = dma.hbm_to_vmem [thread:$0]  (!%p6297_p11), %s8470_s9, 2048, %s6301_s21, [#allocation9], %s6167_s15, %s6167_s15, %s6168_s24  }
  0x45   : > { %s6002_s30 = scalar_lea.hbm %s8468_s7, 2048 }
  0x46   : > { %p6003_p6 = scmp.ne.s32.totalorder %s8468_s7, %s6002_s30  ;;  %p6009_p5 = scmp.lt.u32.totalorder %s6002_s30, %s8468_s7 }
  0x48   : > { %p6005_p10 = pnand %p6003_p6, %p6313_p13 }
  0x4a   : > { %p6006_p3 = pneg %p6005_p10 }
  0x4c   : > { %p6011_p7 = pnand %p6009_p5, %p6006_p3 }
  0x4e   : > { %6014 = shalt.err (!%p6011_p7)
}
  0x4f   : > { %s6015_s18 = scalar_lea.vmem %s381_s23, 2048  ;;  %p6023_p1 = scmp.lt.s32.totalorder %s381_s23, %s381_s23 }
  0x50   : > { %p6016_p9 = scmp.ne.s32.totalorder %s381_s23, %s6015_s18  ;;  %p6024_p2 = scmp.lt.s32.totalorder %s6015_s18, %s6015_s18 }
  0x52   : > { %p6018_p12 = pnand %p6016_p9, %p6313_p13  ;;  %p6025_p4 = por %p6024_p2, %p6023_p1 }
  0x54   : > { %p6019_p0 = pneg %p6018_p12 }
  0x56   : > { %p6026_p8 = pnand %p6025_p4, %p6019_p0 }
  0x58   : > { %6029 = shalt.err (!%p6026_p8)
}
  0x59   : > { %5732 = dma.hbm_to_vmem [thread:$0]  (!%p6297_p11), %s8468_s7, 2048, %s381_s23, [#allocation6], %s6167_s15, %s6167_s15, %s6168_s24  }
  0x5a   : > { %s6169_s8 = smov [#allocation10]   ;;  %s6030_s17 = scalar_lea.hbm %s8472_s11, 2048 }
  0x5b   : > { %s412_s10 = sshll.u32 %s6169_s8, 4  ;;  %p6031_p4 = scmp.ne.s32.totalorder %s8472_s11, %s6030_s17  ;;  %s413_s10 = int_to_ptr.vmem [resolvable:$true] %s412_s10 }
  0x5c   : > { %p6037_p10 = scmp.lt.u32.totalorder %s6030_s17, %s8472_s11 }
  0x5d   : > { %p6033_p8 = pnand %p6031_p4, %p6313_p13 }
  0x5f   : > { %p6034_p6 = pneg %p6033_p8 }
  0x61   : > { %p6039_p3 = pnand %p6037_p10, %p6034_p6 }
  0x63   : > { %6042 = shalt.err (!%p6039_p3)
}
  0x64   : > { %s6043_s23 = scalar_lea.vmem %s413_s10, 2048  ;;  %p6051_p12 = scmp.lt.s32.totalorder %s413_s10, %s413_s10 }
  0x65   : > { %p6044_p5 = scmp.ne.s32.totalorder %s413_s10, %s6043_s23  ;;  %p6052_p0 = scmp.lt.s32.totalorder %s6043_s23, %s6043_s23 }
  0x67   : > { %p6046_p7 = pnand %p6044_p5, %p6313_p13  ;;  %p6053_p1 = por %p6052_p0, %p6051_p12 }
  0x69   : > { %p6047_p9 = pneg %p6046_p7 }
  0x6b   : > { %p6054_p2 = pnand %p6053_p1, %p6047_p9 }
  0x6d   : > { %6057 = shalt.err (!%p6054_p2)
}
  0x6e   : > { %5738 = dma.hbm_to_vmem [thread:$0]  (!%p6297_p11), %s8472_s11, 2048, %s413_s10, [#allocation9], %s6167_s15, %s6167_s15, %s6168_s24  }
  0x6f   : > { %s6407_s13 = sadd.s32 1, %s6162_s28   ;;  %s38_s19 = sadd.s32 1, %s6158_s27 }
  0x70   : > { %s35_s8 = ssub.s32 %s6162_s28, %s6407_s13  ;;  %p45_p13 = scmp.ne.s32.totalorder %s6158_s27, %s6154_s26 }
  0x71   : > { %p36_p4 = scmp.eq.s32.totalorder %s35_s8, 0  ;;  %p46_p8 = scmp.eq.s32.totalorder %s6162_s28, 0 }
  0x72   : > { %p8546_p6 = scmp.eq.s32.totalorder %s6267_s29, 1  ;;  %p5751_p3 = scmp.lt.s32.totalorder %s6162_s28, 2 }
  0x73   : > { %s6423_s30 = scalar_select %p36_p4, %s6158_s27, %s38_s19  }
  0x74   : > { %p6417_p10 = por %p8546_p6, %p45_p13  ;;  %p47_p5 = por %p46_p8, %p45_p13 }
  0x75   : > { %s429_s17 = sand.u32 1, %s6158_s27   ;;  %s4426_s10 = sshll.u32 %s6162_s28, 13 }
  0x76   : > { %s4339_s20 = sshll.u32 %s429_s17, 9  ;;  %s6430_s18 = scalar_lea.hbm %s8461_s0, %s4426_s10 }
  0x77   : > { %s433_s23 = scalar_lea.vmem [#allocation2], %s4339_s20  ;;  %p6434_p11 = pnand %p5751_p3, %p47_p5 }
  0x78   : > { %s441_s21 = sshll.u32 %s433_s23, 4  ;;  %s6438_s19 = scalar_lea.sflag [#allocation3], %s429_s17  ;;  %s6432_s21 = int_to_ptr.vmem [resolvable:$true] %s441_s21 }
  0x79   : > { %s6058_s8 = scalar_lea.hbm %s6430_s18, 8192  ;;  %p6060_p9 = pneg %p6434_p11 }
  0x7a   : > { %p6059_p7 = scmp.ne.s32.totalorder %s6430_s18, %s6058_s8  ;;  %s6063_s22 = scalar_lea.hbm %s8461_s0, 16384 }
  0x7b   : > { %p6064_p1 = scmp.lt.u32.totalorder %s6430_s18, %s8461_s0  ;;  %p6065_p2 = scmp.lt.u32.totalorder %s6063_s22, %s6058_s8 }
  0x7c   : > { %p6061_p12 = pnand %p6060_p9, %p6059_p7  ;;  %p6067_p4 = scmp.lt.u32.totalorder %s6058_s8, %s6430_s18 }
  0x7d   : > { %p6066_p13 = por %p6065_p2, %p6064_p1 }
  0x7e   : > { %p6062_p0 = pneg %p6061_p12 }
  0x7f   : > { %p6068_p8 = por %p6067_p4, %p6066_p13 }
  0x81   : > { %p6069_p6 = pnand %p6068_p8, %p6062_p0 }
  0x83   : > { %6072 = shalt.err (!%p6069_p6)
}
  0x84   : > { %s6073_s17 = scalar_lea.vmem %s6432_s21, 8192  ;;  %s6170_s20 = smov [#allocation2]  }
  0x85   : > { %p6074_p3 = scmp.ne.s32.totalorder %s6432_s21, %s6073_s17  ;;  %s6078_s10 = sshll.u32 %s6170_s20, 4  ;;  %s6079_s10 = int_to_ptr.vmem [resolvable:$false] %s6078_s10 }
  0x86   : > { %s6080_s25 = scalar_lea.vmem %s6079_s10, 16384  ;;  %p6081_p12 = scmp.lt.s32.totalorder %s6432_s21, %s6079_s10 }
  0x87   : > { %p6076_p5 = pnand %p6074_p3, %p6060_p9  ;;  %p6082_p1 = scmp.lt.s32.totalorder %s6080_s25, %s6073_s17 }
  0x89   : > { %p6077_p7 = pneg %p6076_p5  ;;  %p6083_p2 = por %p6082_p1, %p6081_p12 }
  0x8b   : > { %p6084_p13 = pnand %p6083_p2, %p6077_p7 }
  0x8d   : > { %6087 = shalt.err (!%p6084_p13)
}
  0x8e   : > { %5742 = dma.hbm_to_vmem [thread:$0]  (!%p6434_p11), %s6430_s18, 8192, %s6432_s21, %s6438_s19, %s6167_s15, %s6167_s15, %s6168_s24  }
  0x8f   : > { %p8549_p9 = scmp.ne.s32.totalorder %s8543_s16, 0 }
  0x91   : > { %453 = sbr.rel (%p8549_p9) target bundleno = 1364 (0x554), region = 72 }
  0x98   : > { %s6472_s8 = sand.u32 1, %s6154_s26   ;;  %p8550_p0 = scmp.ne.s32.totalorder %s8540_s14, 0 }
  0x99   : > { %s4344_s22 = sshll.u32 %s6472_s8, 9  ;;  %s456_s23 = scalar_lea.sflag [#allocation3], %s6472_s8 }
  0x9a   : > { %s6476_s17 = scalar_lea.vmem [#allocation2], %s4344_s22 }
  0x9b   : > { %6133 = dma.done.wait (%p8550_p0), %s456_s23, 8192  }
  0x9c   : > { %6135 = vsyncadd (%p8550_p0), %s456_s23, 4294959104  ;;  %p8551_p11 = scmp.eq.s32.totalorder %s6267_s29, 0 }
  0x9e   : > { %6137 = dma.done.wait (%p8551_p11), [#allocation6], 3072   ;;  %p8552_p4 = pmov %p8551_p11 }
  0xa0   : > { %6139 = vsyncadd (%p8552_p4), [#allocation6], 4294964224  ;;  %p8553_p8 = pmov %p8552_p4 }
  0xa1   : > { %p8554_p6 = pmov %p8552_p4 }
  0xa2   : > { %6141 = dma.done.wait (%p8553_p8), [#allocation9], 4096  }
  0xa3   : > { %6143 = vsyncadd (%p8554_p6), [#allocation9], 4294963200  ;;  %v8484_v0 = vmov 0.0|0.0   ;;  %vm6172_vm0 = vmmov 0   ;;  %v8482_v1 = vmov 0.0   ;;  %v907_v2 = vld [vmem:[#allocation7] sm:$0xff] }
  0xa4   : > { %5512 = vmatprep.subr.bf16.mxu1 %v8484_v0  ;;  %5488 = vmatprep.subr.bf16.mxu0 %v8484_v0  ;;  %v908_v3 = vld [vmem:[#allocation7 + $0x8] sm:$0xff]  ;;  %v783_v4 = vld [vmem:[%s8466_s5] sm:$0xff]  ;;  %v909_v7 = vld [vmem:[#allocation7 + $0x10] sm:$0xff]  ;;  %vm815_vm1 = vcmask 1041409   ;;  %vm818_vm2 = vcmask 1042434   ;;  %vm821_vm3 = vcmask 1043459  }
  0xa5   : > { %4853 = vmatprep.mubr.msk.f32.mxu0 %vm6172_vm0, %v8482_v1  ;;  %4888 = vmatprep.mubr.msk.f32.mxu1 %vm6172_vm0, %v8482_v1  ;;  %v6499_v5 = vpack.c.bf16 %v908_v3, %v907_v2  ;;  %v784_v6 = vld [vmem:[%s8466_s5 + $0x8] sm:$0xff]  ;;  %v910_v8 = vld [vmem:[#allocation7 + $0x18] sm:$0xff]  ;;  %v785_v10 = vld [vmem:[%s8466_s5 + $0x10] sm:$0xff]  ;;  %vm824_vm4 = vcmask 1044484   ;;  %vm827_vm5 = vcmask 1045509   ;;  %vm830_vm6 = vcmask 1046534  }
  0xa6   : > { %v5489_v9 = vpack.c.bf16 %v784_v6, %v783_v4  ;;  %v786_v11 = vld [vmem:[%s8466_s5 + $0x18] sm:$0xff]  ;;  %v6511_v12 = vpack.c.bf16 %v910_v8, %v909_v7  ;;  %v911_v14 = vld [vmem:[#allocation7 + $0x20] sm:$0xff]  ;;  %v912_v15 = vld [vmem:[#allocation7 + $0x28] sm:$0xff]  ;;  %vm833_vm7 = vcmask 1047559   ;;  %s8648_s15 = sld [smem:[#allocation78_spill]]  ;;  %s8706_s21 = sld [smem:[#allocation77_spill]] }
  0xa7   : > { %5514 = vmatpush3.bf16.msra.mxu1 %v6499_v5  ;;  %v5492_v13 = vpack.c.bf16 %v786_v11, %v785_v10  ;;  %v787_v16 = vld [vmem:[%s8466_s5 + $0x20] sm:$0xff]  ;;  %v788_v17 = vld [vmem:[%s8466_s5 + $0x28] sm:$0xff]  ;;  %v6522_v18 = vpack.c.bf16 %v912_v15, %v911_v14  ;;  %v913_v20 = vld [vmem:[#allocation7 + $0x30] sm:$0xff]  ;;  %vm2490_vm8 = vcmask 64512   ;;  %s8709_s10 = sld [smem:[#allocation79_spill]]  ;;  %s4349_s25 = sshll.u32 %s6472_s8, 3 }
  0xa8   : > { %5490 = vmatpush3.bf16.msra.mxu0 %v5489_v9  ;;  %5515 = vmatprep.subr.bf16.mxu1 %v8484_v0  ;;  %v5495_v19 = vpack.c.bf16 %v788_v17, %v787_v16  ;;  %v914_v21 = vld [vmem:[#allocation7 + $0x38] sm:$0xff]  ;;  %v789_v22 = vld [vmem:[%s8466_s5 + $0x30] sm:$0xff]  ;;  %v6533_v24 = vld [vmem:[%s6476_s17] sm:$0xff]  ;;  %s8769_s14 = sld [smem:[#allocation80_spill]]  ;;  %s4422_s16 = sshll.u32 %s6267_s29, 7 }
  0xa9   : > { %5491 = vmatprep.subr.bf16.mxu0 %v8484_v0  ;;  %v790_v23 = vld [vmem:[%s8466_s5 + $0x38] sm:$0xff]  ;;  %v6536_v25 = vpack.c.bf16 %v914_v21, %v913_v20  ;;  %v915_v26 = vld [vmem:[#allocation7 + $0x40] sm:$0xff]  ;;  %v6539_v27 = vld [vmem:[%s6476_s17 + $0x8] sm:$0xff]  ;;  %s8770_s19 = sld [smem:[#allocation81_spill]]  ;;  %s4211_s20 = scalar_lea.sflag [#allocation4], %s6472_s8 }
  0xaa   : > { %8555 = vst [vmem:[#allocation18_spill] sm:$0xff] %v6539_v27  ;;  %v6542_v28 = vld [vmem:[%s6476_s17 + $0x10] sm:$0xff]  ;;  %v5498_v29 = vpack.c.bf16 %v790_v23, %v789_v22  ;;  %v916_v30 = vld [vmem:[#allocation7 + $0x48] sm:$0xff]  ;;  %v791_v31 = vld [vmem:[%s8466_s5 + $0x40] sm:$0xff]  ;;  %v583_v33 = vadd.f32 %v6539_v27, %v6533_v24  ;;  %s6175_s29 = smov [#allocation11]  }
  0xab   : > { %5517 = vmatpush3.bf16.msra.mxu1 %v6511_v12  ;;  %8556 = vst [vmem:[#allocation19_spill] sm:$0xff] %v6542_v28  ;;  %v792_v32 = vld [vmem:[%s8466_s5 + $0x48] sm:$0xff]  ;;  %v6555_v34 = vld [vmem:[%s6476_s17 + $0x18] sm:$0xff]  ;;  %v6558_v35 = vld [vmem:[%s6476_s17 + $0x40] sm:$0xff]  ;;  %v6575_v43 = vpack.c.bf16 %v916_v30, %v915_v26 }
  0xac   : > { %5493 = vmatpush3.bf16.msra.mxu0 %v5492_v13  ;;  %5518 = vmatprep.subr.bf16.mxu1 %v8484_v0  ;;  %8557 = vst [vmem:[#allocation20_spill] sm:$0xff] %v6555_v34  ;;  %8558 = vst [vmem:[#allocation21_spill] sm:$0xff] %v6558_v35  ;;  %v6561_v36 = vld [vmem:[%s6476_s17 + $0x48] sm:$0xff]  ;;  %v917_v37 = vld [vmem:[#allocation7 + $0x50] sm:$0xff]  ;;  %v584_v41 = vadd.f32 %v583_v33, %v6542_v28  ;;  %v5501_v47 = vpack.c.bf16 %v792_v32, %v791_v31 }
  0xad   : > { %5494 = vmatprep.subr.bf16.mxu0 %v8484_v0  ;;  %8559 = vst [vmem:[#allocation22_spill] sm:$0xff] %v6561_v36  ;;  %v918_v38 = vld [vmem:[#allocation7 + $0x58] sm:$0xff]  ;;  %v6566_v39 = vld [vmem:[%s8466_s5 + $0x50] sm:$0xff]  ;;  %v596_v42 = vadd.f32 %v6561_v36, %v6558_v35  ;;  %v6581_v45 = vld [vmem:[%s6476_s17 + $0x20] sm:$0xff] }
  0xae   : > { %v6569_v40 = vld [vmem:[%s6476_s17 + $0x50] sm:$0xff]  ;;  %v794_v44 = vld [vmem:[%s8466_s5 + $0x58] sm:$0xff]  ;;  %8561 = vst [vmem:[#allocation24_spill] sm:$0xff] %v6581_v45  ;;  %v6588_v48 = vld [vmem:[%s6476_s17 + $0x80] sm:$0xff]  ;;  %v585_v51 = vadd.f32 %v584_v41, %v6555_v34  ;;  %v6629_v3 = vpack.c.bf16 %v918_v38, %v917_v37 }
  0xaf   : > { %5520 = vmatpush3.bf16.msra.mxu1 %v6522_v18  ;;  %8560 = vst [vmem:[#allocation23_spill] sm:$0xff] %v6569_v40  ;;  %v6584_v46 = vld [vmem:[%s6476_s17 + $0x58] sm:$0xff]  ;;  %8563 = vst [vmem:[#allocation26_spill] sm:$0xff] %v6588_v48  ;;  %v6591_v49 = vld [vmem:[%s6476_s17 + $0x88] sm:$0xff]  ;;  %v597_v52 = vadd.f32 %v596_v42, %v6569_v40  ;;  %v5504_v4 = vpack.c.bf16 %v794_v44, %v6566_v39 }
  0xb0   : > { %5496 = vmatpush3.bf16.msra.mxu0 %v5495_v19  ;;  %5521 = vmatprep.subr.bf16.mxu1 %v8484_v0  ;;  %8562 = vst [vmem:[#allocation25_spill] sm:$0xff] %v6584_v46  ;;  %8564 = vst [vmem:[#allocation27_spill] sm:$0xff] %v6591_v49  ;;  %v6594_v50 = vld [vmem:[%s6476_s17 + $0x90] sm:$0xff]  ;;  %v6600_v53 = vld [vmem:[%s6476_s17 + $0x28] sm:$0xff]  ;;  %v609_v55 = vadd.f32 %v6591_v49, %v6588_v48  ;;  %v586_v63 = vadd.f32 %v585_v51, %v6581_v45 }
  0xb1   : > { %5497 = vmatprep.subr.bf16.mxu0 %v8484_v0  ;;  %8565 = vst [vmem:[#allocation28_spill] sm:$0xff] %v6594_v50  ;;  %8566 = vst [vmem:[#allocation29_spill] sm:$0xff] %v6600_v53  ;;  %v6603_v54 = vld [vmem:[%s6476_s17 + $0x60] sm:$0xff]  ;;  %v920_v57 = vld [vmem:[#allocation7 + $0x68] sm:$0xff]  ;;  %v598_v2 = vadd.f32 %v597_v52, %v6584_v46 }
  0xb2   : > { %8567 = vst [vmem:[#allocation30_spill] sm:$0xff] %v6603_v54  ;;  %v919_v56 = vld [vmem:[#allocation7 + $0x60] sm:$0xff]  ;;  %v6615_v59 = vld [vmem:[%s8466_s5 + $0x68] sm:$0xff]  ;;  %v6618_v60 = vld [vmem:[%s6476_s17 + $0x30] sm:$0xff]  ;;  %v610_v9 = vadd.f32 %v609_v55, %v6594_v50  ;;  %v587_v14 = vadd.f32 %v586_v63, %v6600_v53 }
  0xb3   : > { %5523 = vmatpush3.bf16.msra.mxu1 %v6536_v25  ;;  %v6610_v58 = vld [vmem:[%s8466_s5 + $0x60] sm:$0xff]  ;;  %8568 = vst [vmem:[#allocation31_spill] sm:$0xff] %v6618_v60  ;;  %v6621_v61 = vld [vmem:[%s6476_s17 + $0x98] sm:$0xff]  ;;  %8570 = vst [vmem:[#allocation33_spill] sm:$0xff] %v6629_v3  ;;  %v599_v15 = vadd.f32 %v598_v2, %v6603_v54  ;;  %v6692_v41 = vpack.c.bf16 %v920_v57, %v919_v56 }
  0xb4   : > { %5499 = vmatpush3.bf16.msra.mxu0 %v5498_v29  ;;  %5524 = vmatprep.subr.bf16.mxu1 %v8484_v0  ;;  %8569 = vst [vmem:[#allocation32_spill] sm:$0xff] %v6621_v61  ;;  %v6624_v62 = vld [vmem:[%s6476_s17 + $0xc0] sm:$0xff]  ;;  %v6633_v6 = vld [vmem:[%s6476_s17 + $0x68] sm:$0xff]  ;;  %v6639_v8 = vld [vmem:[%s6476_s17 + $0xd0] sm:$0xff]  ;;  %v611_v23 = vadd.f32 %v610_v9, %v6621_v61  ;;  %v588_v33 = vadd.f32 %v587_v14, %v6618_v60 }
  0xb5   : > { %5500 = vmatprep.subr.bf16.mxu0 %v8484_v0  ;;  %8571 = vst [vmem:[#allocation34_spill] sm:$0xff] %v6633_v6  ;;  %v6636_v7 = vld [vmem:[%s6476_s17 + $0xc8] sm:$0xff]  ;;  %8573 = vst [vmem:[#allocation36_spill] sm:$0xff] %v6639_v8  ;;  %v6644_v10 = vld [vmem:[%s6476_s17 + $0x38] sm:$0xff]  ;;  %v600_v37 = vadd.f32 %v599_v15, %v6633_v6  ;;  %v5507_v42 = vpack.c.bf16 %v6615_v59, %v6610_v58 }
  0xb6   : > { %8572 = vst [vmem:[#allocation35_spill] sm:$0xff] %v6636_v7  ;;  %8574 = vst [vmem:[#allocation37_spill] sm:$0xff] %v6644_v10  ;;  %v6647_v11 = vld [vmem:[%s6476_s17 + $0x70] sm:$0xff]  ;;  %v6650_v13 = vld [vmem:[%s6476_s17 + $0xa0] sm:$0xff]  ;;  %v622_v16 = vadd.f32 %v6636_v7, %v6624_v62  ;;  %v589_v58 = vadd.f32 %v588_v33, %v6644_v10 }
  0xb7   : > { %5526 = vmatpush3.bf16.msra.mxu1 %v6575_v43  ;;  %8575 = vst [vmem:[#allocation38_spill] sm:$0xff] %v6647_v11  ;;  %8576 = vst [vmem:[#allocation39_spill] sm:$0xff] %v6650_v13  ;;  %v921_v17 = vld [vmem:[#allocation7 + $0x70] sm:$0xff]  ;;  %v922_v19 = vld [vmem:[#allocation7 + $0x78] sm:$0xff]  ;;  %v612_v52 = vadd.f32 %v611_v23, %v6650_v13  ;;  %v601_v59 = vadd.f32 %v600_v37, %v6647_v11 }
  0xb8   : > { %5502 = vmatpush3.bf16.msra.mxu0 %v5501_v47  ;;  %5527 = vmatprep.subr.bf16.mxu1 %v8484_v0  ;;  %v6658_v20 = vld [vmem:[%s6476_s17 + $0xd8] sm:$0xff]  ;;  %v6661_v21 = vld [vmem:[%s6476_s17 + $0x100] sm:$0xff]  ;;  %v6664_v22 = vld [vmem:[%s6476_s17 + $0x108] sm:$0xff]  ;;  %v623_v38 = vadd.f32 %v622_v16, %v6639_v8  ;;  %8580 = vst [vmem:[#allocation43_spill] sm:$0xff] %v6692_v41  ;;  %v6730_v16 = vpack.c.bf16 %v922_v19, %v921_v17 }
  0xb9   : > { %5503 = vmatprep.subr.bf16.mxu0 %v8484_v0  ;;  %8577 = vst [vmem:[#allocation40_spill] sm:$0xff] %v6658_v20  ;;  %v6670_v26 = vld [vmem:[%s8466_s5 + $0x70] sm:$0xff]  ;;  %v6675_v29 = vld [vmem:[%s8466_s5 + $0x78] sm:$0xff]  ;;  %v6681_v31 = vld [vmem:[%s6476_s17 + $0xa8] sm:$0xff]  ;;  %v635_v39 = vadd.f32 %v6664_v22, %v6661_v21 }
  0xba   : > { %v6678_v30 = vld [vmem:[%s6476_s17 + $0x78] sm:$0xff]  ;;  %8579 = vst [vmem:[#allocation42_spill] sm:$0xff] %v6681_v31  ;;  %v6684_v32 = vld [vmem:[%s6476_s17 + $0x110] sm:$0xff]  ;;  %v6700_v47 = vld [vmem:[%s6476_s17 + $0xe0] sm:$0xff]  ;;  %v624_v63 = vadd.f32 %v623_v38, %v6658_v20  ;;  %v613_v9 = vadd.f32 %v612_v52, %v6681_v31  ;;  %v590_v38 = vrot.slane %v589_v58, 4  ;;  %v5510_v17 = vpack.c.bf16 %v6675_v29, %v6670_v26 }
  0xbb   : > { %8578 = vst [vmem:[#allocation41_spill] sm:$0xff] %v6678_v30  ;;  %5529 = vmatpush3.bf16.msra.mxu1 %v6629_v3  ;;  %v6697_v44 = vld [vmem:[%s6476_s17 + $0xb0] sm:$0xff]  ;;  %8582 = vst [vmem:[#allocation45_spill] sm:$0xff] %v6700_v47  ;;  %v6703_v51 = vld [vmem:[%s6476_s17 + $0x118] sm:$0xff]  ;;  %v636_v14 = vadd.f32 %v635_v39, %v6684_v32  ;;  %v602_v1 = vadd.f32 %v601_v59, %v6678_v30 }
  0xbc   : > { %8581 = vst [vmem:[#allocation44_spill] sm:$0xff] %v6697_v44  ;;  %5505 = vmatpush3.bf16.msra.mxu0 %v5504_v4  ;;  %5530 = vmatprep.subr.bf16.mxu1 %v8484_v0  ;;  %v6708_v55 = vld [vmem:[%s6476_s17 + $0x140] sm:$0xff]  ;;  %v6711_v56 = vld [vmem:[%s6476_s17 + $0x148] sm:$0xff]  ;;  %v6714_v57 = vld [vmem:[%s6476_s17 + $0x150] sm:$0xff]  ;;  %v625_v52 = vadd.f32 %v624_v63, %v6700_v47  ;;  %v614_v20 = vadd.f32 %v613_v9, %v6697_v44  ;;  %v8587_v47 = vmov 0.0|0.0  }
  0xbd   : > { %5506 = vmatprep.subr.bf16.mxu0 %v8484_v0  ;;  %v6721_v2 = vld [vmem:[%s6476_s17 + $0xb8] sm:$0xff]  ;;  %v6724_v4 = vld [vmem:[%s6476_s17 + $0xe8] sm:$0xff]  ;;  %v648_v15 = vadd.f32 %v6711_v56, %v6708_v55  ;;  %8585 = vst [vmem:[#allocation48_spill] sm:$0xff] %v6730_v16  ;;  %v6733_v23 = vld [vmem:[%s6476_s17 + $0x120] sm:$0xff]  ;;  %v637_v59 = vadd.f32 %v636_v14, %v6703_v51  ;;  %v591_v7 = vadd.f32 %v590_v38, %v589_v58  ;;  %v603_v31 = vrot.slane %v602_v1, 4 }
  0xbe   : > { %8583 = vst [vmem:[#allocation46_spill] sm:$0xff] %v6721_v2  ;;  %8584 = vst [vmem:[#allocation47_spill] sm:$0xff] %v6724_v4  ;;  %v6736_v33 = vld [vmem:[%s6476_s17 + $0x158] sm:$0xff]  ;;  %v6739_v37 = vld [vmem:[%s6476_s17 + $0x180] sm:$0xff]  ;;  %v626_v9 = vadd.f32 %v625_v52, %v6724_v4  ;;  %v615_v13 = vadd.f32 %v614_v20, %v6721_v2 }
  0xbf   : > { %5532 = vmatpush3.bf16.msra.mxu1 %v6692_v41  ;;  %v6747_v19 = vld [vmem:[%s6476_s17 + $0xf0] sm:$0xff]  ;;  %v6750_v39 = vld [vmem:[%s6476_s17 + $0x188] sm:$0xff]  ;;  %v649_v63 = vadd.f32 %v648_v15, %v6714_v57  ;;  %v6760_v26 = vld [vmem:[%s6476_s17 + $0xf8] sm:$0xff]  ;;  %v638_v61 = vadd.f32 %v637_v59, %v6733_v23  ;;  %v592_v50 = vrot.slane %v591_v7, 2  ;;  %v604_v49 = vadd.f32 %v603_v31, %v602_v1 }
  0xc0   : > { %8586 = vst [vmem:[#allocation49_spill] sm:$0xff] %v6747_v19  ;;  %v6753_v0 = vld [vmem:[%s6476_s17 + $0x190] sm:$0xff]  ;;  %5508 = vmatpush3.bf16.msra.mxu0 %v5507_v42  ;;  %5533 = vmatprep.subr.bf16.mxu1 %v8587_v47  ;;  %8588 = vst [vmem:[#allocation50_spill] sm:$0xff] %v6760_v26  ;;  %v6763_v29 = vld [vmem:[%s6476_s17 + $0x128] sm:$0xff]  ;;  %v661_v14 = vadd.f32 %v6750_v39, %v6739_v37  ;;  %v627_v48 = vadd.f32 %v626_v9, %v6747_v19  ;;  %v616_v59 = vrot.slane %v615_v13, 4 }
  0xc1   : > { %v6766_v8 = vld [vmem:[%s6476_s17 + $0x160] sm:$0xff]  ;;  %5509 = vmatprep.subr.bf16.mxu0 %v8587_v47  ;;  %v6773_v42 = vld [vmem:[%s6476_s17 + $0x198] sm:$0xff]  ;;  %v6779_v44 = vld [vmem:[%s6476_s17 + $0x1c8] sm:$0xff]  ;;  %v650_v58 = vadd.f32 %v649_v63, %v6736_v33  ;;  %v639_v63 = vadd.f32 %v638_v61, %v6763_v29  ;;  %v605_v19 = vrot.slane %v604_v49, 2 }
  0xc2   : > { %v6776_v15 = vld [vmem:[%s6476_s17 + $0x1c0] sm:$0xff]  ;;  %v6785_v38 = vld [vmem:[%s6476_s17 + $0x130] sm:$0xff]  ;;  %v6788_v52 = vld [vmem:[%s6476_s17 + $0x168] sm:$0xff]  ;;  %v662_v30 = vadd.f32 %v661_v14, %v6753_v0  ;;  %v593_v14 = vadd.f32 %v592_v50, %v591_v7  ;;  %v628_v61 = vadd.f32 %v627_v48, %v6760_v26  ;;  %v617_v54 = vadd.f32 %v616_v59, %v615_v13 }
  0xc3   : > { %v6791_v4 = vld [vmem:[%s6476_s17 + $0x1d0] sm:$0xff]  ;;  %5535 = vmatpush3.bf16.msra.mxu1 %v6730_v16  ;;  %v6797_v20 = vld [vmem:[%s6476_s17 + $0x1a0] sm:$0xff]  ;;  %v651_v2 = vadd.f32 %v650_v58, %v6766_v8  ;;  %v674_v11 = vadd.f32 %v6779_v44, %v6776_v15  ;;  %v6805_v1 = vld [vmem:[%s6476_s17 + $0x138] sm:$0xff]  ;;  %v606_v7 = vadd.f32 %v605_v19, %v604_v49 }
  0xc4   : > { %8589 = vst [vmem:[#allocation51_spill] sm:$0xff] %v6791_v4  ;;  %5511 = vmatpush3.bf16.msra.mxu0 %v5510_v17  ;;  %5561 = vmatprep.subr.bf16.mxu1 %v6499_v5  ;;  %v6808_v31 = vld [vmem:[%s6476_s17 + $0x170] sm:$0xff]  ;;  %v6811_v9 = vld [vmem:[%s6476_s17 + $0x1d8] sm:$0xff]  ;;  %v663_v58 = vadd.f32 %v662_v30, %v6773_v42  ;;  %v6816_v6 = vld [vmem:[%s6476_s17 + $0x1a8] sm:$0xff]  ;;  %v640_v17 = vadd.f32 %v639_v63, %v6785_v38  ;;  %v594_v48 = vrot.slane %v593_v14, 1  ;;  %v629_v30 = vrot.slane %v628_v61, 4 }
  0xc5   : > { %8590 = vst [vmem:[#allocation52_spill] sm:$0xff] %v6811_v9  ;;  %v652_v46 = vadd.f32 %v651_v2, %v6788_v52  ;;  %v675_v40 = vadd.f32 %v674_v11, %v6791_v4  ;;  %5536 = vmatprep.subr.bf16.mxu0 %v8587_v47  ;;  %v6823_v36 = vld [vmem:[%s6476_s17 + $0x178] sm:$0xff]  ;;  %v6826_v50 = vld [vmem:[%s6476_s17 + $0x1e0] sm:$0xff]  ;;  %v6830_v13 = vld [vmem:[%s6476_s17 + $0x1b0] sm:$0xff]  ;;  %v618_v59 = vrot.slane %v617_v54, 2  ;;  %v607_v60 = vrot.slane %v606_v7, 1 }
  0xc6   : > { %8591 = vst [vmem:[#allocation53_spill] sm:$0xff] %v6826_v50  ;;  %v664_v26 = vadd.f32 %v663_v58, %v6797_v20  ;;  %v641_v2 = vadd.f32 %v640_v17, %v6805_v1  ;;  %v6836_v35 = vld [vmem:[%s6476_s17 + $0x1e8] sm:$0xff]  ;;  %v595_v10 = vadd.f32 %v594_v48, %v593_v14  ;;  %v630_v53 = vadd.f32 %v629_v30, %v628_v61  ;;  %v6840_v19 = vld [vmem:[%s6476_s17 + $0x1b8] sm:$0xff]  ;;  %v6845_v28 = vld [vmem:[%s6476_s17 + $0x1f0] sm:$0xff] }
  0xc7   : > { %v653_v11 = vadd.f32 %v652_v46, %v6808_v31  ;;  %v676_v63 = vadd.f32 %v675_v40, %v6811_v9  ;;  %8592 = vst [vmem:[#allocation54_spill] sm:$0xff] %v6836_v35  ;;  %v619_v58 = vadd.f32 %v618_v59, %v617_v54  ;;  %8593 = vst [vmem:[#allocation55_spill] sm:$0xff] %v6845_v28  ;;  %v6852_v54 = vld [vmem:[%s8463_s2] ss:$0 sm:$0xff]  ;;  %v6855_v59 = vld [vmem:[%s6476_s17 + $0x1f8] sm:$0xff]  ;;  %s8417_s17 = scalar_lea.hbm %s8770_s19, %s4422_s16 }
  0xc8   : > { %v665_v49 = vadd.f32 %v664_v26, %v6816_v6  ;;  %v642_v45 = vrot.slane %v641_v2, 4  ;;  %v608_v46 = vadd.f32 %v607_v60, %v606_v7  ;;  %v631_v40 = vrot.slane %v630_v53, 2 }
  0xc9   : > { %v654_v34 = vadd.f32 %v653_v11, %v6823_v36  ;;  %v677_v17 = vadd.f32 %v676_v63, %v6826_v50  ;;  %v688_v14 = vmul.f32 0.015625, %v595_v10  ;;  %v620_v48 = vrot.slane %v619_v58, 1 }
  0xca   : > { %v666_v27 = vadd.f32 %v665_v49, %v6830_v13  ;;  %v643_v61 = vadd.f32 %v642_v45, %v641_v2  ;;  %v632_v11 = vadd.f32 %v631_v40, %v630_v53  ;;  %v689_v60 = vmul.f32 0.015625, %v608_v46 }
  0xcb   : > { %v655_v30 = vrot.slane %v654_v34, 4  ;;  %v678_v26 = vadd.f32 %v677_v17, %v6836_v35  ;;  %v621_v7 = vadd.f32 %v620_v48, %v619_v58  ;;  %v703_v17 = vadd.f32 %v6852_v54, %v688_v14 }
  0xcc   : > { %v667_v63 = vadd.f32 %v666_v27, %v6840_v19  ;;  %v644_v49 = vrot.slane %v643_v61, 2  ;;  %v633_v2 = vrot.slane %v632_v11, 1  ;;  %v704_v41 = vadd.f32 %v6852_v54, %v689_v60 }
  0xcd   : > { %v656_v10 = vadd.f32 %v655_v30, %v654_v34  ;;  %v679_v45 = vadd.f32 %v678_v26, %v6845_v28  ;;  %v690_v53 = vmul.f32 0.015625, %v621_v7 }
  0xce   : > { %v668_v16 = vrot.slane %v667_v63, 4  ;;  %v645_v35 = vadd.f32 %v644_v49, %v643_v61  ;;  %v634_v40 = vadd.f32 %v633_v2, %v632_v11  ;;  %v814_v46 = vrot.slane %v704_v41, 7 }
  0xcf   : > { %v657_v50 = vrot.slane %v656_v10, 2  ;;  %v680_v3 = vadd.f32 %v679_v45, %v6855_v59  ;;  %v705_v34 = vadd.f32 %v6852_v54, %v690_v53 }
  0xd0   : > { %v669_v27 = vadd.f32 %v668_v16, %v667_v63  ;;  %v646_v9 = vrot.slane %v645_v35, 1  ;;  %v691_v26 = vmul.f32 0.015625, %v634_v40  ;;  %v816_v28 = vsel %vm815_vm1, %v814_v46, %v703_v17 }
  0xd1   : > { %v658_v58 = vadd.f32 %v657_v50, %v656_v10  ;;  %v681_v48 = vrot.slane %v680_v3, 4  ;;  %v817_v49 = vrot.slane %v705_v34, 6 }
  0xd2   : > { %v670_v30 = vrot.slane %v669_v27, 2  ;;  %v647_v14 = vadd.f32 %v646_v9, %v645_v35  ;;  %v706_v7 = vadd.f32 %v6852_v54, %v691_v26  ;;  %v1000_v26 = vld [vmem:[#allocation8] sm:$0xff] }
  0xd3   : > { %v659_v60 = vrot.slane %v658_v58, 1  ;;  %v682_v61 = vadd.f32 %v681_v48, %v680_v3  ;;  %v819_v50 = vsel %vm818_vm2, %v817_v49, %v816_v28  ;;  %v6874_v49 = vld [vmem:[#allocation5] sm:$0xff] }
  0xd4   : > { %v671_v4 = vadd.f32 %v670_v30, %v669_v27  ;;  %v692_v11 = vmul.f32 0.015625, %v647_v14  ;;  %v820_v10 = vrot.slane %v706_v7, 5  ;;  %v1001_v14 = vld [vmem:[#allocation8 + $0x8] sm:$0xff] }
  0xd5   : > { %v660_v16 = vadd.f32 %v659_v60, %v658_v58  ;;  %v683_v41 = vrot.slane %v682_v61, 2 }
  0xd6   : > { %v672_v63 = vrot.slane %v671_v4, 1  ;;  %v707_v17 = vadd.f32 %v6852_v54, %v692_v11  ;;  %v822_v35 = vsel %vm821_vm3, %v820_v10, %v819_v50  ;;  %v1003_v11 = vld [vmem:[#allocation8 + $0x18] sm:$0xff]  ;;  %v6880_v50 = vadd.f32 %v6874_v49, %v6624_v62  ;;  %v6889_v10 = vld [vmem:[#allocation5 + $0x8] sm:$0xff] }
  0xd7   : > { %v684_v45 = vadd.f32 %v683_v41, %v682_v61  ;;  %v693_v2 = vmul.f32 0.015625, %v660_v16  ;;  %v6876_v16 = vpack.c.bf16 %v1001_v14, %v1000_v26  ;;  %v1002_v41 = vld [vmem:[#allocation8 + $0x10] sm:$0xff]  ;;  %v1005_v62 = vld [vmem:[#allocation8 + $0x28] sm:$0xff]  ;;  %v8596_v26 = vld [vmem:[#allocation51_spill] sm:$0xff] }
  0xd8   : > { %v673_v53 = vadd.f32 %v672_v63, %v671_v4  ;;  %v823_v40 = vrot.slane %v707_v17, 4  ;;  %v6895_v17 = vpack.c.bf16 %v1003_v11, %v1002_v41  ;;  %v8598_v14 = vld [vmem:[#allocation52_spill] sm:$0xff]  ;;  %v8601_v41 = vld [vmem:[#allocation53_spill] sm:$0xff] }
  0xd9   : > { %v685_v3 = vrot.slane %v684_v45, 1  ;;  %v708_v9 = vadd.f32 %v6852_v54, %v693_v2  ;;  %v1004_v2 = vld [vmem:[#allocation8 + $0x20] sm:$0xff] }
  0xda   : > { %v694_v27 = vmul.f32 0.015625, %v673_v53  ;;  %v825_v58 = vsel %vm824_vm4, %v823_v40, %v822_v35  ;;  %v6897_v53 = vld [vmem:[#allocation5 + $0x18] sm:$0xff]  ;;  %v6899_v35 = vld [vmem:[#allocation5 + $0x20] sm:$0xff]  ;;  %v6913_v40 = vld [vmem:[#allocation5 + $0x30] sm:$0xff] }
  0xdb   : > { %v686_v46 = vadd.f32 %v685_v3, %v684_v45  ;;  %v826_v28 = vrot.slane %v708_v9, 3  ;;  %v6891_v45 = vld [vmem:[#allocation5 + $0x10] sm:$0xff]  ;;  %v6907_v3 = vadd.f32 %v6889_v10, %v6664_v22  ;;  %v6911_v9 = vld [vmem:[#allocation5 + $0x28] sm:$0xff]  ;;  %v6927_v22 = vadd.f32 %v6899_v35, %v6733_v23 }
  0xdc   : > { %v709_v48 = vadd.f32 %v6852_v54, %v694_v27  ;;  %v6915_v27 = vld [vmem:[#allocation5 + $0x38] sm:$0xff]  ;;  %v8594_v23 = vmov 0.0   ;;  %v7052_v11 = vadd.f32 %v6899_v35, %v8601_v41 }
  0xdd   : > { %v695_v34 = vmul.f32 0.015625, %v686_v46  ;;  %v828_v30 = vsel %vm827_vm5, %v826_v28, %v825_v58  ;;  %v6919_v46 = vadd.f32 %v6891_v45, %v6684_v32  ;;  %v6937_v32 = vadd.f32 %v6913_v40, %v6785_v38 }
  0xde   : > { %v829_v4 = vrot.slane %v709_v48, 2  ;;  %v6948_v58 = vadd.f32 %v6874_v49, %v6708_v55  ;;  %v6956_v38 = vadd.f32 %v6891_v45, %v6714_v57  ;;  %v6958_v28 = vpack.c.bf16 %v1005_v62, %v1004_v2  ;;  %v8603_v2 = vld [vmem:[#allocation54_spill] sm:$0xff] }
  0xdf   : > { %v710_v60 = vadd.f32 %v6852_v54, %v695_v34  ;;  %v6887_v54 = vadd.f32 %v6874_v49, %v6533_v24  ;;  %v6903_v24 = vadd.f32 %v6874_v49, %v6661_v21  ;;  %v6923_v21 = vadd.f32 %v6897_v53, %v6703_v51 }
  0xe0   : > { %v831_v61 = vsel %vm830_vm6, %v829_v4, %v828_v30  ;;  %v6941_v51 = vadd.f32 %v6915_v27, %v6805_v1  ;;  %v6962_v1 = vadd.f32 %v6897_v53, %v6736_v33  ;;  %v6966_v48 = vadd.f32 %v6899_v35, %v6766_v8  ;;  %v1006_v33 = vld [vmem:[#allocation8 + $0x30] sm:$0xff]  ;;  %v1011_v4 = vld [vmem:[#allocation8 + $0x58] sm:$0xff] }
  0xe1   : > { %v832_v7 = vrot.slane %v710_v60, 1  ;;  %v6970_v55 = vadd.f32 %v6911_v9, %v6788_v52  ;;  %v6980_v57 = vadd.f32 %v6915_v27, %v6823_v36  ;;  %v6984_v8 = vadd.f32 %v6874_v49, %v6739_v37  ;;  %v1010_v30 = vld [vmem:[#allocation8 + $0x50] sm:$0xff]  ;;  %v8600_v60 = vld [vmem:[#allocation33_spill] sm:$0xff] }
  0xe2   : > { %v6990_v52 = vadd.f32 %v6889_v10, %v6750_v39  ;;  %v6998_v36 = vadd.f32 %v6897_v53, %v6773_v42  ;;  %v7002_v37 = vadd.f32 %v6899_v35, %v6797_v20  ;;  %v7006_v34 = vadd.f32 %v6911_v9, %v6816_v6  ;;  %v1008_v6 = vld [vmem:[#allocation8 + $0x40] sm:$0xff]  ;;  %v1009_v20 = vld [vmem:[#allocation8 + $0x48] sm:$0xff]  ;;  %8602 = vst [vmem:[#allocation33_spill] sm:$0xff] %v7052_v11 }
  0xe3   : > { %v6883_v63 = vsel %vm833_vm7, %v832_v7, %v831_v61  ;;  %v7010_v39 = vadd.f32 %v6913_v40, %v6830_v13  ;;  %v7018_v42 = vadd.f32 %v6915_v27, %v6840_v19  ;;  %v7024_v13 = vadd.f32 %v6874_v49, %v6776_v15  ;;  %v1012_v61 = vld [vmem:[#allocation8 + $0x60] sm:$0xff]  ;;  %v1013_v7 = vld [vmem:[#allocation8 + $0x68] sm:$0xff] }
  0xe4   : > { %4854 = vmatmul.mubr.f32.vlgmr.msra.gmra.mrb[0].mxu0 %v6883_v63  ;;  %4889 = vmatmul.mubr.f32.vlgmr.msra.gmra.mrb[0].mxu1 %v6883_v63  ;;  %v7032_v19 = vadd.f32 %v6889_v10, %v6779_v44  ;;  %v7038_v15 = vadd.f32 %v6891_v45, %v8596_v26  ;;  %v7046_v44 = vadd.f32 %v6897_v53, %v8598_v14  ;;  %v1863_v26 = vld [vmem:[%s8464_s3] sm:$0xff]  ;;  %v1864_v14 = vld [vmem:[%s8464_s3 + $0x8] sm:$0xff] }
  0xe5   : > { %5563 = vmatpush3.bf16.msra.mxu1 %v6499_v5  ;;  %5538 = vmatpush3.bf16.msra.mxu0 %v6876_v16  ;;  %v6933_v5 = vadd.f32 %v6911_v9, %v6763_v29  ;;  %v6952_v29 = vadd.f32 %v6889_v10, %v6711_v56  ;;  %v6976_v56 = vadd.f32 %v6913_v40, %v6808_v31 }
  0xe6   : > { %5565 = vmatprep.subr.bf16.mxu1 %v6511_v12  ;;  %5539 = vmatprep.subr.bf16.mxu0 %v8587_v47  ;;  %v6994_v31 = vadd.f32 %v6891_v45, %v6753_v0  ;;  %8595 = vst [vmem:[#allocation56_spill] sm:$0xff] %v7032_v19  ;;  %8597 = vst [vmem:[#allocation51_spill] sm:$0xff] %v7038_v15  ;;  %v7060_v62 = vadd.f32 %v6911_v9, %v8603_v2 }
  0xe7   : > { %4958 = vmatprep.mubr.f32.mxu1 %v6887_v54  ;;  %4923 = vmatprep.mubr.msk.f32.mxu0 %vm6172_vm0, %v8594_v23  ;;  %8599 = vst [vmem:[#allocation52_spill] sm:$0xff] %v7046_v44  ;;  %v7088_v2 = vpack.c.bf16 %v1864_v14, %v1863_v26  ;;  %v8613_v14 = vld [vmem:[#allocation24_spill] sm:$0xff] }
  0xe8   : > { %8604 = vst [vmem:[#allocation53_spill] sm:$0xff] %v7060_v62  ;;  %v1874_v62 = vld [vmem:[%s8464_s3 + $0x58] sm:$0xff] }
  0xe9   : > { %5567 = vmatpush3.bf16.msra.mxu1 %v6511_v12  ;;  %5541 = vmatpush3.bf16.msra.mxu0 %v6895_v17  ;;  %v1007_v12 = vld [vmem:[#allocation8 + $0x38] sm:$0xff] }
  0xea   : > { %5569 = vmatprep.subr.bf16.mxu1 %v6522_v18  ;;  %5542 = vmatprep.subr.bf16.mxu0 %v8587_v47  ;;  %v7014_v0 = vpack.c.bf16 %v1007_v12, %v1006_v33  ;;  %v8605_v33 = vld [vmem:[#allocation43_spill] sm:$0xff]  ;;  %v1014_v12 = vld [vmem:[#allocation8 + $0x70] sm:$0xff] }
  0xed   : > { %5571 = vmatpush3.bf16.msra.mxu1 %v6522_v18  ;;  %5544 = vmatpush3.bf16.msra.mxu0 %v6958_v28  ;;  %v7028_v18 = vpack.c.bf16 %v1009_v20, %v1008_v6  ;;  %v1015_v6 = vld [vmem:[#allocation8 + $0x78] sm:$0xff] }
  0xee   : > { %5573 = vmatprep.subr.bf16.mxu1 %v6536_v25  ;;  %5545 = vmatprep.subr.bf16.mxu0 %v8587_v47  ;;  %v8606_v20 = vld [vmem:[#allocation55_spill] sm:$0xff] }
  0xf1   : > { %5575 = vmatpush3.bf16.msra.mxu1 %v6536_v25  ;;  %5547 = vmatpush3.bf16.msra.mxu0 %v7014_v0  ;;  %v7042_v25 = vpack.c.bf16 %v1011_v4, %v1010_v30  ;;  %v7066_v30 = vadd.f32 %v6913_v40, %v8606_v20  ;;  %v7070_v4 = vpack.c.bf16 %v1015_v6, %v1014_v12  ;;  %v1866_v6 = vld [vmem:[%s8464_s3 + $0x18] sm:$0xff]  ;;  %v8612_v20 = vld [vmem:[#allocation20_spill] sm:$0xff] }
  0xf2   : > { %5577 = vmatprep.subr.bf16.mxu1 %v6575_v43  ;;  %5548 = vmatprep.subr.bf16.mxu0 %v8587_v47  ;;  %v7107_v26 = vadd.f32 %v6897_v53, %v8612_v20  ;;  %v8614_v20 = vld [vmem:[#allocation29_spill] sm:$0xff] }
  0xf3   : > { %8607 = vst [vmem:[#allocation54_spill] sm:$0xff] %v7066_v30 }
  0xf5   : > { %5579 = vmatpush3.bf16.msra.mxu1 %v6575_v43  ;;  %5550 = vmatpush3.bf16.msra.mxu0 %v7028_v18  ;;  %v7056_v43 = vpack.c.bf16 %v1013_v7, %v1012_v61  ;;  %v8609_v61 = vld [vmem:[#allocation48_spill] sm:$0xff]  ;;  %v8610_v7 = vld [vmem:[#allocation18_spill] sm:$0xff] }
  0xf6   : > { %5581 = vmatprep.subr.bf16.mxu1 %v8600_v60  ;;  %5551 = vmatprep.subr.bf16.mxu0 %v8587_v47  ;;  %v7086_v41 = vadd.f32 %v6889_v10, %v8610_v7 }
  0xf9   : > { %5583 = vmatpush3.bf16.msra.mxu1 %v8600_v60  ;;  %5553 = vmatpush3.bf16.msra.mxu0 %v7042_v25  ;;  %v7080_v60 = vadd.f32 %v6915_v27, %v6855_v59  ;;  %v1865_v59 = vld [vmem:[%s8464_s3 + $0x10] sm:$0xff] }
  0xfa   : > { %5585 = vmatprep.subr.bf16.mxu1 %v8605_v33  ;;  %5554 = vmatprep.subr.bf16.mxu0 %v8587_v47  ;;  %v7118_v7 = vpack.c.bf16 %v1866_v6, %v1865_v59 }
  0xfb   : > { %8608 = vst [vmem:[#allocation43_spill] sm:$0xff] %v7080_v60  ;;  %v1872_v60 = vld [vmem:[%s8464_s3 + $0x48] sm:$0xff] }
  0xfd   : > { %5587 = vmatpush3.bf16.msra.mxu1 %v8605_v33  ;;  %5556 = vmatpush3.bf16.msra.mxu0 %v7056_v43  ;;  %v8611_v33 = vld [vmem:[#allocation19_spill] sm:$0xff] }
  0xfe   : > { %5589 = vmatprep.subr.bf16.mxu1 %v8609_v61  ;;  %5557 = vmatprep.subr.bf16.mxu0 %v8587_v47  ;;  %v7093_v12 = vadd.f32 %v6891_v45, %v8611_v33  ;;  %v1868_v33 = vld [vmem:[%s8464_s3 + $0x28] sm:$0xff] }
 0x101   : > { %5591 = vmatpush3.bf16.msra.mxu1 %v8609_v61  ;;  %5559 = vmatpush3.bf16.msra.mxu0 %v7070_v4  ;;  %v7113_v61 = vadd.f32 %v6899_v35, %v8613_v14  ;;  %v1869_v14 = vld [vmem:[%s8464_s3 + $0x30] sm:$0xff] }
 0x102   : > { %5593 = vmatprep.subr.bf16.mxu0 %v6876_v16  ;;  %5625 = vmatprep.subr.bf16.mxu1 %v7088_v2 }
 0x104   : > { %4959 = vmatmul.mubr.f32.vlgmr.msra.gmra.mrb[2].mxu1 %v7086_v41  ;;  %4924 = vmatmul.mubr.f32.vlgmr.msra.gmra.mrb[2].mxu0 %v6883_v63  ;;  %v1867_v63 = vld [vmem:[%s8464_s3 + $0x20] sm:$0xff] }
 0x105   : > { %4961 = vmatprep.mubr.f32.mxu1 %v7093_v12  ;;  %5595 = vmatpush3.bf16.msra.mxu0 %v6876_v16  ;;  %v7130_v16 = vadd.f32 %v6911_v9, %v8614_v20  ;;  %v7140_v6 = vpack.c.bf16 %v1868_v33, %v1867_v63  ;;  %v1870_v20 = vld [vmem:[%s8464_s3 + $0x38] sm:$0xff] }
 0x106   : > { %5597 = vmatprep.subr.bf16.mxu0 %v6895_v17  ;;  %5086 = vmatprep.mubr.f32.mxu0 %v6887_v54  ;;  %v8615_v54 = vld [vmem:[#allocation31_spill] sm:$0xff]  ;;  %v7162_v33 = vpack.c.bf16 %v1870_v20, %v1869_v14 }
 0x107   : > { %5627 = vmatpush3.bf16.msra.mxu1 %v7088_v2  ;;  %v7136_v59 = vadd.f32 %v6913_v40, %v8615_v54  ;;  %v8616_v54 = vld [vmem:[#allocation37_spill] sm:$0xff] }
 0x108   : > { %4962 = vmatmul.mubr.f32.gmra.mrb[4].mxu1 %v7107_v26  ;;  %5629 = vmatprep.subr.bf16.mxu1 %v7118_v7  ;;  %v7152_v23 = vadd.f32 %v6915_v27, %v8616_v54  ;;  %v1871_v54 = vld [vmem:[%s8464_s3 + $0x40] sm:$0xff] }
 0x109   : > { %4964 = vmatprep.mubr.f32.mxu1 %v7113_v61  ;;  %5599 = vmatpush3.bf16.msra.mxu0 %v6895_v17  ;;  %v8617_v17 = vld [vmem:[#allocation21_spill] sm:$0xff]  ;;  %v7184_v20 = vpack.c.bf16 %v1872_v60, %v1871_v54 }
 0x10a   : > { %5601 = vmatprep.subr.bf16.mxu0 %v6958_v28  ;;  %v7158_v63 = vadd.f32 %v6874_v49, %v8617_v17  ;;  %v8618_v17 = vld [vmem:[#allocation22_spill] sm:$0xff] }
 0x10b   : > { %5631 = vmatpush3.bf16.msra.mxu1 %v7118_v7  ;;  %v7174_v30 = vadd.f32 %v6889_v10, %v8618_v17  ;;  %v1873_v17 = vld [vmem:[%s8464_s3 + $0x50] sm:$0xff] }
 0x10c   : > { %4965 = vmatmul.mubr.f32.gmra.mrb[6].mxu1 %v7130_v16  ;;  %5633 = vmatprep.subr.bf16.mxu1 %v7140_v6  ;;  %v7206_v54 = vpack.c.bf16 %v1874_v62, %v1873_v17  ;;  %v8625_v17 = vld [vmem:[#allocation26_spill] sm:$0xff] }
 0x10d   : > { %4967 = vmatprep.mubr.f32.mxu1 %v7136_v59  ;;  %5603 = vmatpush3.bf16.msra.mxu0 %v6958_v28  ;;  %v8619_v28 = vld [vmem:[#allocation23_spill] sm:$0xff] }
 0x10e   : > { %5605 = vmatprep.subr.bf16.mxu0 %v7014_v0  ;;  %v7180_v14 = vadd.f32 %v6891_v45, %v8619_v28  ;;  %v8620_v28 = vld [vmem:[#allocation25_spill] sm:$0xff] }
 0x10f   : > { %5635 = vmatpush3.bf16.msra.mxu1 %v7140_v6  ;;  %v7196_v11 = vadd.f32 %v6897_v53, %v8620_v28  ;;  %v8622_v28 = vld [vmem:[#allocation34_spill] sm:$0xff] }
 0x110   : > { %4968 = vmatmul.mubr.f32.gmra.mrb[8].mxu1 %v7152_v23  ;;  %5637 = vmatprep.subr.bf16.mxu1 %v7162_v33  ;;  %v7212_v44 = vadd.f32 %v6911_v9, %v8622_v28  ;;  %v7231_v28 = vadd.f32 %v6874_v49, %v8625_v17  ;;  %v8628_v49 = vld [vmem:[#allocation32_spill] sm:$0xff]  ;;  %v8629_v17 = vld [vmem:[#allocation39_spill] sm:$0xff] }
 0x111   : > { %4970 = vmatprep.mubr.f32.mxu1 %v7158_v63  ;;  %5607 = vmatpush3.bf16.msra.mxu0 %v7014_v0  ;;  %v8621_v0 = vld [vmem:[#allocation30_spill] sm:$0xff] }
 0x112   : > { %5609 = vmatprep.subr.bf16.mxu0 %v7028_v18  ;;  %v7202_v60 = vadd.f32 %v6899_v35, %v8621_v0  ;;  %v8623_v0 = vld [vmem:[#allocation38_spill] sm:$0xff] }
 0x113   : > { %5639 = vmatpush3.bf16.msra.mxu1 %v7162_v33  ;;  %v7218_v15 = vadd.f32 %v6913_v40, %v8623_v0 }
 0x114   : > { %4971 = vmatmul.mubr.f32.gmra.mrb[10].mxu1 %v7174_v30  ;;  %5641 = vmatprep.subr.bf16.mxu1 %v7184_v20 }
 0x115   : > { %4973 = vmatprep.mubr.f32.mxu1 %v7180_v14  ;;  %5611 = vmatpush3.bf16.msra.mxu0 %v7028_v18  ;;  %v8624_v18 = vld [vmem:[#allocation41_spill] sm:$0xff] }
 0x116   : > { %5613 = vmatprep.subr.bf16.mxu0 %v7042_v25  ;;  %v7226_v62 = vadd.f32 %v6915_v27, %v8624_v18  ;;  %v8627_v18 = vld [vmem:[#allocation28_spill] sm:$0xff] }
 0x117   : > { %5643 = vmatpush3.bf16.msra.mxu1 %v7184_v20  ;;  %v7243_v19 = vadd.f32 %v6891_v45, %v8627_v18 }
 0x118   : > { %4974 = vmatmul.mubr.f32.gmra.mrb[12].mxu1 %v7196_v11  ;;  %5645 = vmatprep.subr.bf16.mxu1 %v7206_v54 }
 0x119   : > { %4976 = vmatprep.mubr.f32.mxu1 %v7202_v60  ;;  %5615 = vmatpush3.bf16.msra.mxu0 %v7042_v25  ;;  %v8626_v25 = vld [vmem:[#allocation27_spill] sm:$0xff] }
 0x11a   : > { %5617 = vmatprep.subr.bf16.mxu0 %v7056_v43  ;;  %v7238_v0 = vadd.f32 %v6889_v10, %v8626_v25  ;;  %v7256_v25 = vadd.f32 %v6899_v35, %v8629_v17  ;;  %v1877_v17 = vld [vmem:[%s8464_s3 + $0x70] sm:$0xff] }
 0x11b   : > { %5647 = vmatpush3.bf16.msra.mxu1 %v7206_v54 }
 0x11c   : > { %4977 = vmatmul.mubr.f32.gmra.mrb[14].mxu1 %v7212_v44 }
 0x11d   : > { %4979 = vmatprep.mubr.f32.mxu1 %v7218_v15  ;;  %5619 = vmatpush3.bf16.msra.mxu0 %v7056_v43  ;;  %v7250_v43 = vadd.f32 %v6897_v53, %v8628_v49 }
 0x11e   : > { %5621 = vmatprep.subr.bf16.mxu0 %v7070_v4 }
 0x120   : > { %4980 = vmatmul.mubr.f32.gmra.mrb[16].mxu1 %v7226_v62 }
 0x121   : > { %4982 = vmatprep.mubr.f32.mxu1 %v7231_v28  ;;  %5623 = vmatpush3.bf16.msra.mxu0 %v7070_v4  ;;  %v8630_v4 = vld [vmem:[#allocation42_spill] sm:$0xff] }
 0x122   : > { %5656 = vmatprep.subr.bf16.mxu0 %v8587_v47  ;;  %v7264_v18 = vadd.f32 %v6911_v9, %v8630_v4 }
 0x124   : > { %4983 = vmatmul.mubr.f32.gmra.mrb[18].mxu1 %v7238_v0  ;;  %5087 = vmatmul.mubr.f32.vlgmr.msra.gmra.mrb[4].mxu0 %v7086_v41  ;;  %v8631_v41 = vld [vmem:[#allocation44_spill] sm:$0xff] }
 0x125   : > { %4985 = vmatprep.mubr.f32.mxu1 %v7243_v19  ;;  %5089 = vmatprep.mubr.f32.mxu0 %v7093_v12  ;;  %v7270_v49 = vadd.f32 %v6913_v40, %v8631_v41 }
 0x126   : > { %5658 = vmatpush3.bf16.msra.mxu0 %v7088_v2  ;;  %v8632_v2 = vld [vmem:[#allocation46_spill] sm:$0xff] }
 0x127   : > { %5659 = vmatprep.subr.bf16.mxu0 %v8587_v47  ;;  %v7278_v12 = vadd.f32 %v6915_v27, %v8632_v2 }
 0x128   : > { %4986 = vmatmul.mubr.f32.gmra.mrb[20].mxu1 %v7250_v43  ;;  %5090 = vmatmul.mubr.f32.gmra.mrb[6].mxu0 %v7107_v26  ;;  %v8633_v26 = vld [vmem:[#allocation35_spill] sm:$0xff] }
 0x129   : > { %4988 = vmatprep.mubr.f32.mxu1 %v7256_v25  ;;  %5092 = vmatprep.mubr.f32.mxu0 %v7113_v61  ;;  %v744_v61 = vadd.f32 %v6889_v10, %v8633_v26  ;;  %v8636_v10 = vld [vmem:[#allocation45_spill] sm:$0xff] }
 0x12a   : > { %5661 = vmatpush3.bf16.msra.mxu0 %v7118_v7  ;;  %v8634_v7 = vld [vmem:[#allocation36_spill] sm:$0xff] }
 0x12b   : > { %5662 = vmatprep.subr.bf16.mxu0 %v8587_v47 }
 0x12c   : > { %4989 = vmatmul.mubr.f32.gmra.mrb[22].mxu1 %v7264_v18  ;;  %5093 = vmatmul.mubr.f32.gmra.mrb[8].mxu0 %v7130_v16  ;;  %v745_v16 = vadd.f32 %v6891_v45, %v8634_v7  ;;  %v1875_v45 = vld [vmem:[%s8464_s3 + $0x60] sm:$0xff] }
 0x12d   : > { %4991 = vmatprep.mubr.f32.mxu1 %v7270_v49  ;;  %5095 = vmatprep.mubr.f32.mxu0 %v7136_v59  ;;  %v8635_v59 = vld [vmem:[#allocation40_spill] sm:$0xff] }
 0x12e   : > { %5664 = vmatpush3.bf16.msra.mxu0 %v7140_v6  ;;  %v746_v6 = vadd.f32 %v6897_v53, %v8635_v59  ;;  %v8637_v53 = vld [vmem:[#allocation47_spill] sm:$0xff] }
 0x12f   : > { %5665 = vmatprep.subr.bf16.mxu0 %v8587_v47 }
 0x130   : > { %4992 = vmatmul.mubr.f32.gmra.mrb[24].mxu1 %v7278_v12  ;;  %5096 = vmatmul.mubr.f32.gmra.mrb[10].mxu0 %v7152_v23  ;;  %v747_v23 = vadd.f32 %v6899_v35, %v8636_v10 }
 0x131   : > { %4994 = vmatprep.mubr.f32.mxu1 %v6880_v50  ;;  %5098 = vmatprep.mubr.f32.mxu0 %v7158_v63  ;;  %v1876_v63 = vld [vmem:[%s8464_s3 + $0x68] sm:$0xff] }
 0x132   : > { %5667 = vmatpush3.bf16.msra.mxu0 %v7162_v33  ;;  %v5648_v35 = vpack.c.bf16 %v1876_v63, %v1875_v45  ;;  %v8638_v33 = vld [vmem:[#allocation49_spill] sm:$0xff] }
 0x133   : > { %5668 = vmatprep.subr.bf16.mxu0 %v8587_v47 }
 0x134   : > { %4995 = vmatmul.mubr.f32.gmra.mrb[26].mxu1 %v744_v61  ;;  %5099 = vmatmul.mubr.f32.gmra.mrb[12].mxu0 %v7174_v30  ;;  %v748_v30 = vadd.f32 %v6911_v9, %v8637_v53  ;;  %v8639_v9 = vld [vmem:[#allocation50_spill] sm:$0xff] }
 0x135   : > { %4997 = vmatprep.mubr.f32.mxu1 %v745_v16  ;;  %5101 = vmatprep.mubr.f32.mxu0 %v7180_v14  ;;  %v749_v14 = vadd.f32 %v6913_v40, %v8638_v33  ;;  %v750_v40 = vadd.f32 %v6915_v27, %v8639_v9  ;;  %v8643_v27 = vld [vmem:[#allocation33_spill] sm:$0xff] }
 0x136   : > { %5670 = vmatpush3.bf16.msra.mxu0 %v7184_v20  ;;  %v1878_v20 = vld [vmem:[%s8464_s3 + $0x78] sm:$0xff]  ;;  %5649 = vmatprep.subr.bf16.mxu1 %v5648_v35 }
 0x137   : > { %5671 = vmatprep.subr.bf16.mxu0 %v8587_v47  ;;  %5651 = vmatpush3.bf16.msra.mxu1 %v5648_v35 }
 0x138   : > { %4998 = vmatmul.mubr.f32.gmra.mrb[28].mxu1 %v746_v6  ;;  %5102 = vmatmul.mubr.f32.gmra.mrb[14].mxu0 %v7196_v11  ;;  %v5652_v11 = vpack.c.bf16 %v1878_v20, %v1877_v17 }
 0x139   : > { %5000 = vmatprep.mubr.f32.mxu1 %v747_v23  ;;  %5104 = vmatprep.mubr.f32.mxu0 %v7202_v60 }
 0x13a   : > { %5673 = vmatpush3.bf16.msra.mxu0 %v7206_v54  ;;  %5653 = vmatprep.subr.bf16.mxu1 %v5652_v11 }
 0x13b   : > { %5674 = vmatprep.subr.bf16.mxu0 %v8587_v47  ;;  %5655 = vmatpush3.bf16.msra.mxu1 %v5652_v11 }
 0x13c   : > { %5001 = vmatmul.mubr.f32.gmra.mrb[30].mxu1 %v748_v30  ;;  %5105 = vmatmul.mubr.f32.gmra.mrb[16].mxu0 %v7212_v44 }
 0x13d   : > { %5003 = vmatprep.mubr.f32.mxu1 %v749_v14  ;;  %5107 = vmatprep.mubr.f32.mxu0 %v7218_v15 }
 0x13e   : > { %5676 = vmatpush3.bf16.msra.mxu0 %v5648_v35 }
 0x13f   : > { %5677 = vmatprep.subr.bf16.mxu0 %v8587_v47 }
 0x140   : > { %5004 = vmatmul.mubr.f32.gmra.mrb[32].mxu1 %v750_v40  ;;  %5108 = vmatmul.mubr.f32.gmra.mrb[18].mxu0 %v7226_v62 }
 0x141   : > { %5006 = vmatprep.mubr.f32.mxu1 %v6903_v24  ;;  %5110 = vmatprep.mubr.f32.mxu0 %v7231_v28 }
 0x142   : > { %5679 = vmatpush3.bf16.msra.mxu0 %v5652_v11 }
 0x144   : > { %5007 = vmatmul.mubr.f32.gmra.mrb[34].mxu1 %v6907_v3  ;;  %5111 = vmatmul.mubr.f32.gmra.mrb[20].mxu0 %v7238_v0 }
 0x145   : > { %5009 = vmatprep.mubr.f32.mxu1 %v6919_v46  ;;  %5113 = vmatprep.mubr.f32.mxu0 %v7243_v19 }
 0x148   : > { %5010 = vmatmul.mubr.f32.gmra.mrb[36].mxu1 %v6923_v21  ;;  %5114 = vmatmul.mubr.f32.gmra.mrb[22].mxu0 %v7250_v43 }
 0x149   : > { %5012 = vmatprep.mubr.f32.mxu1 %v6927_v22  ;;  %5116 = vmatprep.mubr.f32.mxu0 %v7256_v25 }
 0x14c   : > { %5013 = vmatmul.mubr.f32.gmra.mrb[38].mxu1 %v6933_v5  ;;  %5117 = vmatmul.mubr.f32.gmra.mrb[24].mxu0 %v7264_v18 }
 0x14d   : > { %5015 = vmatprep.mubr.f32.mxu1 %v6937_v32  ;;  %5119 = vmatprep.mubr.f32.mxu0 %v7270_v49 }
 0x150   : > { %5016 = vmatmul.mubr.f32.gmra.mrb[40].mxu1 %v6941_v51  ;;  %5120 = vmatmul.mubr.f32.gmra.mrb[26].mxu0 %v7278_v12 }
 0x151   : > { %5018 = vmatprep.mubr.f32.mxu1 %v6948_v58  ;;  %5122 = vmatprep.mubr.f32.mxu0 %v6880_v50  ;;  %v8640_v50 = vld [vmem:[#allocation56_spill] sm:$0xff] }
 0x154   : > { %5019 = vmatmul.mubr.f32.gmra.mrb[42].mxu1 %v6952_v29  ;;  %5123 = vmatmul.mubr.f32.gmra.mrb[28].mxu0 %v744_v61 }
 0x155   : > { %5021 = vmatprep.mubr.f32.mxu1 %v6956_v38  ;;  %5125 = vmatprep.mubr.f32.mxu0 %v745_v16 }
 0x158   : > { %5022 = vmatmul.mubr.f32.gmra.mrb[44].mxu1 %v6962_v1  ;;  %5126 = vmatmul.mubr.f32.gmra.mrb[30].mxu0 %v746_v6 }
 0x159   : > { %5024 = vmatprep.mubr.f32.mxu1 %v6966_v48  ;;  %5128 = vmatprep.mubr.f32.mxu0 %v747_v23 }
 0x15c   : > { %5025 = vmatmul.mubr.f32.gmra.mrb[46].mxu1 %v6970_v55  ;;  %5129 = vmatmul.mubr.f32.gmra.mrb[32].mxu0 %v748_v30 }
 0x15d   : > { %5027 = vmatprep.mubr.f32.mxu1 %v6976_v56  ;;  %5131 = vmatprep.mubr.f32.mxu0 %v749_v14 }
 0x160   : > { %5028 = vmatmul.mubr.f32.gmra.mrb[48].mxu1 %v6980_v57  ;;  %5132 = vmatmul.mubr.f32.gmra.mrb[34].mxu0 %v750_v40 }
 0x161   : > { %5030 = vmatprep.mubr.f32.mxu1 %v6984_v8  ;;  %5134 = vmatprep.mubr.f32.mxu0 %v6903_v24  ;;  %v8641_v24 = vld [vmem:[#allocation51_spill] sm:$0xff] }
 0x164   : > { %5031 = vmatmul.mubr.f32.gmra.mrb[50].mxu1 %v6990_v52  ;;  %5135 = vmatmul.mubr.f32.gmra.mrb[36].mxu0 %v6907_v3  ;;  %v8642_v3 = vld [vmem:[#allocation52_spill] sm:$0xff] }
 0x165   : > { %5033 = vmatprep.mubr.f32.mxu1 %v6994_v31  ;;  %5137 = vmatprep.mubr.f32.mxu0 %v6919_v46  ;;  %v8644_v46 = vld [vmem:[#allocation53_spill] sm:$0xff] }
 0x168   : > { %5034 = vmatmul.mubr.f32.gmra.mrb[52].mxu1 %v6998_v36  ;;  %5138 = vmatmul.mubr.f32.gmra.mrb[38].mxu0 %v6923_v21  ;;  %v8645_v21 = vld [vmem:[#allocation54_spill] sm:$0xff] }
 0x169   : > { %5036 = vmatprep.mubr.f32.mxu1 %v7002_v37  ;;  %5140 = vmatprep.mubr.f32.mxu0 %v6927_v22  ;;  %v8646_v22 = vld [vmem:[#allocation43_spill] sm:$0xff] }
 0x16c   : > { %5037 = vmatmul.mubr.f32.gmra.mrb[54].mxu1 %v7006_v34  ;;  %5141 = vmatmul.mubr.f32.gmra.mrb[40].mxu0 %v6933_v5  ;;  %v8647_v5 = vmov 0.0  }
 0x16d   : > { %5039 = vmatprep.mubr.f32.mxu1 %v7010_v39  ;;  %5143 = vmatprep.mubr.f32.mxu0 %v6937_v32  ;;  %v6174_v32 = vmov 1966171168  }
 0x170   : > { %5040 = vmatmul.mubr.f32.gmra.mrb[56].mxu1 %v7018_v42  ;;  %5144 = vmatmul.mubr.f32.gmra.mrb[42].mxu0 %v6941_v51  ;;  %v1883_v51 = vunpack.c.l.s4 %v6174_v32 }
 0x171   : > { %5042 = vmatprep.mubr.f32.mxu1 %v7024_v13  ;;  %5146 = vmatprep.mubr.f32.mxu0 %v6948_v58  ;;  %v1885_v58 = vlaneseq }
 0x174   : > { %5043 = vmatmul.mubr.f32.gmra.mrb[58].mxu1 %v8640_v50  ;;  %5147 = vmatmul.mubr.f32.gmra.mrb[44].mxu0 %v6952_v29  ;;  %v4351_v29 = vld [vmem:[%s8467_s6] ss:$0 sm:$0xff] }
 0x175   : > { %5045 = vmatprep.mubr.f32.mxu1 %v8641_v24  ;;  %5149 = vmatprep.mubr.f32.mxu0 %v6956_v38 }
 0x178   : > { %5046 = vmatmul.mubr.f32.gmra.mrb[60].mxu1 %v8642_v3  ;;  %5150 = vmatmul.mubr.f32.gmra.mrb[46].mxu0 %v6962_v1 }
 0x179   : > { %5048 = vmatprep.mubr.f32.mxu1 %v8643_v27  ;;  %5152 = vmatprep.mubr.f32.mxu0 %v6966_v48  ;;  %v7410_v48 = vld [vmem:[%s8648_s15] ss:$0 sm:$0xff]  ;;  %s517_s15 = scalar_lea.vmem [#allocation11], %s4349_s25  ;;  %s6092_s25 = sshll.u32 %s6175_s29, 4  ;;  %s6093_s25 = int_to_ptr.vmem [resolvable:$false] %s6092_s25 }
 0x17a   : > { %s4224_s24 = sshll.u32 %s517_s15, 4  ;;  %s6094_s22 = scalar_lea.vmem %s6093_s25, 256  ;;  %s8419_s24 = int_to_ptr.vmem [resolvable:$true] %s4224_s24 }
 0x17b   : > { %p6095_p12 = scmp.lt.s32.totalorder %s8419_s24, %s6093_s25 }
 0x17c   : > { %5049 = vmatmul.mubr.f32.gmra.mrb[62].mxu1 %v8644_v46  ;;  %5153 = vmatmul.mubr.f32.gmra.mrb[48].mxu0 %v6970_v55 }
 0x17d   : > { %5051 = vmatprep.mubr.f32.mxu1 %v8645_v21  ;;  %5155 = vmatprep.mubr.f32.mxu0 %v6976_v56  ;;  %v1884_v56 = vunpack.c.0.s8 %v1883_v51 }
 0x180   : > { %5052 = vmatmul.mubr.f32.gmra.mrb[64].mxu1 %v8646_v22  ;;  %5156 = vmatmul.mubr.f32.gmra.mrb[50].mxu0 %v6980_v57  ;;  %v1886_v57 = vshrl.u32 %v1885_v58, 7 }
 0x181   : > { %5158 = vmatprep.mubr.f32.mxu0 %v6984_v8 }
 0x182   : > { %v7419_v54 = vsub.s32 0, %v1886_v57 }
 0x184   : > { %5159 = vmatmul.mubr.f32.gmra.mrb[52].mxu0 %v6990_v52 }
 0x185   : > { %5161 = vmatprep.mubr.f32.mxu0 %v6994_v31 }
 0x188   : > { %5162 = vmatmul.mubr.f32.gmra.mrb[54].mxu0 %v6998_v36 }
 0x189   : > { %5164 = vmatprep.mubr.f32.mxu0 %v7002_v37 }
 0x18c   : > { %5165 = vmatmul.mubr.f32.gmra.mrb[56].mxu0 %v7006_v34  ;;  %v1887_v34 = vsub.s32 %v1884_v56, %v1886_v57 }
 0x18d   : > { %5167 = vmatprep.mubr.f32.mxu0 %v7010_v39 }
 0x190   : > { %5168 = vmatmul.mubr.f32.gmra.mrb[58].mxu0 %v7018_v42 }
 0x191   : > { %5170 = vmatprep.mubr.f32.mxu0 %v7024_v13 }
 0x194   : > { %5171 = vmatmul.mubr.f32.gmra.mrb[60].mxu0 %v8640_v50 }
 0x195   : > { %5173 = vmatprep.mubr.f32.mxu0 %v8641_v24 }
 0x198   : > { %5174 = vmatmul.mubr.f32.gmra.mrb[62].mxu0 %v8642_v3 }
 0x199   : > { %5176 = vmatprep.mubr.f32.mxu0 %v8643_v27 }
 0x19c   : > { %5177 = vmatmul.mubr.f32.gmra.mrb[64].mxu0 %v8644_v46 }
 0x19d   : > { %5179 = vmatprep.mubr.f32.mxu0 %v8645_v21 }
 0x1a0   : > { %5180 = vmatmul.mubr.f32.gmra.mrb[66].mxu0 %v8646_v22 }
 0x1a1   : > { %5342 = vmatprep.mubr.msk.f32.mxu0 %vm6172_vm0, %v8647_v5 }
 0x1b7   : > { %v902_v38 = vpop.f32.mrb[0].mxu0  ;;  %v996_v1 = vpop.f32.mrb[0].mxu1 }
 0x1b8   : > { %v903_v55 = vadd.f32 %v4351_v29, %v902_v38  ;;  %v4890_v8 = vpop.f32.mrb[1].mxu1  ;;  %v4855_v52 = vpop.f32.mrb[1].mxu0  ;;  %v997_v36 = vadd.f32 %v7410_v48, %v996_v1 }
 0x1ba   : > { %v906_v31 = vmul.f32 0.25, %v903_v55 }
 0x1bc   : > { %v1881_v37 = vcombine.high %v906_v31, %v906_v31  ;;  %v2419_v39 = vmul.f32 %v997_v36, %v906_v31  ;;  %v1888_v44 = vrot.slane %v906_v31, %v1887_v34 }
 0x1be   : > { %v1895_v42 = vrot.slane %v1881_v37, %v1887_v34  ;;  %5343 = vmatmul.mubr.f32.vlgmr.msra.gmra.mrb[68].mxu0 %v2419_v39  ;;  %v7417_v60 = vrot.slane %v1888_v44, %v1887_v34  ;;  %v1896_v6 = vcombine.high %v1888_v44, %v1888_v44 }
 0x1c0   : > { %v1897_v13 = vcombine.high %v1895_v42, %v1895_v42  ;;  %v7413_v19 = vrot.slane %v1895_v42, %v1887_v34  ;;  %v1933_v62 = vrot.slane %v7417_v60, %v7419_v54  ;;  %v7431_v35 = vrot.slane %v1896_v6, %v1887_v34 }
 0x1c1   : > { %v1926_v31 = vcombine.high %v7417_v60, %v7417_v60 }
 0x1c2   : > { %v7415_v15 = vrot.slane %v1897_v13, %v1887_v34  ;;  %v1937_v11 = vrot.slane %v7431_v35, %v7419_v54 }
 0x1d7   : > { %v4960_v28 = vpop.f32.mrb[2].mxu1  ;;  %v7423_v0 = vpop.f32.mrb[2].mxu0 }
 0x1d8   : > { %8649 = vst [vmem:[#allocation55_spill] sm:$0xff] %v7423_v0  ;;  %v1165_v43 = vadd.f32 %v4960_v28, %v7410_v48  ;;  %v1159_v25 = vpop.f32.mrb[3].mxu1  ;;  %v4925_v4 = vpop.f32.mrb[3].mxu0 }
 0x1d9   : > { %v1160_v18 = vadd.f32 %v7410_v48, %v1159_v25 }
 0x1da   : > { %v1971_v41 = vmul.f32 %v1933_v62, %v1165_v43 }
 0x1db   : > { %v1970_v49 = vmul.f32 %v1933_v62, %v1160_v18  ;;  %v4963_v2 = vpop.f32.mrb[4].mxu1 }
 0x1dc   : > { %v1175_v12 = vadd.f32 %v4963_v2, %v7410_v48  ;;  %v1169_v26 = vpop.f32.mrb[5].mxu1 }
 0x1dd   : > { %v1170_v61 = vadd.f32 %v7410_v48, %v1169_v26  ;;  %5214 = vmatprep.mubr.f32.mxu1 %v1970_v49 }
 0x1de   : > { %v1973_v7 = vmul.f32 %v1933_v62, %v1175_v12  ;;  %5215 = vmatmul.mubr.f32.vlgmr.msra.gmra.mrb[66].mxu1 %v1971_v41 }
 0x1df   : > { %v1972_v16 = vmul.f32 %v1933_v62, %v1170_v61  ;;  %v4966_v59 = vpop.f32.mrb[6].mxu1 }
 0x1e0   : > { %v1185_v10 = vadd.f32 %v4966_v59, %v7410_v48  ;;  %v1179_v23 = vpop.f32.mrb[7].mxu1 }
 0x1e1   : > { %v1180_v45 = vadd.f32 %v7410_v48, %v1179_v23  ;;  %5217 = vmatprep.mubr.f32.mxu1 %v1972_v16 }
 0x1e2   : > { %v1975_v63 = vmul.f32 %v1933_v62, %v1185_v10  ;;  %5218 = vmatmul.mubr.f32.gmra.mrb[68].mxu1 %v1973_v7 }
 0x1e3   : > { %v1974_v53 = vmul.f32 %v1933_v62, %v1180_v45  ;;  %v4969_v30 = vpop.f32.mrb[8].mxu1 }
 0x1e4   : > { %v1195_v33 = vadd.f32 %v4969_v30, %v7410_v48  ;;  %v1189_v14 = vpop.f32.mrb[9].mxu1 }
 0x1e5   : > { %v1190_v17 = vadd.f32 %v7410_v48, %v1189_v14  ;;  %5220 = vmatprep.mubr.f32.mxu1 %v1974_v53 }
 0x1e6   : > { %v1977_v20 = vmul.f32 %v1933_v62, %v1195_v33  ;;  %5221 = vmatmul.mubr.f32.gmra.mrb[70].mxu1 %v1975_v63 }
 0x1e7   : > { %v1976_v9 = vmul.f32 %v1933_v62, %v1190_v17  ;;  %v4972_v40 = vpop.f32.mrb[10].mxu1  ;;  %v1941_v62 = vrot.slane %v1926_v31, %v7419_v54  ;;  %v1928_v17 = vcombine.high %v7431_v35, %v7431_v35 }
 0x1e8   : > { %v1205_v50 = vadd.f32 %v4972_v40, %v7410_v48  ;;  %v1199_v24 = vpop.f32.mrb[11].mxu1 }
 0x1e9   : > { %v1200_v3 = vadd.f32 %v7410_v48, %v1199_v24  ;;  %5223 = vmatprep.mubr.f32.mxu1 %v1976_v9 }
 0x1ea   : > { %v1979_v27 = vmul.f32 %v1937_v11, %v1205_v50  ;;  %5224 = vmatmul.mubr.f32.gmra.mrb[72].mxu1 %v1977_v20 }
 0x1eb   : > { %v1978_v46 = vmul.f32 %v1937_v11, %v1200_v3  ;;  %v4975_v21 = vpop.f32.mrb[12].mxu1 }
 0x1ec   : > { %v1215_v22 = vadd.f32 %v4975_v21, %v7410_v48  ;;  %v1209_v32 = vpop.f32.mrb[13].mxu1 }
 0x1ed   : > { %v1210_v51 = vadd.f32 %v7410_v48, %v1209_v32  ;;  %5226 = vmatprep.mubr.f32.mxu1 %v1978_v46  ;;  %v1945_v46 = vrot.slane %v1928_v17, %v7419_v54 }
 0x1ee   : > { %v1981_v58 = vmul.f32 %v1937_v11, %v1215_v22  ;;  %5227 = vmatmul.mubr.f32.gmra.mrb[74].mxu1 %v1979_v27 }
 0x1ef   : > { %v1980_v29 = vmul.f32 %v1937_v11, %v1210_v51  ;;  %v4978_v38 = vpop.f32.mrb[14].mxu1 }
 0x1f0   : > { %v1225_v1 = vadd.f32 %v4978_v38, %v7410_v48  ;;  %v1219_v55 = vpop.f32.mrb[15].mxu1 }
 0x1f1   : > { %v1220_v56 = vadd.f32 %v7410_v48, %v1219_v55  ;;  %5229 = vmatprep.mubr.f32.mxu1 %v1980_v29 }
 0x1f2   : > { %v1983_v57 = vmul.f32 %v1937_v11, %v1225_v1  ;;  %5230 = vmatmul.mubr.f32.gmra.mrb[76].mxu1 %v1981_v58 }
 0x1f3   : > { %v1982_v8 = vmul.f32 %v1937_v11, %v1220_v56  ;;  %v4981_v52 = vpop.f32.mrb[16].mxu1 }
 0x1f4   : > { %v1235_v36 = vadd.f32 %v4981_v52, %v7410_v48  ;;  %v1229_v37 = vpop.f32.mrb[17].mxu1 }
 0x1f5   : > { %v1230_v34 = vadd.f32 %v7410_v48, %v1229_v37  ;;  %5232 = vmatprep.mubr.f32.mxu1 %v1982_v8 }
 0x1f6   : > { %v1985_v39 = vmul.f32 %v1937_v11, %v1235_v36  ;;  %5233 = vmatmul.mubr.f32.gmra.mrb[78].mxu1 %v1983_v57 }
 0x1f7   : > { %v1984_v42 = vmul.f32 %v1937_v11, %v1230_v34  ;;  %v4984_v13 = vpop.f32.mrb[18].mxu1  ;;  %v7447_v44 = vpop.f32.mrb[4].mxu0 }
 0x1f8   : > { %v1245_v28 = vadd.f32 %v4984_v13, %v7410_v48  ;;  %v1239_v43 = vpop.f32.mrb[19].mxu1  ;;  %v7451_v25 = vpop.f32.mrb[5].mxu0 }
 0x1f9   : > { %v1240_v60 = vadd.f32 %v7410_v48, %v1239_v43  ;;  %5235 = vmatprep.mubr.f32.mxu1 %v1984_v42 }
 0x1fa   : > { %v1987_v4 = vmul.f32 %v1941_v62, %v1245_v28  ;;  %5236 = vmatmul.mubr.f32.gmra.mrb[80].mxu1 %v1985_v39 }
 0x1fb   : > { %v1986_v18 = vmul.f32 %v1941_v62, %v1240_v60  ;;  %v4987_v41 = vpop.f32.mrb[20].mxu1  ;;  %v7454_v49 = vpop.f32.mrb[6].mxu0 }
 0x1fc   : > { %v1255_v2 = vadd.f32 %v4987_v41, %v7410_v48  ;;  %v1249_v12 = vpop.f32.mrb[21].mxu1  ;;  %v7457_v26 = vpop.f32.mrb[7].mxu0 }
 0x1fd   : > { %v1250_v61 = vadd.f32 %v7410_v48, %v1249_v12  ;;  %5238 = vmatprep.mubr.f32.mxu1 %v1986_v18 }
 0x1fe   : > { %v1989_v7 = vmul.f32 %v1941_v62, %v1255_v2  ;;  %5239 = vmatmul.mubr.f32.gmra.mrb[82].mxu1 %v1987_v4 }
 0x1ff   : > { %v1988_v16 = vmul.f32 %v1941_v62, %v1250_v61  ;;  %v4990_v59 = vpop.f32.mrb[22].mxu1  ;;  %v7460_v6 = vpop.f32.mrb[8].mxu0 }
 0x200   : > { %v1265_v10 = vadd.f32 %v4990_v59, %v7410_v48  ;;  %v1259_v23 = vpop.f32.mrb[23].mxu1  ;;  %v7463_v45 = vpop.f32.mrb[9].mxu0 }
 0x201   : > { %v1260_v63 = vadd.f32 %v7410_v48, %v1259_v23  ;;  %5241 = vmatprep.mubr.f32.mxu1 %v1988_v16  ;;  %v1949_v16 = vrot.slane %v7413_v19, %v7419_v54 }
 0x202   : > { %v1991_v53 = vmul.f32 %v1941_v62, %v1265_v10  ;;  %5242 = vmatmul.mubr.f32.gmra.mrb[84].mxu1 %v1989_v7 }
 0x203   : > { %v1990_v30 = vmul.f32 %v1941_v62, %v1260_v63  ;;  %v4993_v33 = vpop.f32.mrb[24].mxu1  ;;  %v7466_v14 = vpop.f32.mrb[10].mxu0 }
 0x204   : > { %8650 = vst [vmem:[#allocation48_spill] sm:$0xff] %v7466_v14  ;;  %v1275_v20 = vadd.f32 %v4993_v33, %v7410_v48  ;;  %v1269_v9 = vpop.f32.mrb[25].mxu1  ;;  %v7471_v40 = vpop.f32.mrb[11].mxu0 }
 0x205   : > { %8651 = vst [vmem:[#allocation18_spill] sm:$0xff] %v7471_v40  ;;  %v1270_v11 = vadd.f32 %v7410_v48, %v1269_v9  ;;  %5244 = vmatprep.mubr.f32.mxu1 %v1990_v30 }
 0x206   : > { %v1993_v50 = vmul.f32 %v1941_v62, %v1275_v20  ;;  %5245 = vmatmul.mubr.f32.gmra.mrb[86].mxu1 %v1991_v53 }
 0x207   : > { %v1992_v24 = vmul.f32 %v1941_v62, %v1270_v11  ;;  %v4996_v3 = vpop.f32.mrb[26].mxu1  ;;  %v7474_v27 = vpop.f32.mrb[12].mxu0 }
 0x208   : > { %8652 = vst [vmem:[#allocation19_spill] sm:$0xff] %v7474_v27  ;;  %v1285_v21 = vadd.f32 %v4996_v3, %v7410_v48  ;;  %v1279_v22 = vpop.f32.mrb[27].mxu1  ;;  %v7478_v35 = vpop.f32.mrb[13].mxu0 }
 0x209   : > { %8653 = vst [vmem:[#allocation20_spill] sm:$0xff] %v7478_v35  ;;  %v1280_v32 = vadd.f32 %v7410_v48, %v1279_v22  ;;  %5247 = vmatprep.mubr.f32.mxu1 %v1992_v24 }
 0x20a   : > { %v1995_v51 = vmul.f32 %v1945_v46, %v1285_v21  ;;  %5248 = vmatmul.mubr.f32.gmra.mrb[88].mxu1 %v1993_v50 }
 0x20b   : > { %v1994_v58 = vmul.f32 %v1945_v46, %v1280_v32  ;;  %v4999_v29 = vpop.f32.mrb[28].mxu1  ;;  %v7481_v38 = vpop.f32.mrb[14].mxu0 }
 0x20c   : > { %8654 = vst [vmem:[#allocation24_spill] sm:$0xff] %v7481_v38  ;;  %v1295_v1 = vadd.f32 %v4999_v29, %v7410_v48  ;;  %v1289_v55 = vpop.f32.mrb[29].mxu1  ;;  %v7484_v56 = vpop.f32.mrb[15].mxu0 }
 0x20d   : > { %8655 = vst [vmem:[#allocation29_spill] sm:$0xff] %v7484_v56  ;;  %v1290_v57 = vadd.f32 %v7410_v48, %v1289_v55  ;;  %5250 = vmatprep.mubr.f32.mxu1 %v1994_v58 }
 0x20e   : > { %v1997_v8 = vmul.f32 %v1945_v46, %v1295_v1  ;;  %5251 = vmatmul.mubr.f32.gmra.mrb[90].mxu1 %v1995_v51 }
 0x20f   : > { %v1996_v52 = vmul.f32 %v1945_v46, %v1290_v57  ;;  %v5002_v31 = vpop.f32.mrb[30].mxu1  ;;  %v7487_v36 = vpop.f32.mrb[16].mxu0 }
 0x210   : > { %8656 = vst [vmem:[#allocation31_spill] sm:$0xff] %v7487_v36  ;;  %v1305_v37 = vadd.f32 %v5002_v31, %v7410_v48  ;;  %v1299_v34 = vpop.f32.mrb[31].mxu1  ;;  %v7490_v39 = vpop.f32.mrb[17].mxu0 }
 0x211   : > { %8657 = vst [vmem:[#allocation37_spill] sm:$0xff] %v7490_v39  ;;  %v1300_v42 = vadd.f32 %v7410_v48, %v1299_v34  ;;  %5253 = vmatprep.mubr.f32.mxu1 %v1996_v52 }
 0x212   : > { %v1999_v13 = vmul.f32 %v1945_v46, %v1305_v37  ;;  %5254 = vmatmul.mubr.f32.gmra.mrb[92].mxu1 %v1997_v8 }
 0x213   : > { %v1998_v62 = vmul.f32 %v1945_v46, %v1300_v42  ;;  %v5005_v28 = vpop.f32.mrb[32].mxu1  ;;  %v7493_v43 = vpop.f32.mrb[18].mxu0 }
 0x214   : > { %8658 = vst [vmem:[#allocation21_spill] sm:$0xff] %v7493_v43  ;;  %v1315_v60 = vadd.f32 %v5005_v28, %v7410_v48  ;;  %v1309_v4 = vpop.f32.mrb[33].mxu1  ;;  %v7496_v18 = vpop.f32.mrb[19].mxu0  ;;  %v1953_v28 = vrot.slane %v7415_v15, %v7419_v54 }
 0x215   : > { %8659 = vst [vmem:[#allocation22_spill] sm:$0xff] %v7496_v18  ;;  %v1310_v41 = vadd.f32 %v7410_v48, %v1309_v4  ;;  %5256 = vmatprep.mubr.f32.mxu1 %v1998_v62 }
 0x216   : > { %v2001_v2 = vmul.f32 %v1945_v46, %v1315_v60  ;;  %5257 = vmatmul.mubr.f32.gmra.mrb[94].mxu1 %v1999_v13 }
 0x217   : > { %v2000_v12 = vmul.f32 %v1945_v46, %v1310_v41  ;;  %v5008_v61 = vpop.f32.mrb[34].mxu1  ;;  %v7499_v7 = vpop.f32.mrb[20].mxu0 }
 0x218   : > { %8660 = vst [vmem:[#allocation23_spill] sm:$0xff] %v7499_v7  ;;  %v1325_v59 = vadd.f32 %v5008_v61, %v7410_v48  ;;  %v1319_v10 = vpop.f32.mrb[35].mxu1  ;;  %v7504_v23 = vpop.f32.mrb[21].mxu0 }
 0x219   : > { %8661 = vst [vmem:[#allocation25_spill] sm:$0xff] %v7504_v23  ;;  %v1320_v63 = vadd.f32 %v7410_v48, %v1319_v10  ;;  %5259 = vmatprep.mubr.f32.mxu1 %v2000_v12 }
 0x21a   : > { %v2003_v53 = vmul.f32 %v1949_v16, %v1325_v59  ;;  %5260 = vmatmul.mubr.f32.gmra.mrb[96].mxu1 %v2001_v2 }
 0x21b   : > { %v2002_v30 = vmul.f32 %v1949_v16, %v1320_v63  ;;  %v5011_v33 = vpop.f32.mrb[36].mxu1  ;;  %v7507_v17 = vpop.f32.mrb[22].mxu0 }
 0x21c   : > { %8662 = vst [vmem:[#allocation30_spill] sm:$0xff] %v7507_v17  ;;  %v1335_v20 = vadd.f32 %v5011_v33, %v7410_v48  ;;  %v1329_v9 = vpop.f32.mrb[37].mxu1  ;;  %v7510_v11 = vpop.f32.mrb[23].mxu0 }
 0x21d   : > { %8663 = vst [vmem:[#allocation34_spill] sm:$0xff] %v7510_v11  ;;  %v1330_v50 = vadd.f32 %v7410_v48, %v1329_v9  ;;  %5262 = vmatprep.mubr.f32.mxu1 %v2002_v30 }
 0x21e   : > { %v2005_v24 = vmul.f32 %v1949_v16, %v1335_v20  ;;  %5263 = vmatmul.mubr.f32.gmra.mrb[98].mxu1 %v2003_v53 }
 0x21f   : > { %v2004_v3 = vmul.f32 %v1949_v16, %v1330_v50  ;;  %v5014_v46 = vpop.f32.mrb[38].mxu1  ;;  %v7513_v21 = vpop.f32.mrb[24].mxu0 }
 0x220   : > { %8664 = vst [vmem:[#allocation38_spill] sm:$0xff] %v7513_v21  ;;  %v1345_v22 = vadd.f32 %v5014_v46, %v7410_v48  ;;  %v1339_v32 = vpop.f32.mrb[39].mxu1  ;;  %v7516_v51 = vpop.f32.mrb[25].mxu0 }
 0x221   : > { %8665 = vst [vmem:[#allocation41_spill] sm:$0xff] %v7516_v51  ;;  %v1340_v58 = vadd.f32 %v7410_v48, %v1339_v32  ;;  %5265 = vmatprep.mubr.f32.mxu1 %v2004_v3 }
 0x222   : > { %v2007_v29 = vmul.f32 %v1949_v16, %v1345_v22  ;;  %5266 = vmatmul.mubr.f32.gmra.mrb[100].mxu1 %v2005_v24 }
 0x223   : > { %v2006_v1 = vmul.f32 %v1949_v16, %v1340_v58  ;;  %v5017_v55 = vpop.f32.mrb[40].mxu1  ;;  %v7519_v57 = vpop.f32.mrb[26].mxu0 }
 0x224   : > { %8666 = vst [vmem:[#allocation26_spill] sm:$0xff] %v7519_v57  ;;  %v1355_v8 = vadd.f32 %v5017_v55, %v7410_v48  ;;  %v1349_v52 = vpop.f32.mrb[41].mxu1  ;;  %v7522_v31 = vpop.f32.mrb[27].mxu0  ;;  %v1927_v55 = vcombine.high %v7413_v19, %v7413_v19 }
 0x225   : > { %8667 = vst [vmem:[#allocation27_spill] sm:$0xff] %v7522_v31  ;;  %v1350_v37 = vadd.f32 %v7410_v48, %v1349_v52  ;;  %5268 = vmatprep.mubr.f32.mxu1 %v2006_v1 }
 0x226   : > { %v2009_v34 = vmul.f32 %v1949_v16, %v1355_v8  ;;  %5269 = vmatmul.mubr.f32.gmra.mrb[102].mxu1 %v2007_v29 }
 0x227   : > { %v2008_v42 = vmul.f32 %v1949_v16, %v1350_v37  ;;  %v5020_v13 = vpop.f32.mrb[42].mxu1  ;;  %v7525_v62 = vpop.f32.mrb[28].mxu0 }
 0x228   : > { %8668 = vst [vmem:[#allocation28_spill] sm:$0xff] %v7525_v62  ;;  %v1365_v60 = vadd.f32 %v5020_v13, %v7410_v48  ;;  %v1359_v4 = vpop.f32.mrb[43].mxu1  ;;  %v7530_v41 = vpop.f32.mrb[29].mxu0 }
 0x229   : > { %8669 = vst [vmem:[#allocation32_spill] sm:$0xff] %v7530_v41  ;;  %v1360_v2 = vadd.f32 %v7410_v48, %v1359_v4  ;;  %5271 = vmatprep.mubr.f32.mxu1 %v2008_v42 }
 0x22a   : > { %v2011_v12 = vmul.f32 %v1953_v28, %v1365_v60  ;;  %5272 = vmatmul.mubr.f32.gmra.mrb[104].mxu1 %v2009_v34 }
 0x22b   : > { %v2010_v61 = vmul.f32 %v1953_v28, %v1360_v2  ;;  %v5023_v59 = vpop.f32.mrb[44].mxu1  ;;  %v7533_v10 = vpop.f32.mrb[30].mxu0  ;;  %v1957_v2 = vrot.slane %v1927_v55, %v7419_v54 }
 0x22c   : > { %8670 = vst [vmem:[#allocation39_spill] sm:$0xff] %v7533_v10  ;;  %v1375_v16 = vadd.f32 %v5023_v59, %v7410_v48  ;;  %v1369_v63 = vpop.f32.mrb[45].mxu1  ;;  %v7536_v53 = vpop.f32.mrb[31].mxu0 }
 0x22d   : > { %8671 = vst [vmem:[#allocation42_spill] sm:$0xff] %v7536_v53  ;;  %v1370_v30 = vadd.f32 %v7410_v48, %v1369_v63  ;;  %5274 = vmatprep.mubr.f32.mxu1 %v2010_v61 }
 0x22e   : > { %v2013_v33 = vmul.f32 %v1953_v28, %v1375_v16  ;;  %5275 = vmatmul.mubr.f32.gmra.mrb[106].mxu1 %v2011_v12 }
 0x22f   : > { %v2012_v20 = vmul.f32 %v1953_v28, %v1370_v30  ;;  %v5026_v9 = vpop.f32.mrb[46].mxu1  ;;  %v7539_v50 = vpop.f32.mrb[32].mxu0 }
 0x230   : > { %8672 = vst [vmem:[#allocation44_spill] sm:$0xff] %v7539_v50  ;;  %v1385_v24 = vadd.f32 %v5026_v9, %v7410_v48  ;;  %v1379_v3 = vpop.f32.mrb[47].mxu1  ;;  %v7542_v46 = vpop.f32.mrb[33].mxu0 }
 0x231   : > { %8673 = vst [vmem:[#allocation46_spill] sm:$0xff] %v7542_v46  ;;  %v1380_v22 = vadd.f32 %v7410_v48, %v1379_v3  ;;  %5277 = vmatprep.mubr.f32.mxu1 %v2012_v20 }
 0x232   : > { %v2015_v32 = vmul.f32 %v1953_v28, %v1385_v24  ;;  %5278 = vmatmul.mubr.f32.gmra.mrb[108].mxu1 %v2013_v33 }
 0x233   : > { %v2014_v58 = vmul.f32 %v1953_v28, %v1380_v22  ;;  %v5029_v29 = vpop.f32.mrb[48].mxu1  ;;  %v7545_v1 = vpop.f32.mrb[34].mxu0 }
 0x234   : > { %8674 = vst [vmem:[#allocation35_spill] sm:$0xff] %v7545_v1  ;;  %v1395_v8 = vadd.f32 %v5029_v29, %v7410_v48  ;;  %v1389_v52 = vpop.f32.mrb[49].mxu1  ;;  %v7550_v37 = vpop.f32.mrb[35].mxu0 }
 0x235   : > { %8675 = vst [vmem:[#allocation36_spill] sm:$0xff] %v7550_v37  ;;  %v1390_v34 = vadd.f32 %v7410_v48, %v1389_v52  ;;  %5280 = vmatprep.mubr.f32.mxu1 %v2014_v58 }
 0x236   : > { %v2017_v42 = vmul.f32 %v1953_v28, %v1395_v8  ;;  %5281 = vmatmul.mubr.f32.gmra.mrb[110].mxu1 %v2015_v32 }
 0x237   : > { %v2016_v13 = vmul.f32 %v1953_v28, %v1390_v34  ;;  %v5032_v60 = vpop.f32.mrb[50].mxu1  ;;  %v7553_v4 = vpop.f32.mrb[36].mxu0 }
 0x238   : > { %8676 = vst [vmem:[#allocation40_spill] sm:$0xff] %v7553_v4  ;;  %v1405_v12 = vadd.f32 %v5032_v60, %v7410_v48  ;;  %v1399_v61 = vpop.f32.mrb[51].mxu1  ;;  %v7557_v19 = vpop.f32.mrb[37].mxu0 }
 0x239   : > { %8677 = vst [vmem:[#allocation45_spill] sm:$0xff] %v7557_v19  ;;  %v1400_v59 = vadd.f32 %v7410_v48, %v1399_v61  ;;  %5283 = vmatprep.mubr.f32.mxu1 %v2016_v13 }
 0x23a   : > { %v2019_v16 = vmul.f32 %v1957_v2, %v1405_v12  ;;  %5284 = vmatmul.mubr.f32.gmra.mrb[112].mxu1 %v2017_v42  ;;  %v1929_v12 = vcombine.high %v7415_v15, %v7415_v15 }
 0x23b   : > { %v2018_v63 = vmul.f32 %v1957_v2, %v1400_v59  ;;  %v5035_v30 = vpop.f32.mrb[52].mxu1  ;;  %v7560_v33 = vpop.f32.mrb[38].mxu0 }
 0x23c   : > { %8678 = vst [vmem:[#allocation47_spill] sm:$0xff] %v7560_v33  ;;  %v1415_v28 = vadd.f32 %v5035_v30, %v7410_v48  ;;  %v1409_v20 = vpop.f32.mrb[53].mxu1  ;;  %v7563_v9 = vpop.f32.mrb[39].mxu0 }
 0x23d   : > { %8679 = vst [vmem:[#allocation49_spill] sm:$0xff] %v7563_v9  ;;  %v1410_v24 = vadd.f32 %v7410_v48, %v1409_v20  ;;  %5286 = vmatprep.mubr.f32.mxu1 %v2018_v63 }
 0x23e   : > { %v2021_v3 = vmul.f32 %v1957_v2, %v1415_v28  ;;  %5287 = vmatmul.mubr.f32.gmra.mrb[114].mxu1 %v2019_v16 }
 0x23f   : > { %v2020_v22 = vmul.f32 %v1957_v2, %v1410_v24  ;;  %v5038_v32 = vpop.f32.mrb[54].mxu1  ;;  %v7566_v58 = vpop.f32.mrb[40].mxu0 }
 0x240   : > { %8680 = vst [vmem:[#allocation50_spill] sm:$0xff] %v7566_v58  ;;  %v1425_v29 = vadd.f32 %v5038_v32, %v7410_v48  ;;  %v1419_v55 = vpop.f32.mrb[55].mxu1  ;;  %v7569_v8 = vpop.f32.mrb[41].mxu0 }
 0x241   : > { %8681 = vst [vmem:[#allocation56_spill] sm:$0xff] %v7569_v8  ;;  %v1420_v52 = vadd.f32 %v7410_v48, %v1419_v55  ;;  %5289 = vmatprep.mubr.f32.mxu1 %v2020_v22 }
 0x242   : > { %v2023_v34 = vmul.f32 %v1957_v2, %v1425_v29  ;;  %5290 = vmatmul.mubr.f32.gmra.mrb[116].mxu1 %v2021_v3  ;;  %v1961_v3 = vrot.slane %v1929_v12, %v7419_v54 }
 0x243   : > { %v2022_v42 = vmul.f32 %v1957_v2, %v1420_v52  ;;  %v5041_v13 = vpop.f32.mrb[56].mxu1  ;;  %v7572_v60 = vpop.f32.mrb[42].mxu0 }
 0x244   : > { %8682 = vst [vmem:[#allocation51_spill] sm:$0xff] %v7572_v60  ;;  %v1435_v61 = vadd.f32 %v5041_v13, %v7410_v48  ;;  %v1429_v59 = vpop.f32.mrb[57].mxu1  ;;  %v7577_v16 = vpop.f32.mrb[43].mxu0 }
 0x245   : > { %8683 = vst [vmem:[#allocation52_spill] sm:$0xff] %v7577_v16  ;;  %v1430_v63 = vadd.f32 %v7410_v48, %v1429_v59  ;;  %5292 = vmatprep.mubr.f32.mxu1 %v2022_v42 }
 0x246   : > { %v2025_v30 = vmul.f32 %v1957_v2, %v1435_v61  ;;  %5293 = vmatmul.mubr.f32.gmra.mrb[118].mxu1 %v2023_v34 }
 0x247   : > { %v2024_v28 = vmul.f32 %v1957_v2, %v1430_v63  ;;  %v5044_v20 = vpop.f32.mrb[58].mxu1  ;;  %v7580_v24 = vpop.f32.mrb[44].mxu0 }
 0x248   : > { %8684 = vst [vmem:[#allocation33_spill] sm:$0xff] %v7580_v24  ;;  %v1445_v22 = vadd.f32 %v5044_v20, %v7410_v48  ;;  %v1439_v32 = vpop.f32.mrb[59].mxu1  ;;  %v7584_v15 = vpop.f32.mrb[45].mxu0 }
 0x249   : > { %8685 = vst [vmem:[#allocation53_spill] sm:$0xff] %v7584_v15  ;;  %v1440_v29 = vadd.f32 %v7410_v48, %v1439_v32  ;;  %5295 = vmatprep.mubr.f32.mxu1 %v2024_v28 }
 0x24a   : > { %v2027_v55 = vmul.f32 %v1961_v3, %v1445_v22  ;;  %5296 = vmatmul.mubr.f32.gmra.mrb[120].mxu1 %v2025_v30 }
 0x24b   : > { %v2026_v52 = vmul.f32 %v1961_v3, %v1440_v29  ;;  %v5047_v42 = vpop.f32.mrb[60].mxu1  ;;  %v7587_v13 = vpop.f32.mrb[46].mxu0 }
 0x24c   : > { %8686 = vst [vmem:[#allocation54_spill] sm:$0xff] %v7587_v13  ;;  %v1455_v2 = vadd.f32 %v5047_v42, %v7410_v48  ;;  %v1449_v34 = vpop.f32.mrb[61].mxu1  ;;  %v7590_v61 = vpop.f32.mrb[47].mxu0 }
 0x24d   : > { %8687 = vst [vmem:[#allocation43_spill] sm:$0xff] %v7590_v61  ;;  %v1450_v12 = vadd.f32 %v7410_v48, %v1449_v34  ;;  %5298 = vmatprep.mubr.f32.mxu1 %v2026_v52 }
 0x24e   : > { %v2029_v59 = vmul.f32 %v1961_v3, %v1455_v2  ;;  %5299 = vmatmul.mubr.f32.gmra.mrb[122].mxu1 %v2027_v55 }
 0x24f   : > { %v2028_v63 = vmul.f32 %v1961_v3, %v1450_v12  ;;  %v5050_v20 = vpop.f32.mrb[62].mxu1  ;;  %v7593_v32 = vpop.f32.mrb[48].mxu0 }
 0x250   : > { %8688 = vst [vmem:[#allocation57_spill] sm:$0xff] %v7593_v32  ;;  %v1465_v30 = vadd.f32 %v5050_v20, %v7410_v48  ;;  %v1459_v28 = vpop.f32.mrb[63].mxu1  ;;  %v7596_v22 = vpop.f32.mrb[49].mxu0 }
 0x251   : > { %8689 = vst [vmem:[#allocation58_spill] sm:$0xff] %v7596_v22  ;;  %v1460_v29 = vadd.f32 %v7410_v48, %v1459_v28  ;;  %5301 = vmatprep.mubr.f32.mxu1 %v2028_v63 }
 0x252   : > { %v2031_v42 = vmul.f32 %v1961_v3, %v1465_v30  ;;  %5302 = vmatmul.mubr.f32.gmra.mrb[124].mxu1 %v2029_v59 }
 0x253   : > { %v2030_v0 = vmul.f32 %v1961_v3, %v1460_v29  ;;  %v5053_v61 = vpop.f32.mrb[64].mxu1  ;;  %v7599_v34 = vpop.f32.mrb[50].mxu0 }
 0x254   : > { %8690 = vst [vmem:[#allocation59_spill] sm:$0xff] %v7599_v34  ;;  %v1475_v55 = vadd.f32 %v5053_v61, %v7410_v48  ;;  %v1469_v52 = vpop.f32.mrb[65].mxu1  ;;  %v7602_v2 = vpop.f32.mrb[51].mxu0 }
 0x255   : > { %8691 = vst [vmem:[#allocation60_spill] sm:$0xff] %v7602_v2  ;;  %v1470_v12 = vadd.f32 %v7410_v48, %v1469_v52  ;;  %5304 = vmatprep.mubr.f32.mxu1 %v2030_v0 }
 0x256   : > { %v2033_v20 = vmul.f32 %v1961_v3, %v1475_v55  ;;  %5305 = vmatmul.mubr.f32.gmra.mrb[126].mxu1 %v2031_v42 }
 0x257   : > { %v2032_v22 = vmul.f32 %v1961_v3, %v1470_v12  ;;  %v7605_v32 = vpop.f32.mrb[52].mxu0  ;;  %v1879_v12 = vld [vmem:[%s8706_s21] sm:$0xff] }
 0x258   : > { %8692 = vst [vmem:[#allocation61_spill] sm:$0xff] %v7605_v32  ;;  %v7607_v63 = vpop.f32.mrb[53].mxu0  ;;  %5345 = vmatprep.subr.mxu0 %v1879_v12  ;;  %5704 = vmatprep.subr.mxu1 %v1879_v12 }
 0x259   : > { %8693 = vst [vmem:[#allocation62_spill] sm:$0xff] %v7607_v63  ;;  %5307 = vmatprep.mubr.f32.mxu1 %v2032_v22  ;;  %5346 = vmatpush3.msra.mxu0 %v1879_v12 }
 0x25a   : > { %5308 = vmatmul.mubr.f32.gmra.mrb[128].mxu1 %v2033_v20  ;;  %5680 = vmatprep.subr.bf16.mxu0 %v8587_v47 }
 0x25b   : > { %v7609_v59 = vpop.f32.mrb[54].mxu0  ;;  %5705 = vmatpush3.msra.mxu1 %v1879_v12 }
 0x25c   : > { %8694 = vst [vmem:[#allocation63_spill] sm:$0xff] %v7609_v59  ;;  %v7611_v30 = vpop.f32.mrb[55].mxu0  ;;  %5443 = vmatprep.subr.mxu1 %v8647_v5 }
 0x25d   : > { %8695 = vst [vmem:[#allocation64_spill] sm:$0xff] %v7611_v30 }
 0x25f   : > { %v7613_v61 = vpop.f32.mrb[56].mxu0 }
 0x260   : > { %8696 = vst [vmem:[#allocation65_spill] sm:$0xff] %v7613_v61  ;;  %v7615_v28 = vpop.f32.mrb[57].mxu0 }
 0x261   : > { %8697 = vst [vmem:[#allocation66_spill] sm:$0xff] %v7615_v28 }
 0x263   : > { %v7617_v29 = vpop.f32.mrb[58].mxu0 }
 0x264   : > { %8698 = vst [vmem:[#allocation67_spill] sm:$0xff] %v7617_v29  ;;  %v7619_v48 = vpop.f32.mrb[59].mxu0 }
 0x265   : > { %8699 = vst [vmem:[#allocation68_spill] sm:$0xff] %v7619_v48 }
 0x267   : > { %v7621_v0 = vpop.f32.mrb[60].mxu0 }
 0x268   : > { %8700 = vst [vmem:[#allocation69_spill] sm:$0xff] %v7621_v0  ;;  %v7623_v3 = vpop.f32.mrb[61].mxu0 }
 0x269   : > { %8701 = vst [vmem:[#allocation70_spill] sm:$0xff] %v7623_v3 }
 0x26b   : > { %v7625_v42 = vpop.f32.mrb[62].mxu0 }
 0x26c   : > { %8702 = vst [vmem:[#allocation71_spill] sm:$0xff] %v7625_v42  ;;  %v7627_v22 = vpop.f32.mrb[63].mxu0 }
 0x26d   : > { %8703 = vst [vmem:[#allocation72_spill] sm:$0xff] %v7627_v22 }
 0x26f   : > { %v7629_v55 = vpop.f32.mrb[64].mxu0 }
 0x270   : > { %8704 = vst [vmem:[#allocation73_spill] sm:$0xff] %v7629_v55  ;;  %v7631_v52 = vpop.f32.mrb[65].mxu0 }
 0x271   : > { %8705 = vst [vmem:[#allocation74_spill] sm:$0xff] %v7631_v52 }
 0x273   : > { %v7636_v20 = vpop.f32.mrb[66].mxu0 }
 0x274   : > { %8707 = vst [vmem:[#allocation75_spill] sm:$0xff] %v7636_v20  ;;  %v7638_v0 = vpop.f32.mrb[67].mxu0 }
 0x275   : > { %8708 = vst [vmem:[#allocation76_spill] sm:$0xff] %v7638_v0 }
 0x291   : > { %v7642_v22 = vpop.f32.mrb[68].mxu0 }
 0x292   : > { %v5344_v55 = vpop.f32.mrb[69].mxu0 }
 0x2b1   : > { %v7644_v52 = vpop.f32.mrb[66].mxu1 }
 0x2b2   : > { %v2492_v42 = vsel %vm2490_vm8, %v7644_v52, -inf  ;;  %v7648_v3 = vpop.f32.mrb[67].mxu1 }
 0x2b3   : > { %v2491_v12 = vsel %vm2490_vm8, %v7648_v3, -inf }
 0x2b4   : > { %v2493_v20 = vmax.f32 %v2491_v12, %v2492_v42 }
 0x2b5   : > { %v7652_v0 = vpop.f32.mrb[68].mxu1 }
 0x2b6   : > { %v7654_v48 = vpop.f32.mrb[69].mxu1  ;;  %v2496_v28 = vsel %vm2490_vm8, %v7652_v0, -inf }
 0x2b7   : > { %v2494_v29 = vsel %vm2490_vm8, %v7654_v48, -inf }
 0x2b8   : > { %v2495_v55 = vmax.f32 %v2493_v20, %v2494_v29 }
 0x2b9   : > { %v7660_v61 = vpop.f32.mrb[70].mxu1 }
 0x2ba   : > { %v2120_v30 = vpop.f32.mrb[71].mxu1  ;;  %v2497_v59 = vmax.f32 %v2495_v55, %v2496_v28  ;;  %v2500_v42 = vsel %vm2490_vm8, %v7660_v61, -inf }
 0x2bb   : > { %v2498_v63 = vsel %vm2490_vm8, %v2120_v30, -inf }
 0x2bc   : > { %v2499_v32 = vmax.f32 %v2497_v59, %v2498_v63 }
 0x2bd   : > { %v7665_v12 = vpop.f32.mrb[72].mxu1 }
 0x2be   : > { %v7667_v2 = vpop.f32.mrb[73].mxu1  ;;  %v2501_v34 = vmax.f32 %v2499_v32, %v2500_v42  ;;  %v2504_v13 = vsel %vm2490_vm8, %v7665_v12, -inf }
 0x2bf   : > { %v2502_v29 = vsel %vm2490_vm8, %v7667_v2, -inf }
 0x2c0   : > { %v2503_v20 = vmax.f32 %v2501_v34, %v2502_v29 }
 0x2c1   : > { %v7673_v15 = vpop.f32.mrb[74].mxu1 }
 0x2c2   : > { %v2505_v28 = vmax.f32 %v2503_v20, %v2504_v13  ;;  %v2513_v63 = vsel %vm2490_vm8, %v7673_v15, -inf  ;;  %v7677_v59 = vpop.f32.mrb[75].mxu1 }
 0x2c3   : > { %v2512_v55 = vsel %vm2490_vm8, %v7677_v59, -inf }
 0x2c4   : > { %v2506_v24 = vrot.slane %v2505_v28, 4  ;;  %v2514_v32 = vmax.f32 %v2512_v55, %v2513_v63 }
 0x2c5   : > { %v7681_v42 = vpop.f32.mrb[76].mxu1 }
 0x2c6   : > { %v2507_v16 = vmax.f32 %v2505_v28, %v2506_v24  ;;  %v7683_v34 = vpop.f32.mrb[77].mxu1  ;;  %v2517_v20 = vsel %vm2490_vm8, %v7681_v42, -inf }
 0x2c7   : > { %v2515_v29 = vsel %vm2490_vm8, %v7683_v34, -inf }
 0x2c8   : > { %v2508_v60 = vrot.slane %v2507_v16, 2  ;;  %v2516_v13 = vmax.f32 %v2514_v32, %v2515_v29 }
 0x2c9   : > { %v7689_v8 = vpop.f32.mrb[78].mxu1 }
 0x2ca   : > { %v2509_v58 = vmax.f32 %v2507_v16, %v2508_v60  ;;  %v7691_v9 = vpop.f32.mrb[79].mxu1  ;;  %v2518_v33 = vmax.f32 %v2516_v13, %v2517_v20  ;;  %v2521_v55 = vsel %vm2490_vm8, %v7689_v8, -inf }
 0x2cb   : > { %v2519_v63 = vsel %vm2490_vm8, %v7691_v9, -inf }
 0x2cc   : > { %v2510_v24 = vrot.slane %v2509_v58, 1  ;;  %v2520_v28 = vmax.f32 %v2518_v33, %v2519_v63 }
 0x2cd   : > { %v7697_v19 = vpop.f32.mrb[80].mxu1 }
 0x2ce   : > { %v2511_v32 = vmax.f32 %v2509_v58, %v2510_v24  ;;  %v7699_v29 = vpop.f32.mrb[81].mxu1  ;;  %v2522_v4 = vmax.f32 %v2520_v28, %v2521_v55  ;;  %v2525_v20 = vsel %vm2490_vm8, %v7697_v19, -inf }
 0x2cf   : > { %v2523_v60 = vsel %vm2490_vm8, %v7699_v29, -inf }
 0x2d0   : > { %v7704_v16 = vmax.f32 %v2511_v32, %v7642_v22  ;;  %v2524_v13 = vmax.f32 %v2522_v4, %v2523_v60 }
 0x2d1   : > { %v7708_v33 = vpop.f32.mrb[82].mxu1 }
 0x2d2   : > { %v2686_v63 = vrot.slane %v7704_v16, %v7419_v54  ;;  %v2526_v37 = vmax.f32 %v2524_v13, %v2525_v20  ;;  %v7712_v58 = vpop.f32.mrb[83].mxu1  ;;  %v2534_v24 = vsel %vm2490_vm8, %v7708_v33, -inf }
 0x2d3   : > { %v2533_v28 = vsel %vm2490_vm8, %v7712_v58, -inf }
 0x2d4   : > { %v2715_v55 = vsub.f32 %v7648_v3, %v2686_v63  ;;  %v2716_v4 = vsub.f32 %v7644_v52, %v2686_v63  ;;  %v2717_v32 = vsub.f32 %v7654_v48, %v2686_v63  ;;  %v2718_v60 = vsub.f32 %v7652_v0, %v2686_v63 }
 0x2d5   : > { %v2719_v1 = vsub.f32 %v2120_v30, %v2686_v63  ;;  %v2720_v46 = vsub.f32 %v7660_v61, %v2686_v63  ;;  %v2721_v13 = vsub.f32 %v7667_v2, %v2686_v63  ;;  %v2722_v20 = vsub.f32 %v7665_v12, %v2686_v63  ;;  %v7725_v50 = vpop.f32.mrb[84].mxu1 }
 0x2d6   : > { %v2779_v53 = vmul.f32 1.442695, %v2715_v55  ;;  %v2781_v10 = vmul.f32 1.442695, %v2716_v4  ;;  %v2783_v41 = vmul.f32 1.442695, %v2717_v32  ;;  %v2535_v62 = vmax.f32 %v2533_v28, %v2534_v24 }
 0x2d7   : > { %v2785_v3 = vmul.f32 1.442695, %v2718_v60  ;;  %v2787_v52 = vmul.f32 1.442695, %v2719_v1  ;;  %v2527_v31 = vrot.slane %v2526_v37, 4  ;;  %v7727_v48 = vpop.f32.mrb[85].mxu1 }
 0x2d8   : > { %5799 = vpow2.f32 %v2779_v53  ;;  %v2536_v30 = vsel %vm2490_vm8, %v7727_v48, -inf  ;;  %v2789_v2 = vmul.f32 1.442695, %v2720_v46  ;;  %v2791_v24 = vmul.f32 1.442695, %v2721_v13 }
 0x2d9   : > { %5801 = vpow2.f32 %v2781_v10  ;;  %v7731_v61 = vpop.f32.mrb[86].mxu1  ;;  %v2528_v0 = vmax.f32 %v2526_v37, %v2527_v31  ;;  %v2537_v12 = vmax.f32 %v2535_v62, %v2536_v30  ;;  %v2538_v53 = vsel %vm2490_vm8, %v7725_v50, -inf }
 0x2da   : > { %5803 = vpow2.f32 %v2783_v41  ;;  %v7733_v63 = vpop.f32.mrb[87].mxu1  ;;  %v2793_v10 = vmul.f32 1.442695, %v2722_v20  ;;  %v2542_v46 = vsel %vm2490_vm8, %v7731_v61, -inf }
 0x2db   : > { %5805 = vpow2.f32 %v2785_v3  ;;  %v2540_v1 = vsel %vm2490_vm8, %v7733_v63, -inf  ;;  %v2529_v28 = vrot.slane %v2528_v0, 2  ;;  %v2539_v55 = vmax.f32 %v2537_v12, %v2538_v53 }
 0x2dc   : > { %5807 = vpow2.f32 %v2787_v52  ;;  %v2660_v52 = vrot.slane %v7642_v22, 1 }
 0x2dd   : > { %v7739_v4 = vpop.f32.mrb[88].mxu1  ;;  %5809 = vpow2.f32 %v2789_v2  ;;  %v2530_v41 = vmax.f32 %v2528_v0, %v2529_v28  ;;  %v2541_v31 = vmax.f32 %v2539_v55, %v2540_v1 }
 0x2de   : > { %v7741_v62 = vpop.f32.mrb[89].mxu1  ;;  %5811 = vpow2.f32 %v2791_v24  ;;  %v2546_v53 = vsel %vm2490_vm8, %v7739_v4, -inf }
 0x2df   : > { %v2544_v37 = vsel %vm2490_vm8, %v7741_v62, -inf  ;;  %5813 = vpow2.f32 %v2793_v10  ;;  %v2531_v32 = vrot.slane %v2530_v41, 1  ;;  %v2543_v60 = vmax.f32 %v2541_v31, %v2542_v46 }
 0x2e1   : > { %v7747_v13 = vpop.f32.mrb[90].mxu1  ;;  %v2532_v3 = vmax.f32 %v2530_v41, %v2531_v32  ;;  %v2545_v30 = vmax.f32 %v2543_v60, %v2544_v37 }
 0x2e2   : > { %v5800_v20 = vpop.eup %5799  ;;  %v7752_v2 = vsel %vm2490_vm8, %v7747_v13, -inf  ;;  %v7754_v0 = vpop.f32.mrb[91].mxu1 }
 0x2e3   : > { %v5802_v12 = vpop.eup %5801  ;;  %v2933_v24 = vsel %vm2490_vm8, %v5800_v20, 0.0  ;;  %v2554_v1 = vsel %vm2490_vm8, %v7754_v0, -inf  ;;  %5347 = vmatprep.mubr.msk.f32.mxu0 %vm2490_vm8, %v5800_v20  ;;  %v2676_v55 = vmax.f32 %v2532_v3, %v2660_v52  ;;  %v2547_v41 = vmax.f32 %v2545_v30, %v2546_v53 }
 0x2e4   : > { %v5804_v10 = vpop.eup %5803  ;;  %v2934_v28 = vsel %vm2490_vm8, %v5802_v12, 0.0  ;;  %v2556_v31 = vmax.f32 %v2554_v1, %v7752_v2  ;;  %5348 = vmatmul.mubr.msk.f32.vlgmr.msra.gmra.mrb[70].mxu0 %vm2490_vm8, %v5802_v12 }
 0x2e5   : > { %v5806_v46 = vpop.eup %5805  ;;  %v2935_v37 = vadd.f32 %v2934_v28, %v2933_v24  ;;  %v7765_v32 = vpop.f32.mrb[92].mxu1  ;;  %5350 = vmatprep.mubr.msk.f32.mxu0 %vm2490_vm8, %v5804_v10  ;;  %v2936_v57 = vsel %vm2490_vm8, %v5804_v10, 0.0  ;;  %v2690_v20 = vrot.slane %v2676_v55, %v7419_v54  ;;  %v2915_v52 = vrot.slane %v2676_v55, 7 }
 0x2e6   : > { %v5808_v60 = vpop.eup %5807  ;;  %v7770_v51 = vpop.f32.mrb[93].mxu1  ;;  %v2938_v3 = vsel %vm2490_vm8, %v5806_v46, 0.0  ;;  %v2548_v30 = vrot.slane %v2547_v41, 4  ;;  %v2559_v55 = vsel %vm2490_vm8, %v7765_v32, -inf }
 0x2e7   : > { %v2937_v21 = vadd.f32 %v2936_v57, %v2935_v37  ;;  %v5810_v2 = vpop.eup %5809  ;;  %v2940_v12 = vsel %vm2490_vm8, %v5808_v60, 0.0  ;;  %v2723_v24 = vsub.f32 %v7677_v59, %v2690_v20  ;;  %v2724_v53 = vsub.f32 %v7673_v15, %v2690_v20 }
 0x2e8   : > { %v2725_v1 = vsub.f32 %v7683_v34, %v2690_v20  ;;  %5351 = vmatmul.mubr.msk.f32.gmra.mrb[72].mxu0 %vm2490_vm8, %v5806_v46  ;;  %v5812_v10 = vpop.eup %5811  ;;  %v2726_v11 = vsub.f32 %v7681_v42, %v2690_v20  ;;  %v2727_v57 = vsub.f32 %v7691_v9, %v2690_v20  ;;  %v2728_v15 = vsub.f32 %v7689_v8, %v2690_v20 }
 0x2e9   : > { %v2939_v28 = vadd.f32 %v2938_v3, %v2937_v21  ;;  %v7782_v37 = vpop.f32.mrb[94].mxu1  ;;  %5353 = vmatprep.mubr.msk.f32.mxu0 %vm2490_vm8, %v5808_v60  ;;  %v5814_v59 = vpop.eup %5813  ;;  %v2729_v34 = vsub.f32 %v7699_v29, %v2690_v20  ;;  %v2730_v46 = vsub.f32 %v7697_v19, %v2690_v20  ;;  %v2557_v21 = vsel %vm2490_vm8, %v7770_v51, -inf }
 0x2ea   : > { %v7790_v42 = vpop.f32.mrb[95].mxu1  ;;  %v2795_v3 = vmul.f32 1.442695, %v2723_v24  ;;  %v2797_v17 = vmul.f32 1.442695, %v2724_v53  ;;  %v2942_v7 = vsel %vm2490_vm8, %v5810_v2, 0.0  ;;  %v7796_v8 = vsel %vm815_vm1, %v2915_v52, %v7704_v16 }
 0x2eb   : > { %v2941_v9 = vadd.f32 %v2940_v12, %v2939_v28  ;;  %v2799_v23 = vmul.f32 1.442695, %v2725_v1  ;;  %v2944_v60 = vsel %vm2490_vm8, %v5812_v10, 0.0  ;;  %v2801_v18 = vmul.f32 1.442695, %v2726_v11 }
 0x2ec   : > { %5354 = vmatmul.mubr.msk.f32.gmra.mrb[74].mxu0 %vm2490_vm8, %v5810_v2  ;;  %v2946_v29 = vsel %vm2490_vm8, %v5814_v59, 0.0  ;;  %5815 = vpow2.f32 %v2795_v3  ;;  %v2803_v20 = vmul.f32 1.442695, %v2727_v57  ;;  %v2805_v24 = vmul.f32 1.442695, %v2728_v15 }
 0x2ed   : > { %v2943_v19 = vadd.f32 %v2942_v7, %v2941_v9  ;;  %v7800_v12 = vpop.f32.mrb[96].mxu1  ;;  %5356 = vmatprep.mubr.msk.f32.mxu0 %vm2490_vm8, %v5812_v10  ;;  %5817 = vpow2.f32 %v2797_v17  ;;  %v2549_v53 = vmax.f32 %v2547_v41, %v2548_v30  ;;  %v2558_v1 = vmax.f32 %v2556_v31, %v2557_v21 }
 0x2ee   : > { %v7803_v11 = vpop.f32.mrb[97].mxu1  ;;  %5819 = vpow2.f32 %v2799_v23  ;;  %v2807_v16 = vmul.f32 1.442695, %v2729_v34  ;;  %v2561_v7 = vsel %vm2490_vm8, %v7790_v42, -inf  ;;  %v2809_v52 = vmul.f32 1.442695, %v2730_v46 }
 0x2ef   : > { %v2945_v28 = vadd.f32 %v2944_v60, %v2943_v19  ;;  %5821 = vpow2.f32 %v2801_v18  ;;  %v2550_v2 = vrot.slane %v2549_v53, 2  ;;  %v2560_v57 = vmax.f32 %v2558_v1, %v2559_v55 }
 0x2f0   : > { %5357 = vmatmul.mubr.msk.f32.gmra.mrb[76].mxu0 %vm2490_vm8, %v5814_v59  ;;  %5823 = vpow2.f32 %v2803_v20  ;;  %v2563_v18 = vsel %vm2490_vm8, %v7782_v37, -inf  ;;  %v2565_v10 = vsel %vm2490_vm8, %v7803_v11, -inf  ;;  %v2661_v3 = vrot.slane %v7642_v22, 2 }
 0x2f1   : > { %v7808_v9 = vadd.f32 %v2946_v29, %v2945_v28  ;;  %v7810_v17 = vpop.f32.mrb[98].mxu1  ;;  %5825 = vpow2.f32 %v2805_v24  ;;  %v2551_v41 = vmax.f32 %v2549_v53, %v2550_v2  ;;  %v2562_v31 = vmax.f32 %v2560_v57, %v2561_v7 }
 0x2f2   : > { %v2576_v23 = vsel %vm2490_vm8, %v7810_v17, -inf  ;;  %v7814_v30 = vpop.f32.mrb[99].mxu1  ;;  %5827 = vpow2.f32 %v2807_v16  ;;  %v2567_v20 = vsel %vm2490_vm8, %v7800_v12, -inf }
 0x2f3   : > { %v2575_v55 = vsel %vm2490_vm8, %v7814_v30, -inf  ;;  %5829 = vpow2.f32 %v2809_v52  ;;  %v2552_v59 = vrot.slane %v2551_v41, 1  ;;  %v2564_v15 = vmax.f32 %v2562_v31, %v2563_v18 }
 0x2f4   : > { %v2577_v34 = vmax.f32 %v2575_v55, %v2576_v23 }
 0x2f5   : > { %v7822_v46 = vpop.f32.mrb[100].mxu1  ;;  %v2553_v21 = vmax.f32 %v2551_v41, %v2552_v59  ;;  %v2566_v60 = vmax.f32 %v2564_v15, %v2565_v10 }
 0x2f6   : > { %v7825_v19 = vpop.f32.mrb[101].mxu1  ;;  %v5816_v29 = vpop.eup %5815  ;;  %v2580_v15 = vsel %vm2490_vm8, %v7822_v46, -inf }
 0x2f7   : > { %v2578_v24 = vsel %vm2490_vm8, %v7825_v19, -inf  ;;  %v5818_v53 = vpop.eup %5817  ;;  %v2954_v1 = vsel %vm2490_vm8, %v5816_v29, 0.0  ;;  %v2677_v28 = vmax.f32 %v2553_v21, %v2661_v3  ;;  %v2568_v16 = vmax.f32 %v2566_v60, %v2567_v20  ;;  %5359 = vmatprep.mubr.msk.f32.mxu0 %vm2490_vm8, %v5816_v29 }
 0x2f8   : > { %v7833_v7 = vmax.f32 %v2577_v34, %v2578_v24  ;;  %v5820_v52 = vpop.eup %5819  ;;  %v2955_v2 = vsel %vm2490_vm8, %v5818_v53, 0.0  ;;  %5360 = vmatmul.mubr.msk.f32.gmra.mrb[78].mxu0 %vm2490_vm8, %v5818_v53 }
 0x2f9   : > { %v7837_v57 = vpop.f32.mrb[102].mxu1  ;;  %v5822_v41 = vpop.eup %5821  ;;  %v2956_v31 = vadd.f32 %v2955_v2, %v2954_v1  ;;  %v2694_v23 = vrot.slane %v2677_v28, %v7419_v54  ;;  %5362 = vmatprep.mubr.msk.f32.mxu0 %vm2490_vm8, %v5820_v52  ;;  %v2957_v55 = vsel %vm2490_vm8, %v5820_v52, 0.0  ;;  %v2917_v59 = vrot.slane %v2677_v28, 6 }
 0x2fa   : > { %v7841_v18 = vpop.f32.mrb[103].mxu1  ;;  %v5824_v10 = vpop.eup %5823  ;;  %v2959_v3 = vsel %vm2490_vm8, %v5822_v41, 0.0  ;;  %v2569_v1 = vrot.slane %v2568_v16, 4  ;;  %v2584_v28 = vsel %vm2490_vm8, %v7837_v57, -inf }
 0x2fb   : > { %v5826_v34 = vpop.eup %5825  ;;  %v2958_v21 = vadd.f32 %v2957_v55, %v2956_v31  ;;  %v2731_v60 = vsub.f32 %v7712_v58, %v2694_v23  ;;  %v2732_v29 = vsub.f32 %v7708_v33, %v2694_v23  ;;  %v2733_v24 = vsub.f32 %v7727_v48, %v2694_v23 }
 0x2fc   : > { %v5828_v20 = vpop.eup %5827  ;;  %v2734_v53 = vsub.f32 %v7725_v50, %v2694_v23  ;;  %5363 = vmatmul.mubr.msk.f32.gmra.mrb[80].mxu0 %vm2490_vm8, %v5822_v41  ;;  %v2961_v55 = vsel %vm2490_vm8, %v5824_v10, 0.0  ;;  %v2735_v58 = vsub.f32 %v7733_v63, %v2694_v23  ;;  %v2736_v33 = vsub.f32 %v7731_v61, %v2694_v23 }
 0x2fd   : > { %v7854_v52 = vpop.f32.mrb[104].mxu1  ;;  %v5830_v2 = vpop.eup %5829  ;;  %v2960_v31 = vadd.f32 %v2959_v3, %v2958_v21  ;;  %5365 = vmatprep.mubr.msk.f32.mxu0 %vm2490_vm8, %v5824_v10  ;;  %v2963_v50 = vsel %vm2490_vm8, %v5826_v34, 0.0  ;;  %v2737_v41 = vsub.f32 %v7741_v62, %v2694_v23  ;;  %v2738_v43 = vsub.f32 %v7739_v4, %v2694_v23 }
 0x2fe   : > { %v7860_v48 = vpop.f32.mrb[105].mxu1  ;;  %v2811_v39 = vmul.f32 1.442695, %v2731_v60  ;;  %v2813_v56 = vmul.f32 1.442695, %v2732_v29  ;;  %v2965_v38 = vsel %vm2490_vm8, %v5828_v20, 0.0  ;;  %v7870_v62 = vsel %vm818_vm2, %v2917_v59, %v7796_v8 }
 0x2ff   : > { %v2962_v36 = vadd.f32 %v2961_v55, %v2960_v31  ;;  %v2815_v21 = vmul.f32 1.442695, %v2733_v24  ;;  %v2817_v3 = vmul.f32 1.442695, %v2734_v53  ;;  %v2967_v63 = vsel %vm2490_vm8, %v5830_v2, 0.0 }
 0x300   : > { %5831 = vpow2.f32 %v2811_v39  ;;  %v2819_v61 = vmul.f32 1.442695, %v2735_v58  ;;  %5366 = vmatmul.mubr.msk.f32.gmra.mrb[82].mxu0 %vm2490_vm8, %v5826_v34  ;;  %v2821_v35 = vmul.f32 1.442695, %v2736_v33  ;;  %v2570_v23 = vmax.f32 %v2568_v16, %v2569_v1 }
 0x301   : > { %v2964_v10 = vadd.f32 %v2963_v50, %v2962_v36  ;;  %5833 = vpow2.f32 %v2813_v56  ;;  %5368 = vmatprep.mubr.msk.f32.mxu0 %vm2490_vm8, %v5828_v20  ;;  %v7873_v4 = vpop.f32.mrb[106].mxu1  ;;  %v2581_v60 = vmax.f32 %v7833_v7, %v2580_v15  ;;  %v2582_v39 = vsel %vm2490_vm8, %v7841_v18, -inf }
 0x302   : > { %5835 = vpow2.f32 %v2815_v21  ;;  %v7878_v29 = vpop.f32.mrb[107].mxu1  ;;  %v2823_v56 = vmul.f32 1.442695, %v2737_v41  ;;  %v2825_v34 = vmul.f32 1.442695, %v2738_v43  ;;  %v2571_v8 = vrot.slane %v2570_v23, 2 }
 0x303   : > { %v2966_v36 = vadd.f32 %v2965_v38, %v2964_v10  ;;  %5837 = vpow2.f32 %v2817_v3  ;;  %v2583_v59 = vmax.f32 %v2581_v60, %v2582_v39  ;;  %v2597_v20 = vsel %vm2490_vm8, %v7873_v4, -inf }
 0x304   : > { %5839 = vpow2.f32 %v2819_v61  ;;  %5369 = vmatmul.mubr.msk.f32.gmra.mrb[84].mxu0 %vm2490_vm8, %v5830_v2  ;;  %v2586_v15 = vsel %vm2490_vm8, %v7860_v48, -inf  ;;  %v2596_v38 = vsel %vm2490_vm8, %v7878_v29, -inf  ;;  %v2572_v24 = vmax.f32 %v2570_v23, %v2571_v8 }
 0x305   : > { %v7883_v16 = vpop.f32.mrb[108].mxu1  ;;  %v7885_v7 = vadd.f32 %v2967_v63, %v2966_v36  ;;  %5841 = vpow2.f32 %v2821_v35  ;;  %v2585_v53 = vmax.f32 %v2583_v59, %v2584_v28  ;;  %v2598_v1 = vmax.f32 %v2596_v38, %v2597_v20 }
 0x306   : > { %v7891_v43 = vpop.f32.mrb[109].mxu1  ;;  %5843 = vpow2.f32 %v2823_v56  ;;  %v2573_v31 = vrot.slane %v2572_v24, 1  ;;  %v2662_v33 = vrot.slane %v7642_v22, 3  ;;  %v2588_v50 = vsel %vm2490_vm8, %v7854_v52, -inf }
 0x307   : > { %v2599_v2 = vsel %vm2490_vm8, %v7891_v43, -inf  ;;  %5845 = vpow2.f32 %v2825_v34  ;;  %v2587_v55 = vmax.f32 %v2585_v53, %v2586_v15  ;;  %v2601_v41 = vsel %vm2490_vm8, %v7883_v16, -inf }
 0x308   : > { %v2600_v58 = vmax.f32 %v2598_v1, %v2599_v2  ;;  %v2574_v3 = vmax.f32 %v2572_v24, %v2573_v31 }
 0x309   : > { %v7895_v35 = vpop.f32.mrb[110].mxu1  ;;  %v2589_v63 = vmax.f32 %v2587_v55, %v2588_v50 }
 0x30a   : > { %v7902_v28 = vpop.f32.mrb[111].mxu1  ;;  %v5832_v21 = vpop.eup %5831  ;;  %v2602_v61 = vmax.f32 %v2600_v58, %v2601_v41  ;;  %v2678_v56 = vmax.f32 %v2574_v3, %v2662_v33  ;;  %v2605_v2 = vsel %vm2490_vm8, %v7895_v35, -inf }
 0x30b   : > { %v2603_v10 = vsel %vm2490_vm8, %v7902_v28, -inf  ;;  %v5834_v23 = vpop.eup %5833  ;;  %v2975_v60 = vsel %vm2490_vm8, %v5832_v21, 0.0  ;;  %5371 = vmatprep.mubr.msk.f32.mxu0 %vm2490_vm8, %v5832_v21  ;;  %v2590_v15 = vrot.slane %v2589_v63, 4 }
 0x30c   : > { %v5836_v39 = vpop.eup %5835  ;;  %v2976_v36 = vsel %vm2490_vm8, %v5834_v23, 0.0  ;;  %5372 = vmatmul.mubr.msk.f32.gmra.mrb[86].mxu0 %vm2490_vm8, %v5834_v23  ;;  %v2604_v34 = vmax.f32 %v2602_v61, %v2603_v10  ;;  %v7917_v1 = vrot.slane %v2678_v56, %v7419_v54  ;;  %v2919_v61 = vrot.slane %v2678_v56, 5 }
 0x30d   : > { %v7910_v8 = vpop.f32.mrb[112].mxu1  ;;  %v5838_v59 = vpop.eup %5837  ;;  %v2977_v20 = vadd.f32 %v2976_v36, %v2975_v60  ;;  %5374 = vmatprep.mubr.msk.f32.mxu0 %vm2490_vm8, %v5836_v39  ;;  %v2978_v53 = vsel %vm2490_vm8, %v5836_v39, 0.0 }
 0x30e   : > { %v7913_v38 = vpop.f32.mrb[113].mxu1  ;;  %v5840_v24 = vpop.eup %5839  ;;  %v2980_v58 = vsel %vm2490_vm8, %v5838_v59, 0.0  ;;  %v2609_v33 = vsel %vm2490_vm8, %v7910_v8, -inf  ;;  %v2606_v50 = vmax.f32 %v2604_v34, %v2605_v2  ;;  %v2739_v41 = vsub.f32 %v7754_v0, %v7917_v1 }
 0x30f   : > { %v5842_v31 = vpop.eup %5841  ;;  %v2979_v55 = vadd.f32 %v2978_v53, %v2977_v20  ;;  %v2740_v21 = vsub.f32 %v7747_v13, %v7917_v1  ;;  %v2741_v3 = vsub.f32 %v7770_v51, %v7917_v1  ;;  %v2982_v39 = vsel %vm2490_vm8, %v5840_v24, 0.0 }
 0x310   : > { %5375 = vmatmul.mubr.msk.f32.gmra.mrb[88].mxu0 %vm2490_vm8, %v5838_v59  ;;  %v5844_v23 = vpop.eup %5843  ;;  %v2742_v36 = vsub.f32 %v7765_v32, %v7917_v1  ;;  %v2591_v34 = vmax.f32 %v2589_v63, %v2590_v15  ;;  %v2984_v51 = vsel %vm2490_vm8, %v5842_v31, 0.0  ;;  %v2743_v56 = vsub.f32 %v7790_v42, %v7917_v1 }
 0x311   : > { %v7931_v10 = vpop.f32.mrb[114].mxu1  ;;  %v2981_v60 = vadd.f32 %v2980_v58, %v2979_v55  ;;  %5377 = vmatprep.mubr.msk.f32.mxu0 %vm2490_vm8, %v5840_v24  ;;  %v5846_v13 = vpop.eup %5845  ;;  %v2744_v59 = vsub.f32 %v7782_v37, %v7917_v1  ;;  %v2745_v20 = vsub.f32 %v7803_v11, %v7917_v1  ;;  %v2746_v32 = vsub.f32 %v7800_v12, %v7917_v1 }
 0x312   : > { %v7937_v0 = vpop.f32.mrb[115].mxu1  ;;  %v2827_v63 = vmul.f32 1.442695, %v2739_v41  ;;  %v2829_v15 = vmul.f32 1.442695, %v2740_v21  ;;  %v2986_v24 = vsel %vm2490_vm8, %v5844_v23, 0.0  ;;  %v7951_v58 = vsel %vm821_vm3, %v2919_v61, %v7870_v62 }
 0x313   : > { %v2983_v53 = vadd.f32 %v2982_v39, %v2981_v60  ;;  %v2831_v2 = vmul.f32 1.442695, %v2741_v3  ;;  %v2833_v55 = vmul.f32 1.442695, %v2742_v36  ;;  %v2988_v42 = vsel %vm2490_vm8, %v5846_v13, 0.0 }
 0x314   : > { %5378 = vmatmul.mubr.msk.f32.gmra.mrb[90].mxu0 %vm2490_vm8, %v5842_v31  ;;  %5847 = vpow2.f32 %v2827_v63  ;;  %v2835_v11 = vmul.f32 1.442695, %v2743_v56  ;;  %v2837_v1 = vmul.f32 1.442695, %v2744_v59  ;;  %v2592_v41 = vrot.slane %v2591_v34, 2 }
 0x315   : > { %v2985_v37 = vadd.f32 %v2984_v51, %v2983_v53  ;;  %5380 = vmatprep.mubr.msk.f32.mxu0 %vm2490_vm8, %v5844_v23  ;;  %v7956_v12 = vpop.f32.mrb[116].mxu1  ;;  %5849 = vpow2.f32 %v2829_v15  ;;  %v2607_v21 = vsel %vm2490_vm8, %v7913_v38, -inf  ;;  %v2618_v61 = vsel %vm2490_vm8, %v7931_v10, -inf }
 0x316   : > { %v7960_v3 = vpop.f32.mrb[117].mxu1  ;;  %5851 = vpow2.f32 %v2831_v2  ;;  %v2608_v31 = vmax.f32 %v2606_v50, %v2607_v21  ;;  %v2839_v60 = vmul.f32 1.442695, %v2745_v20  ;;  %v2593_v39 = vmax.f32 %v2591_v34, %v2592_v41 }
 0x317   : > { %v2987_v62 = vadd.f32 %v2986_v24, %v2985_v37  ;;  %5853 = vpow2.f32 %v2833_v55  ;;  %v2617_v23 = vsel %vm2490_vm8, %v7937_v0, -inf  ;;  %v2663_v63 = vrot.slane %v7642_v22, 4 }
 0x318   : > { %5381 = vmatmul.mubr.msk.f32.gmra.mrb[92].mxu0 %vm2490_vm8, %v5846_v13  ;;  %v2610_v56 = vmax.f32 %v2608_v31, %v2609_v33  ;;  %v2619_v59 = vmax.f32 %v2617_v23, %v2618_v61  ;;  %5855 = vpow2.f32 %v2835_v11  ;;  %v2594_v50 = vrot.slane %v2593_v39, 1 }
 0x319   : > { %v7967_v36 = vpop.f32.mrb[118].mxu1  ;;  %v7969_v51 = vadd.f32 %v2988_v42, %v2987_v62  ;;  %v2620_v34 = vsel %vm2490_vm8, %v7960_v3, -inf  ;;  %5857 = vpow2.f32 %v2837_v1  ;;  %v2841_v13 = vmul.f32 1.442695, %v2746_v32 }
 0x31a   : > { %v7971_v53 = vpop.f32.mrb[119].mxu1  ;;  %v2611_v20 = vrot.slane %v2610_v56, 4  ;;  %v2621_v15 = vmax.f32 %v2619_v59, %v2620_v34  ;;  %5859 = vpow2.f32 %v2839_v60  ;;  %v2595_v24 = vmax.f32 %v2593_v39, %v2594_v50 }
 0x31b   : > { %v2622_v2 = vsel %vm2490_vm8, %v7956_v12, -inf  ;;  %v2624_v33 = vsel %vm2490_vm8, %v7971_v53, -inf  ;;  %5861 = vpow2.f32 %v2841_v13  ;;  %v2626_v61 = vsel %vm2490_vm8, %v7967_v36, -inf }
 0x31c   : > { %v2612_v37 = vmax.f32 %v2610_v56, %v2611_v20  ;;  %v2623_v42 = vmax.f32 %v2621_v15, %v2622_v2  ;;  %v2679_v41 = vmax.f32 %v2595_v24, %v2663_v63 }
 0x31d   : > { %v7980_v55 = vpop.f32.mrb[120].mxu1 }
 0x31e   : > { %v7982_v11 = vpop.f32.mrb[121].mxu1  ;;  %v5848_v21 = vpop.eup %5847  ;;  %v2625_v1 = vmax.f32 %v2623_v42, %v2624_v33  ;;  %v7986_v31 = vrot.slane %v2679_v41, %v7419_v54  ;;  %v2613_v56 = vrot.slane %v2612_v37, 2  ;;  %v2921_v33 = vrot.slane %v2679_v41, 4 }
 0x31f   : > { %v5850_v32 = vpop.eup %5849  ;;  %v2996_v62 = vsel %vm2490_vm8, %v5848_v21, 0.0  ;;  %5383 = vmatprep.mubr.msk.f32.mxu0 %vm2490_vm8, %v5848_v21 }
 0x320   : > { %v5852_v39 = vpop.eup %5851  ;;  %v2997_v23 = vsel %vm2490_vm8, %v5850_v32, 0.0  ;;  %5384 = vmatmul.mubr.msk.f32.gmra.mrb[94].mxu0 %vm2490_vm8, %v5850_v32  ;;  %v2627_v59 = vmax.f32 %v2625_v1, %v2626_v61  ;;  %v2747_v13 = vsub.f32 %v7814_v30, %v7986_v31  ;;  %v2748_v20 = vsub.f32 %v7810_v17, %v7986_v31 }
 0x321   : > { %v7991_v60 = vpop.f32.mrb[122].mxu1  ;;  %v5854_v63 = vpop.eup %5853  ;;  %v2998_v34 = vadd.f32 %v2997_v23, %v2996_v62  ;;  %5386 = vmatprep.mubr.msk.f32.mxu0 %vm2490_vm8, %v5852_v39  ;;  %v2999_v15 = vsel %vm2490_vm8, %v5852_v39, 0.0  ;;  %v2749_v24 = vsub.f32 %v7825_v19, %v7986_v31  ;;  %v2750_v2 = vsub.f32 %v7822_v46, %v7986_v31 }
 0x322   : > { %v7995_v50 = vpop.f32.mrb[123].mxu1  ;;  %v5856_v42 = vpop.eup %5855  ;;  %v2751_v1 = vsub.f32 %v7841_v18, %v7986_v31  ;;  %v2752_v30 = vsub.f32 %v7837_v57, %v7986_v31  ;;  %v2664_v17 = vrot.slane %v7642_v22, 5  ;;  %v3001_v61 = vsel %vm2490_vm8, %v5854_v63, 0.0 }
 0x323   : > { %v3000_v21 = vadd.f32 %v2999_v15, %v2998_v34  ;;  %v5858_v62 = vpop.eup %5857  ;;  %v2753_v19 = vsub.f32 %v7860_v48, %v7986_v31  ;;  %v2754_v46 = vsub.f32 %v7854_v52, %v7986_v31  ;;  %v2614_v41 = vmax.f32 %v2612_v37, %v2613_v56 }
 0x324   : > { %5387 = vmatmul.mubr.msk.f32.gmra.mrb[96].mxu0 %vm2490_vm8, %v5854_v63  ;;  %v5860_v39 = vpop.eup %5859  ;;  %v2843_v23 = vmul.f32 1.442695, %v2747_v13  ;;  %v2845_v34 = vmul.f32 1.442695, %v2748_v20  ;;  %v2628_v15 = vsel %vm2490_vm8, %v7982_v11, -inf  ;;  %v3003_v27 = vsel %vm2490_vm8, %v5856_v42, 0.0 }
 0x325   : > { %v8012_v32 = vpop.f32.mrb[124].mxu1  ;;  %v3002_v57 = vadd.f32 %v3001_v61, %v3000_v21  ;;  %5389 = vmatprep.mubr.msk.f32.mxu0 %vm2490_vm8, %v5856_v42  ;;  %v2847_v48 = vmul.f32 1.442695, %v2749_v24  ;;  %v2849_v40 = vmul.f32 1.442695, %v2750_v2  ;;  %v8028_v52 = vsel %vm824_vm4, %v2921_v33, %v7951_v58  ;;  %v5862_v58 = vpop.eup %5861 }
 0x326   : > { %v8020_v18 = vpop.f32.mrb[125].mxu1  ;;  %v3005_v31 = vsel %vm2490_vm8, %v5858_v62, 0.0  ;;  %5863 = vpow2.f32 %v2843_v23  ;;  %v2630_v56 = vsel %vm2490_vm8, %v7980_v55, -inf  ;;  %v3007_v13 = vsel %vm2490_vm8, %v5860_v39, 0.0 }
 0x327   : > { %v3004_v37 = vadd.f32 %v3003_v27, %v3002_v57  ;;  %5865 = vpow2.f32 %v2845_v34  ;;  %v2851_v20 = vmul.f32 1.442695, %v2751_v1  ;;  %v2615_v42 = vrot.slane %v2614_v41, 1 }
 0x328   : > { %5390 = vmatmul.mubr.msk.f32.gmra.mrb[98].mxu0 %vm2490_vm8, %v5858_v62  ;;  %5867 = vpow2.f32 %v2847_v48  ;;  %v2629_v27 = vmax.f32 %v2627_v59, %v2628_v15  ;;  %v2639_v33 = vsel %vm2490_vm8, %v7991_v60, -inf  ;;  %v2853_v21 = vmul.f32 1.442695, %v2752_v30 }
 0x329   : > { %v8033_v63 = vpop.f32.mrb[126].mxu1  ;;  %v3006_v2 = vadd.f32 %v3005_v31, %v3004_v37  ;;  %5392 = vmatprep.mubr.msk.f32.mxu0 %vm2490_vm8, %v5860_v39  ;;  %5869 = vpow2.f32 %v2849_v40  ;;  %v2616_v61 = vmax.f32 %v2614_v41, %v2615_v42  ;;  %v2638_v1 = vsel %vm2490_vm8, %v7995_v50, -inf }
 0x32a   : > { %v8037_v24 = vpop.f32.mrb[127].mxu1  ;;  %v2855_v23 = vmul.f32 1.442695, %v2753_v19  ;;  %v2631_v62 = vmax.f32 %v2629_v27, %v2630_v56  ;;  %v2640_v34 = vmax.f32 %v2638_v1, %v2639_v33  ;;  %v3009_v48 = vsel %vm2490_vm8, %v5862_v58, 0.0 }
 0x32b   : > { %v3008_v57 = vadd.f32 %v3007_v13, %v3006_v2  ;;  %5871 = vpow2.f32 %v2851_v20  ;;  %v2680_v39 = vmax.f32 %v2616_v61, %v2664_v17  ;;  %v2641_v40 = vsel %vm2490_vm8, %v8020_v18, -inf }
 0x32c   : > { %5393 = vmatmul.mubr.msk.f32.gmra.mrb[100].mxu0 %vm2490_vm8, %v5862_v58  ;;  %v2857_v41 = vmul.f32 1.442695, %v2754_v46  ;;  %v2642_v15 = vmax.f32 %v2640_v34, %v2641_v40  ;;  %5873 = vpow2.f32 %v2853_v21  ;;  %v2643_v37 = vsel %vm2490_vm8, %v8012_v32, -inf }
 0x32d   : > { %v8044_v14 = vpop.f32.mrb[128].mxu1  ;;  %v8052_v30 = vadd.f32 %v3009_v48, %v3008_v57  ;;  %v2706_v19 = vrot.slane %v2680_v39, %v7419_v54  ;;  %5875 = vpow2.f32 %v2855_v23  ;;  %v2632_v31 = vrot.slane %v2631_v62, 4 }
 0x32e   : > { %v8050_v59 = vpop.f32.mrb[129].mxu1  ;;  %v2644_v17 = vmax.f32 %v2642_v15, %v2643_v37  ;;  %5877 = vpow2.f32 %v2857_v41  ;;  %v2923_v23 = vrot.slane %v2680_v39, 3 }
 0x32f   : > { %v2755_v56 = vsub.f32 %v7878_v29, %v2706_v19  ;;  %v2756_v13 = vsub.f32 %v7873_v4, %v2706_v19  ;;  %v2757_v20 = vsub.f32 %v7891_v43, %v2706_v19  ;;  %v2758_v42 = vsub.f32 %v7883_v16, %v2706_v19 }
 0x330   : > { %v5864_v58 = vpop.eup %5863  ;;  %v2759_v46 = vsub.f32 %v7902_v28, %v2706_v19  ;;  %v2760_v2 = vsub.f32 %v7895_v35, %v2706_v19  ;;  %v2761_v27 = vsub.f32 %v7913_v38, %v2706_v19  ;;  %v2762_v61 = vsub.f32 %v7910_v8, %v2706_v19 }
 0x331   : > { %v5866_v33 = vpop.eup %5865  ;;  %v3017_v21 = vsel %vm2490_vm8, %v5864_v58, 0.0  ;;  %v2859_v29 = vmul.f32 1.442695, %v2755_v56  ;;  %v2861_v1 = vmul.f32 1.442695, %v2756_v13  ;;  %5395 = vmatprep.mubr.msk.f32.mxu0 %vm2490_vm8, %v5864_v58  ;;  %v2633_v48 = vmax.f32 %v2631_v62, %v2632_v31 }
 0x332   : > { %v5868_v4 = vpop.eup %5867  ;;  %v3018_v16 = vsel %vm2490_vm8, %v5866_v33, 0.0  ;;  %v2863_v43 = vmul.f32 1.442695, %v2757_v20  ;;  %v2865_v57 = vmul.f32 1.442695, %v2758_v42  ;;  %5396 = vmatmul.mubr.msk.f32.gmra.mrb[102].mxu0 %vm2490_vm8, %v5866_v33  ;;  %v2645_v19 = vsel %vm2490_vm8, %v8037_v24, -inf }
 0x333   : > { %v5870_v28 = vpop.eup %5869  ;;  %v3019_v35 = vadd.f32 %v3018_v16, %v3017_v21  ;;  %5879 = vpow2.f32 %v2859_v29  ;;  %v2867_v38 = vmul.f32 1.442695, %v2759_v46  ;;  %5398 = vmatprep.mubr.msk.f32.mxu0 %vm2490_vm8, %v5868_v4  ;;  %v3020_v8 = vsel %vm2490_vm8, %v5868_v4, 0.0 }
 0x334   : > { %5881 = vpow2.f32 %v2861_v1  ;;  %v2869_v34 = vmul.f32 1.442695, %v2760_v2  ;;  %v3022_v15 = vsel %vm2490_vm8, %v5870_v28, 0.0  ;;  %v8077_v56 = vsel %vm827_vm5, %v2923_v23, %v8028_v52 }
 0x335   : > { %v5872_v40 = vpop.eup %5871  ;;  %v3021_v41 = vadd.f32 %v3020_v8, %v3019_v35  ;;  %5883 = vpow2.f32 %v2863_v43  ;;  %v2871_v13 = vmul.f32 1.442695, %v2761_v27  ;;  %v2634_v20 = vrot.slane %v2633_v48, 2 }
 0x336   : > { %5885 = vpow2.f32 %v2865_v57  ;;  %5399 = vmatmul.mubr.msk.f32.gmra.mrb[104].mxu0 %vm2490_vm8, %v5870_v28  ;;  %v5874_v37 = vpop.eup %5873  ;;  %v3024_v31 = vsel %vm2490_vm8, %v5872_v40, 0.0  ;;  %v2647_v58 = vsel %vm2490_vm8, %v8033_v63, -inf  ;;  %v2646_v46 = vmax.f32 %v2644_v17, %v2645_v19 }
 0x337   : > { %v3023_v39 = vadd.f32 %v3022_v15, %v3021_v41  ;;  %5887 = vpow2.f32 %v2867_v38  ;;  %5401 = vmatprep.mubr.msk.f32.mxu0 %vm2490_vm8, %v5872_v40  ;;  %v5876_v62 = vpop.eup %5875  ;;  %v3026_v33 = vsel %vm2490_vm8, %v5874_v37, 0.0  ;;  %v2873_v21 = vmul.f32 1.442695, %v2762_v61 }
 0x338   : > { %5889 = vpow2.f32 %v2869_v34  ;;  %v5878_v2 = vpop.eup %5877  ;;  %v2635_v29 = vmax.f32 %v2633_v48, %v2634_v20  ;;  %v2649_v52 = vsel %vm2490_vm8, %v8050_v59, -inf  ;;  %v2648_v27 = vmax.f32 %v2646_v46, %v2647_v58 }
 0x339   : > { %v3025_v42 = vadd.f32 %v3024_v31, %v3023_v39  ;;  %v3028_v4 = vsel %vm2490_vm8, %v5876_v62, 0.0  ;;  %5891 = vpow2.f32 %v2871_v13  ;;  %v2665_v57 = vrot.slane %v7642_v22, 6 }
 0x33a   : > { %5402 = vmatmul.mubr.msk.f32.gmra.mrb[106].mxu0 %vm2490_vm8, %v5874_v37  ;;  %v2636_v16 = vrot.slane %v2635_v29, 1  ;;  %v2651_v61 = vsel %vm2490_vm8, %v8044_v14, -inf  ;;  %v2650_v28 = vmax.f32 %v2648_v27, %v2649_v52  ;;  %v3030_v38 = vsel %vm2490_vm8, %v5878_v2, 0.0 }
 0x33b   : > { %v3027_v1 = vadd.f32 %v3026_v33, %v3025_v42  ;;  %5404 = vmatprep.mubr.msk.f32.mxu0 %vm2490_vm8, %v5876_v62  ;;  %5893 = vpow2.f32 %v2873_v21 }
 0x33c   : > { %v2637_v8 = vmax.f32 %v2635_v29, %v2636_v16  ;;  %v2652_v41 = vmax.f32 %v2650_v28, %v2651_v61 }
 0x33d   : > { %v5880_v43 = vpop.eup %5879  ;;  %v3029_v17 = vadd.f32 %v3028_v4, %v3027_v1 }
 0x33e   : > { %v5882_v35 = vpop.eup %5881  ;;  %v3038_v23 = vsel %vm2490_vm8, %v5880_v43, 0.0  ;;  %5405 = vmatmul.mubr.msk.f32.gmra.mrb[108].mxu0 %vm2490_vm8, %v5878_v2  ;;  %v2681_v37 = vmax.f32 %v2637_v8, %v2665_v57  ;;  %v2653_v58 = vrot.slane %v2652_v41, 4 }
 0x33f   : > { %v5884_v34 = vpop.eup %5883  ;;  %v8095_v48 = vadd.f32 %v3030_v38, %v3029_v17  ;;  %v3039_v40 = vsel %vm2490_vm8, %v5882_v35, 0.0  ;;  %5407 = vmatprep.mubr.msk.f32.mxu0 %vm2490_vm8, %v5880_v43 }
 0x340   : > { %v5886_v15 = vpop.eup %5885  ;;  %v3040_v19 = vadd.f32 %v3039_v40, %v3038_v23  ;;  %v3041_v62 = vsel %vm2490_vm8, %v5884_v34, 0.0  ;;  %v2710_v20 = vrot.slane %v2681_v37, %v7419_v54  ;;  %v2925_v27 = vrot.slane %v2681_v37, 2 }
 0x341   : > { %v5888_v39 = vpop.eup %5887  ;;  %v3043_v42 = vsel %vm2490_vm8, %v5886_v15, 0.0  ;;  %v2654_v28 = vmax.f32 %v2652_v41, %v2653_v58  ;;  %v2948_v37 = vrot.slane %v7808_v9, 4 }
 0x342   : > { %v5890_v31 = vpop.eup %5889  ;;  %v3042_v13 = vadd.f32 %v3041_v62, %v3040_v19  ;;  %5408 = vmatmul.mubr.msk.f32.gmra.mrb[110].mxu0 %vm2490_vm8, %v5882_v35  ;;  %v3045_v2 = vsel %vm2490_vm8, %v5888_v39, 0.0  ;;  %v2763_v33 = vsub.f32 %v7937_v0, %v2710_v20  ;;  %v2764_v21 = vsub.f32 %v7931_v10, %v2710_v20 }
 0x343   : > { %5410 = vmatprep.mubr.msk.f32.mxu0 %vm2490_vm8, %v5884_v34  ;;  %v3047_v29 = vsel %vm2490_vm8, %v5890_v31, 0.0  ;;  %v2765_v52 = vsub.f32 %v7960_v3, %v2710_v20  ;;  %v2766_v1 = vsub.f32 %v7956_v12, %v2710_v20  ;;  %v5892_v4 = vpop.eup %5891  ;;  %v2767_v43 = vsub.f32 %v7971_v53, %v2710_v20 }
 0x344   : > { %v3044_v46 = vadd.f32 %v3043_v42, %v3042_v13  ;;  %v2768_v17 = vsub.f32 %v7967_v36, %v2710_v20  ;;  %v2769_v57 = vsub.f32 %v7982_v11, %v2710_v20  ;;  %v2770_v0 = vsub.f32 %v7980_v55, %v2710_v20 }
 0x345   : > { %v2875_v10 = vmul.f32 1.442695, %v2763_v33  ;;  %v2877_v61 = vmul.f32 1.442695, %v2764_v21  ;;  %v5894_v3 = vpop.eup %5893  ;;  %v2879_v35 = vmul.f32 1.442695, %v2765_v52  ;;  %v8119_v11 = vsel %vm830_vm6, %v2925_v27, %v8077_v56 }
 0x346   : > { %v3046_v16 = vadd.f32 %v3045_v2, %v3044_v46  ;;  %5411 = vmatmul.mubr.msk.f32.gmra.mrb[112].mxu0 %vm2490_vm8, %v5886_v15  ;;  %v2881_v38 = vmul.f32 1.442695, %v2766_v1  ;;  %v3049_v23 = vsel %vm2490_vm8, %v5892_v4, 0.0  ;;  %v2883_v36 = vmul.f32 1.442695, %v2767_v43 }
 0x347   : > { %5413 = vmatprep.mubr.msk.f32.mxu0 %vm2490_vm8, %v5888_v39  ;;  %5895 = vpow2.f32 %v2875_v10  ;;  %v3051_v55 = vsel %vm2490_vm8, %v5894_v3, 0.0  ;;  %v2655_v8 = vrot.slane %v2654_v28, 2  ;;  %v2885_v40 = vmul.f32 1.442695, %v2768_v17 }
 0x348   : > { %v3048_v12 = vadd.f32 %v3047_v29, %v3046_v16  ;;  %5897 = vpow2.f32 %v2877_v61  ;;  %v2887_v15 = vmul.f32 1.442695, %v2769_v57  ;;  %v2889_v56 = vmul.f32 1.442695, %v2770_v0 }
 0x349   : > { %5899 = vpow2.f32 %v2879_v35  ;;  %v2656_v41 = vmax.f32 %v2654_v28, %v2655_v8  ;;  %v2969_v39 = vrot.slane %v7885_v7, 4  ;;  %v2990_v13 = vrot.slane %v7969_v51, 4 }
 0x34a   : > { %v3050_v53 = vadd.f32 %v3049_v23, %v3048_v12  ;;  %5414 = vmatmul.mubr.msk.f32.gmra.mrb[114].mxu0 %vm2490_vm8, %v5890_v31  ;;  %5901 = vpow2.f32 %v2881_v38  ;;  %v2666_v31 = vrot.slane %v7642_v22, 7  ;;  %v3011_v20 = vrot.slane %v8052_v30, 4 }
 0x34b   : > { %5416 = vmatprep.mubr.msk.f32.mxu0 %vm2490_vm8, %v5892_v4  ;;  %5903 = vpow2.f32 %v2883_v36  ;;  %v2657_v19 = vrot.slane %v2656_v41, 1  ;;  %v8135_v21 = vadd.f32 %v2948_v37, %v7808_v9  ;;  %v8138_v29 = vadd.f32 %v2969_v39, %v7885_v7 }
 0x34c   : > { %v8124_v34 = vadd.f32 %v3051_v55, %v3050_v53  ;;  %5905 = vpow2.f32 %v2885_v40  ;;  %v8146_v4 = vadd.f32 %v2990_v13, %v7969_v51  ;;  %v8149_v16 = vadd.f32 %v3011_v20, %v8052_v30 }
 0x34d   : > { %v2658_v62 = vmax.f32 %v2656_v41, %v2657_v19  ;;  %5907 = vpow2.f32 %v2887_v15  ;;  %v3032_v0 = vrot.slane %v8095_v48, 4  ;;  %v2950_v19 = vrot.slane %v8135_v21, 2 }
 0x34e   : > { %5417 = vmatmul.mubr.msk.f32.gmra.mrb[116].mxu0 %vm2490_vm8, %v5894_v3  ;;  %5909 = vpow2.f32 %v2889_v56  ;;  %v3053_v12 = vrot.slane %v8124_v34, 4  ;;  %v3013_v13 = vrot.slane %v8149_v16, 2 }
 0x34f   : > { %v2682_v58 = vmax.f32 %v2658_v62, %v2666_v31  ;;  %v2992_v62 = vrot.slane %v8146_v4, 2 }
 0x350   : > { %v3054_v56 = vadd.f32 %v3053_v12, %v8124_v34 }
 0x351   : > { %v5896_v42 = vpop.eup %5895  ;;  %v8142_v1 = vrot.slane %v2682_v58, %v7419_v54  ;;  %v2927_v9 = vrot.slane %v2682_v58, 1 }
 0x352   : > { %v5898_v46 = vpop.eup %5897  ;;  %v3059_v2 = vsel %vm2490_vm8, %v5896_v42, 0.0  ;;  %5419 = vmatprep.mubr.msk.f32.mxu0 %vm2490_vm8, %v5896_v42  ;;  %v3055_v42 = vrot.slane %v3054_v56, 2 }
 0x353   : > { %v5900_v33 = vpop.eup %5899  ;;  %v3060_v52 = vsel %vm2490_vm8, %v5898_v46, 0.0  ;;  %5420 = vmatmul.mubr.msk.f32.gmra.mrb[118].mxu0 %vm2490_vm8, %v5898_v46  ;;  %v2771_v17 = vsub.f32 %v7995_v50, %v8142_v1  ;;  %v2772_v54 = vsub.f32 %v7991_v60, %v8142_v1  ;;  %v2773_v57 = vsub.f32 %v8020_v18, %v8142_v1 }
 0x354   : > { %v5902_v27 = vpop.eup %5901  ;;  %v3061_v43 = vadd.f32 %v3060_v52, %v3059_v2  ;;  %5422 = vmatprep.mubr.msk.f32.mxu0 %vm2490_vm8, %v5900_v33  ;;  %v3062_v7 = vsel %vm2490_vm8, %v5900_v33, 0.0  ;;  %v2774_v10 = vsub.f32 %v8012_v32, %v8142_v1  ;;  %v2775_v61 = vsub.f32 %v8037_v24, %v8142_v1 }
 0x355   : > { %v5904_v51 = vpop.eup %5903  ;;  %v3064_v28 = vsel %vm2490_vm8, %v5902_v27, 0.0  ;;  %v2776_v50 = vsub.f32 %v8033_v63, %v8142_v1  ;;  %v2777_v60 = vsub.f32 %v8050_v59, %v8142_v1  ;;  %v2778_v18 = vsub.f32 %v8044_v14, %v8142_v1 }
 0x356   : > { %v3063_v30 = vadd.f32 %v3062_v7, %v3061_v43  ;;  %v5906_v3 = vpop.eup %5905  ;;  %v2891_v35 = vmul.f32 1.442695, %v2771_v17  ;;  %v2893_v38 = vmul.f32 1.442695, %v2772_v54  ;;  %v3066_v24 = vsel %vm2490_vm8, %v5904_v51, 0.0 }
 0x357   : > { %5423 = vmatmul.mubr.msk.f32.gmra.mrb[120].mxu0 %vm2490_vm8, %v5902_v27  ;;  %v2895_v23 = vmul.f32 1.442695, %v2773_v57  ;;  %v2897_v63 = vmul.f32 1.442695, %v2774_v10  ;;  %v2928_v59 = vsel %vm833_vm7, %v2927_v9, %v8119_v11  ;;  %v5908_v53 = vpop.eup %5907  ;;  %v3033_v14 = vadd.f32 %v3032_v0, %v8095_v48 }
 0x358   : > { %v3065_v32 = vadd.f32 %v3064_v28, %v3063_v30  ;;  %5425 = vmatprep.mubr.msk.f32.mxu0 %vm2490_vm8, %v5904_v51  ;;  %5911 = vpow2.f32 %v2891_v35  ;;  %v2899_v55 = vmul.f32 1.442695, %v2775_v61  ;;  %v3068_v8 = vsel %vm2490_vm8, %v5906_v3, 0.0  ;;  %v5910_v15 = vpop.eup %5909 }
 0x359   : > { %5913 = vpow2.f32 %v2893_v38  ;;  %v2901_v40 = vmul.f32 1.442695, %v2776_v50  ;;  %v2930_v41 = vsub.f32 %v7642_v22, %v2928_v59  ;;  %v2971_v48 = vrot.slane %v8138_v29, 2  ;;  %v5945_v50 = vld [vmem:[%s8706_s21] sm:$0xff] }
 0x35a   : > { %v3067_v36 = vadd.f32 %v3066_v24, %v3065_v32  ;;  %5915 = vpow2.f32 %v2895_v23  ;;  %v3070_v37 = vsel %vm2490_vm8, %v5908_v53, 0.0  ;;  %v2903_v39 = vmul.f32 1.442695, %v2777_v60 }
 0x35b   : > { %5426 = vmatmul.mubr.msk.f32.gmra.mrb[122].mxu0 %vm2490_vm8, %v5906_v3  ;;  %5917 = vpow2.f32 %v2897_v63  ;;  %v2931_v31 = vmul.f32 1.442695, %v2930_v41  ;;  %v3034_v20 = vrot.slane %v3033_v14, 2  ;;  %v3072_v34 = vsel %vm2490_vm8, %v5910_v15, 0.0 }
 0x35c   : > { %v3069_v11 = vadd.f32 %v3068_v8, %v3067_v36  ;;  %5428 = vmatprep.mubr.msk.f32.mxu0 %vm2490_vm8, %v5908_v53  ;;  %5919 = vpow2.f32 %v2899_v55  ;;  %v2905_v46 = vmul.f32 1.442695, %v2778_v18  ;;  %v2951_v2 = vadd.f32 %v2950_v19, %v8135_v21 }
 0x35d   : > { %5921 = vpow2.f32 %v2901_v40  ;;  %v2972_v33 = vadd.f32 %v2971_v48, %v8138_v29  ;;  %v2993_v1 = vadd.f32 %v2992_v62, %v8146_v4  ;;  %v3014_v27 = vadd.f32 %v3013_v13, %v8149_v16 }
 0x35e   : > { %v3071_v22 = vadd.f32 %v3070_v37, %v3069_v11  ;;  %5923 = vpow2.f32 %v2903_v39  ;;  %v3035_v43 = vadd.f32 %v3034_v20, %v3033_v14  ;;  %v3056_v7 = vadd.f32 %v3055_v42, %v3054_v56 }
 0x35f   : > { %5429 = vmatmul.mubr.msk.f32.gmra.mrb[124].mxu0 %vm2490_vm8, %v5910_v15  ;;  %5925 = vpow2.f32 %v2931_v31  ;;  %v2952_v21 = vrot.slane %v2951_v2, 1  ;;  %v2973_v0 = vrot.slane %v2972_v33, 1  ;;  %v2994_v16 = vrot.slane %v2993_v1, 1 }
 0x360   : > { %v3073_v58 = vadd.f32 %v3072_v34, %v3071_v22  ;;  %5485 = vmatprep.mubr.msk.f32.mxu0 %vm6172_vm0, %v8647_v5  ;;  %5927 = vpow2.f32 %v2905_v46  ;;  %v3015_v10 = vrot.slane %v3014_v27, 1  ;;  %v3036_v61 = vrot.slane %v3035_v43, 1 }
 0x361   : > { %v3057_v3 = vrot.slane %v3056_v7, 1  ;;  %v2953_v38 = vadd.f32 %v2952_v21, %v2951_v2  ;;  %v2974_v24 = vadd.f32 %v2973_v0, %v2972_v33  ;;  %v2995_v53 = vadd.f32 %v2994_v16, %v2993_v1 }
 0x362   : > { %v3074_v52 = vrot.slane %v3073_v58, 4  ;;  %v5912_v9 = vpop.eup %5911  ;;  %v3016_v14 = vadd.f32 %v3015_v10, %v3014_v27  ;;  %v3037_v55 = vadd.f32 %v3036_v61, %v3035_v43 }
 0x363   : > { %v5914_v54 = vpop.eup %5913  ;;  %v3080_v57 = vsel %vm2490_vm8, %v5912_v9, 0.0  ;;  %5431 = vmatprep.mubr.msk.f32.mxu1 %vm2490_vm8, %v5912_v9  ;;  %v3058_v15 = vadd.f32 %v3057_v3, %v3056_v7 }
 0x364   : > { %v3075_v17 = vadd.f32 %v3074_v52, %v3073_v58  ;;  %v5916_v51 = vpop.eup %5915  ;;  %v3081_v30 = vsel %vm2490_vm8, %v5914_v54, 0.0  ;;  %5432 = vmatmul.mubr.msk.f32.vlgmr.msra.gmra.mrb[130].mxu1 %vm2490_vm8, %v5914_v54  ;;  %v4093_v54 = vld [vmem:[#allocation10] sm:$0xff] }
 0x365   : > { %v5918_v4 = vpop.eup %5917  ;;  %v3082_v28 = vadd.f32 %v3081_v30, %v3080_v57  ;;  %5434 = vmatprep.mubr.msk.f32.mxu1 %vm2490_vm8, %v5916_v51  ;;  %5444 = vmatpush3.msra.mxu1 %v5945_v50  ;;  %v3083_v18 = vsel %vm2490_vm8, %v5916_v51, 0.0  ;;  %v4094_v57 = vld [vmem:[#allocation10 + $0x8] sm:$0xff] }
 0x366   : > { %v3076_v29 = vrot.slane %v3075_v17, 2  ;;  %v5920_v60 = vpop.eup %5919  ;;  %5448 = vmatprep.subr.mxu1 %v8647_v5  ;;  %v3085_v23 = vsel %vm2490_vm8, %v5918_v4, 0.0  ;;  %v5681_v51 = vpack.c.bf16 %v4094_v57, %v4093_v54  ;;  %v8710_v57 = vld [vmem:[#allocation48_spill] sm:$0xff] }
 0x367   : > { %v5922_v32 = vpop.eup %5921  ;;  %v3084_v35 = vadd.f32 %v3083_v18, %v3082_v28  ;;  %v3087_v40 = vsel %vm2490_vm8, %v5920_v60, 0.0 }
 0x368   : > { %v3077_v12 = vadd.f32 %v3076_v29, %v3075_v17  ;;  %5435 = vmatmul.mubr.msk.f32.gmra.mrb[132].mxu1 %vm2490_vm8, %v5918_v4  ;;  %v5924_v59 = vpop.eup %5923  ;;  %v3089_v41 = vsel %vm2490_vm8, %v5922_v32, 0.0  ;;  %5682 = vmatpush3.bf16.msra.mxu0 %v5681_v51  ;;  %v8711_v51 = vld [vmem:[#allocation18_spill] sm:$0xff] }
 0x369   : > { %v3086_v36 = vadd.f32 %v3085_v23, %v3084_v35  ;;  %5437 = vmatprep.mubr.msk.f32.mxu1 %vm2490_vm8, %v5920_v60  ;;  %v8209_v8 = vpop.eup %5925  ;;  %v3091_v39 = vsel %vm2490_vm8, %v5924_v59, 0.0  ;;  %5683 = vmatprep.subr.bf16.mxu0 %v8587_v47 }
 0x36a   : > { %v3078_v63 = vrot.slane %v3077_v12, 1  ;;  %v3102_v11 = vrot.slane %v8209_v8, 1  ;;  %v3103_v48 = vrot.slane %v8209_v8, 2  ;;  %v3104_v37 = vrot.slane %v8209_v8, 3  ;;  %v5928_v13 = vpop.eup %5927 }
 0x36b   : > { %v3088_v56 = vadd.f32 %v3087_v40, %v3086_v36  ;;  %v3105_v62 = vrot.slane %v8209_v8, 4  ;;  %v3106_v22 = vrot.slane %v8209_v8, 5  ;;  %v3107_v31 = vrot.slane %v8209_v8, 6  ;;  %v4096_v40 = vld [vmem:[#allocation10 + $0x18] sm:$0xff] }
 0x36c   : > { %v3079_v19 = vadd.f32 %v3078_v63, %v3077_v12  ;;  %5438 = vmatmul.mubr.msk.f32.gmra.mrb[134].mxu1 %vm2490_vm8, %v5922_v32  ;;  %v3117_v34 = vadd.f32 %v8209_v8, %v2953_v38  ;;  %v3118_v42 = vadd.f32 %v3102_v11, %v2974_v24  ;;  %v3119_v58 = vadd.f32 %v3103_v48, %v2995_v53  ;;  %v8246_v48 = vld [vmem:[%s8709_s10] ss:$0 sm:$0xff]  ;;  %s6088_s10 = scalar_lea.vmem %s8419_s24, 128 }
 0x36d   : > { %v3090_v20 = vadd.f32 %v3089_v41, %v3088_v56  ;;  %5440 = vmatprep.mubr.msk.f32.mxu1 %vm2490_vm8, %v5924_v59  ;;  %v3120_v46 = vadd.f32 %v3104_v37, %v3016_v14  ;;  %v3121_v2 = vadd.f32 %v3105_v62, %v3037_v55  ;;  %v3122_v33 = vadd.f32 %v3106_v22, %v3058_v15  ;;  %v4098_v56 = vld [vmem:[#allocation10 + $0x28] sm:$0xff]  ;;  %v4100_v62 = vld [vmem:[#allocation10 + $0x38] sm:$0xff]  ;;  %p6089_p3 = scmp.ne.s32.totalorder %s8419_s24, %s6088_s10  ;;  %p6096_p1 = scmp.lt.s32.totalorder %s6094_s22, %s6088_s10 }
 0x36e   : > { %v3123_v52 = vadd.f32 %v3107_v31, %v3079_v19  ;;  %5929 = vrcp.f32 %v3117_v34  ;;  %v3093_v27 = vsel %vm2490_vm8, %v5928_v13, 0.0  ;;  %v4097_v19 = vld [vmem:[#allocation10 + $0x20] sm:$0xff]  ;;  %v1550_v37 = vadd.f32 %v7447_v44, %v8246_v48 }
 0x36f   : > { %v3092_v1 = vadd.f32 %v3091_v39, %v3090_v20  ;;  %5931 = vrcp.f32 %v3118_v42  ;;  %v5687_v11 = vpack.c.bf16 %v4098_v56, %v4097_v19  ;;  %v4099_v39 = vld [vmem:[#allocation10 + $0x30] sm:$0xff]  ;;  %v1545_v22 = vadd.f32 %v8246_v48, %v7451_v25  ;;  %p6090_p5 = pnand %p6089_p3, %p6417_p10  ;;  %p6097_p2 = por %p6096_p1, %p6095_p12 }
 0x370   : > { %5441 = vmatmul.mubr.msk.f32.gmra.mrb[136].mxu1 %vm2490_vm8, %v5928_v13  ;;  %5933 = vrcp.f32 %v3119_v58  ;;  %v5690_v13 = vpack.c.bf16 %v4100_v62, %v4099_v39  ;;  %v1560_v58 = vadd.f32 %v7454_v49, %v8246_v48  ;;  %v1570_v25 = vadd.f32 %v7460_v6, %v8246_v48 }
 0x371   : > { %v3094_v43 = vadd.f32 %v3093_v27, %v3092_v1  ;;  %5445 = vmatprep.mubr.msk.f32.mxu1 %vm6172_vm0, %v8647_v5  ;;  %5935 = vrcp.f32 %v3120_v46  ;;  %v1555_v46 = vadd.f32 %v8246_v48, %v7457_v26  ;;  %v1565_v27 = vadd.f32 %v8246_v48, %v7463_v45  ;;  %p6091_p7 = pneg %p6090_p5 }
 0x372   : > { %5937 = vrcp.f32 %v3121_v2  ;;  %v1580_v26 = vadd.f32 %v8710_v57, %v8246_v48  ;;  %v8721_v57 = vld [vmem:[#allocation25_spill] sm:$0xff] }
 0x373   : > { %v3095_v9 = vrot.slane %v3094_v43, 4  ;;  %5939 = vrcp.f32 %v3122_v33  ;;  %p6098_p13 = pnand %p6097_p2, %p6091_p7 }
 0x374   : > { %5446 = vmatmul.mubr.msk.f32.vlgmr.msra.gmra.mrb[138].mxu1 %vm2490_vm8, %v8209_v8  ;;  %5941 = vrcp.f32 %v3123_v52 }
 0x375   : > { %v3096_v7 = vadd.f32 %v3095_v9, %v3094_v43  ;;  %5449 = vmatpush3.msra.mxu1 %v5945_v50  ;;  %5450 = vmatprep.mubr.msk.f32.mxu1 %vm6172_vm0, %v8647_v5  ;;  %v3108_v5 = vrot.slane %v8209_v8, 7  ;;  %v4095_v8 = vld [vmem:[#allocation10 + $0x10] sm:$0xff] }
 0x376   : > { %v5684_v41 = vpack.c.bf16 %v4096_v40, %v4095_v8  ;;  %v8716_v40 = vld [vmem:[#allocation31_spill] sm:$0xff] }
 0x377   : > { %v3097_v17 = vrot.slane %v3096_v7, 2 }
 0x378   : > { %v5930_v21 = vpop.eup %5929  ;;  %5685 = vmatpush3.bf16.msra.mxu0 %v5684_v41  ;;  %v1610_v41 = vadd.f32 %v8716_v40, %v8246_v48 }
 0x379   : > { %v3098_v0 = vadd.f32 %v3097_v17, %v3096_v7  ;;  %v5932_v29 = vpop.eup %5931  ;;  %5686 = vmatprep.subr.bf16.mxu0 %v8587_v47 }
 0x37a   : > { %v5934_v30 = vpop.eup %5933  ;;  %v3790_v16 = vrot.slane %v5932_v29, 7 }
 0x37b   : > { %v3099_v4 = vrot.slane %v3098_v0, 1  ;;  %v5936_v10 = vpop.eup %5935  ;;  %v3792_v61 = vrot.slane %v5934_v30, 6 }
 0x37c   : > { %v5938_v28 = vpop.eup %5937  ;;  %v3791_v60 = vsel %vm815_vm1, %v3790_v16, %v5930_v21  ;;  %v3794_v18 = vrot.slane %v5936_v10, 5  ;;  %5688 = vmatpush3.bf16.msra.mxu0 %v5687_v11  ;;  %v1575_v21 = vadd.f32 %v8246_v48, %v8711_v51 }
 0x37d   : > { %v3100_v50 = vadd.f32 %v3099_v4, %v3098_v0  ;;  %v5940_v3 = vpop.eup %5939  ;;  %v3793_v12 = vsel %vm818_vm2, %v3792_v61, %v3791_v60  ;;  %v3796_v32 = vrot.slane %v5938_v28, 4  ;;  %5689 = vmatprep.subr.bf16.mxu0 %v8587_v47  ;;  %v4101_v61 = vld [vmem:[#allocation10 + $0x40] sm:$0xff]  ;;  %v4102_v28 = vld [vmem:[#allocation10 + $0x48] sm:$0xff] }
 0x37e   : > { %v5942_v35 = vpop.eup %5941  ;;  %v3795_v24 = vsel %vm821_vm3, %v3794_v18, %v3793_v12  ;;  %v3798_v23 = vrot.slane %v5940_v3, 3  ;;  %v8713_v18 = vld [vmem:[#allocation20_spill] sm:$0xff] }
 0x37f   : > { %v3124_v38 = vadd.f32 %v3108_v5, %v3100_v50  ;;  %v3797_v63 = vsel %vm824_vm4, %v3796_v32, %v3795_v24  ;;  %v3800_v59 = vrot.slane %v5942_v35, 2  ;;  %v5693_v50 = vpack.c.bf16 %v4102_v28, %v4101_v61  ;;  %v8712_v5 = vld [vmem:[#allocation19_spill] sm:$0xff]  ;;  %v8714_v24 = vld [vmem:[#allocation24_spill] sm:$0xff] }
 0x380   : > { %v3799_v53 = vsel %vm827_vm5, %v3798_v23, %v3797_v63  ;;  %5691 = vmatpush3.bf16.msra.mxu0 %v5690_v13  ;;  %v1590_v60 = vadd.f32 %v8712_v5, %v8246_v48  ;;  %v1585_v3 = vadd.f32 %v8246_v48, %v8713_v18  ;;  %v1600_v23 = vadd.f32 %v8714_v24, %v8246_v48  ;;  %v8715_v63 = vld [vmem:[#allocation29_spill] sm:$0xff] }
 0x381   : > { %5943 = vrcp.f32 %v3124_v38  ;;  %v3801_v14 = vsel %vm830_vm6, %v3800_v59, %v3799_v53  ;;  %5692 = vmatprep.subr.bf16.mxu0 %v8587_v47  ;;  %v1595_v59 = vadd.f32 %v8246_v48, %v8715_v63 }
 0x384   : > { %5694 = vmatpush3.bf16.msra.mxu0 %v5693_v50 }
 0x385   : > { %5695 = vmatprep.subr.bf16.mxu0 %v8587_v47 }
 0x38b   : > { %v5944_v36 = vpop.eup %5943 }
 0x38c   : > { %v3802_v55 = vrot.slane %v5944_v36, 1 }
 0x38e   : > { %v3803_v15 = vsel %vm833_vm7, %v3802_v55, %v3801_v14 }
 0x38f   : > { %5451 = vmatmul.mubr.msk.f32.vlgmr.msra.gmra.mrb[140].mxu1 %vm2490_vm8, %v3803_v15  ;;  %v8717_v15 = vld [vmem:[#allocation37_spill] sm:$0xff] }
 0x390   : > { %v1605_v19 = vadd.f32 %v8246_v48, %v8717_v15 }
 0x3b7   : > { %v5349_v31 = vpop.f32.mrb[70].mxu0 }
 0x3b8   : > { %v3877_v20 = vmul.f32 %v5349_v31, %v1550_v37  ;;  %v3391_v34 = vpop.f32.mrb[71].mxu0  ;;  %v8718_v31 = vld [vmem:[#allocation21_spill] sm:$0xff] }
 0x3b9   : > { %v3876_v42 = vmul.f32 %v3391_v34, %v1545_v22  ;;  %v1620_v13 = vadd.f32 %v8718_v31, %v8246_v48  ;;  %v8729_v31 = vld [vmem:[#allocation32_spill] sm:$0xff] }
 0x3bb   : > { %v3940_v44 = vadd.f32 %v3877_v20, %v3876_v42  ;;  %v5352_v2 = vpop.f32.mrb[72].mxu0  ;;  %v8719_v20 = vld [vmem:[#allocation22_spill] sm:$0xff] }
 0x3bc   : > { %v3879_v33 = vmul.f32 %v5352_v2, %v1560_v58  ;;  %v3401_v52 = vpop.f32.mrb[73].mxu0  ;;  %v1615_v34 = vadd.f32 %v8246_v48, %v8719_v20 }
 0x3bd   : > { %v3878_v1 = vmul.f32 %v3401_v52, %v1555_v46 }
 0x3bf   : > { %v3941_v43 = vadd.f32 %v3940_v44, %v3878_v1  ;;  %v5355_v9 = vpop.f32.mrb[74].mxu0  ;;  %v4103_v1 = vld [vmem:[#allocation10 + $0x50] sm:$0xff] }
 0x3c0   : > { %v3881_v7 = vmul.f32 %v5355_v9, %v1570_v25  ;;  %v3411_v49 = vpop.f32.mrb[75].mxu0  ;;  %v4104_v25 = vld [vmem:[#allocation10 + $0x58] sm:$0xff]  ;;  %v4106_v9 = vld [vmem:[#allocation10 + $0x68] sm:$0xff] }
 0x3c1   : > { %v3880_v17 = vmul.f32 %v3411_v49, %v1565_v27  ;;  %v3942_v54 = vadd.f32 %v3941_v43, %v3879_v33  ;;  %v4105_v27 = vld [vmem:[#allocation10 + $0x60] sm:$0xff]  ;;  %v5696_v43 = vpack.c.bf16 %v4104_v25, %v4103_v1  ;;  %v8720_v49 = vld [vmem:[#allocation23_spill] sm:$0xff] }
 0x3c3   : > { %v3943_v0 = vadd.f32 %v3942_v54, %v3880_v17  ;;  %v5358_v29 = vpop.f32.mrb[76].mxu0  ;;  %v1630_v17 = vadd.f32 %v8720_v49, %v8246_v48  ;;  %5697 = vmatpush3.bf16.msra.mxu0 %v5696_v43  ;;  %v5699_v54 = vpack.c.bf16 %v4106_v9, %v4105_v27  ;;  %v8732_v9 = vld [vmem:[#allocation44_spill] sm:$0xff] }
 0x3c4   : > { %v3883_v30 = vmul.f32 %v5358_v29, %v1580_v26  ;;  %v3421_v4 = vpop.f32.mrb[77].mxu0  ;;  %v1625_v26 = vadd.f32 %v8246_v48, %v8721_v57  ;;  %5698 = vmatprep.subr.bf16.mxu0 %v8587_v47  ;;  %v1690_v49 = vadd.f32 %v8732_v9, %v8246_v48 }
 0x3c5   : > { %v3882_v6 = vmul.f32 %v3421_v4, %v1575_v21  ;;  %v3944_v16 = vadd.f32 %v3943_v0, %v3881_v7 }
 0x3c7   : > { %v3945_v10 = vadd.f32 %v3944_v16, %v3882_v6  ;;  %5700 = vmatpush3.bf16.msra.mxu0 %v5699_v54  ;;  %v8723_v6 = vld [vmem:[#allocation34_spill] sm:$0xff] }
 0x3c8   : > { %v1635_v16 = vadd.f32 %v8246_v48, %v8723_v6  ;;  %5701 = vmatprep.subr.bf16.mxu0 %v8587_v47  ;;  %v8735_v6 = vld [vmem:[#allocation36_spill] sm:$0xff] }
 0x3c9   : > { %v8265_v45 = vadd.f32 %v3945_v10, %v3883_v30  ;;  %v8722_v30 = vld [vmem:[#allocation30_spill] sm:$0xff] }
 0x3ca   : > { %v1640_v4 = vadd.f32 %v8722_v30, %v8246_v48  ;;  %v8734_v30 = vld [vmem:[#allocation35_spill] sm:$0xff] }
 0x3cb   : > { %v5361_v12 = vpop.f32.mrb[78].mxu0 }
 0x3cc   : > { %v3885_v32 = vmul.f32 %v5361_v12, %v1590_v60  ;;  %v3431_v35 = vpop.f32.mrb[79].mxu0  ;;  %v8724_v60 = vld [vmem:[#allocation38_spill] sm:$0xff] }
 0x3cd   : > { %v3884_v38 = vmul.f32 %v3431_v35, %v1585_v3  ;;  %v1650_v18 = vadd.f32 %v8724_v60, %v8246_v48  ;;  %v8725_v3 = vld [vmem:[#allocation41_spill] sm:$0xff] }
 0x3ce   : > { %v1645_v12 = vadd.f32 %v8246_v48, %v8725_v3  ;;  %v8736_v3 = vld [vmem:[#allocation40_spill] sm:$0xff] }
 0x3cf   : > { %v3953_v53 = vadd.f32 %v3885_v32, %v3884_v38  ;;  %v5364_v14 = vpop.f32.mrb[80].mxu0 }
 0x3d0   : > { %v3887_v36 = vmul.f32 %v5364_v14, %v1600_v23  ;;  %v3441_v55 = vpop.f32.mrb[81].mxu0  ;;  %v8727_v14 = vld [vmem:[#allocation27_spill] sm:$0xff] }
 0x3d1   : > { %v3886_v8 = vmul.f32 %v3441_v55, %v1595_v59  ;;  %v8726_v59 = vld [vmem:[#allocation26_spill] sm:$0xff]  ;;  %v1655_v47 = vadd.f32 %v8246_v48, %v8727_v14 }
 0x3d3   : > { %v3954_v56 = vadd.f32 %v3953_v53, %v3886_v8  ;;  %v5367_v11 = vpop.f32.mrb[82].mxu0  ;;  %v1660_v53 = vadd.f32 %v8726_v59, %v8246_v48 }
 0x3d4   : > { %v3889_v37 = vmul.f32 %v5367_v11, %v1610_v41  ;;  %v3451_v39 = vpop.f32.mrb[83].mxu0 }
 0x3d5   : > { %v3888_v62 = vmul.f32 %v3451_v39, %v1605_v19  ;;  %v3955_v22 = vadd.f32 %v3954_v56, %v3887_v36  ;;  %v4107_v19 = vld [vmem:[#allocation10 + $0x70] sm:$0xff]  ;;  %v4108_v56 = vld [vmem:[#allocation10 + $0x78] sm:$0xff] }
 0x3d6   : > { %v5702_v11 = vpack.c.bf16 %v4108_v56, %v4107_v19  ;;  %v8740_v19 = vld [vmem:[#allocation50_spill] sm:$0xff] }
 0x3d7   : > { %v3956_v42 = vadd.f32 %v3955_v22, %v3888_v62  ;;  %v5370_v58 = vpop.f32.mrb[84].mxu0  ;;  %v8728_v62 = vld [vmem:[#allocation28_spill] sm:$0xff]  ;;  %v1730_v56 = vadd.f32 %v8740_v19, %v8246_v48 }
 0x3d8   : > { %v3891_v46 = vmul.f32 %v5370_v58, %v1620_v13  ;;  %v3461_v44 = vpop.f32.mrb[85].mxu0  ;;  %5703 = vmatpush3.bf16.msra.mxu0 %v5702_v11  ;;  %v1670_v22 = vadd.f32 %v8728_v62, %v8246_v48  ;;  %v1665_v13 = vadd.f32 %v8246_v48, %v8729_v31  ;;  %v8741_v11 = vld [vmem:[#allocation56_spill] sm:$0xff] }
 0x3d9   : > { %v3890_v2 = vmul.f32 %v3461_v44, %v1615_v34  ;;  %v3957_v33 = vadd.f32 %v3956_v42, %v3889_v37 }
 0x3db   : > { %v3958_v52 = vadd.f32 %v3957_v33, %v3890_v2  ;;  %v8731_v2 = vld [vmem:[#allocation42_spill] sm:$0xff] }
 0x3dc   : > { %v1675_v33 = vadd.f32 %v8246_v48, %v8731_v2 }
 0x3dd   : > { %v8284_v7 = vadd.f32 %v3958_v52, %v3891_v46  ;;  %v8730_v46 = vld [vmem:[#allocation39_spill] sm:$0xff] }
 0x3de   : > { %v1680_v44 = vadd.f32 %v8730_v46, %v8246_v48  ;;  %v8743_v46 = vld [vmem:[#allocation52_spill] sm:$0xff] }
 0x3df   : > { %v5373_v51 = vpop.f32.mrb[86].mxu0 }
 0x3e0   : > { %v3893_v21 = vmul.f32 %v5373_v51, %v1630_v17  ;;  %v3471_v0 = vpop.f32.mrb[87].mxu0  ;;  %v8733_v17 = vld [vmem:[#allocation46_spill] sm:$0xff] }
 0x3e1   : > { %v3892_v29 = vmul.f32 %v3471_v0, %v1625_v26  ;;  %v1685_v54 = vadd.f32 %v8246_v48, %v8733_v17 }
 0x3e3   : > { %v3966_v10 = vadd.f32 %v3893_v21, %v3892_v29  ;;  %v5376_v61 = vpop.f32.mrb[88].mxu0 }
 0x3e4   : > { %v3895_v28 = vmul.f32 %v5376_v61, %v1640_v4  ;;  %v3481_v50 = vpop.f32.mrb[89].mxu0  ;;  %v1700_v4 = vadd.f32 %v8734_v30, %v8246_v48 }
 0x3e5   : > { %v3894_v5 = vmul.f32 %v3481_v50, %v1635_v16  ;;  %v1695_v16 = vadd.f32 %v8246_v48, %v8735_v6 }
 0x3e7   : > { %v3967_v32 = vadd.f32 %v3966_v10, %v3894_v5  ;;  %v5379_v35 = vpop.f32.mrb[90].mxu0 }
 0x3e8   : > { %v3897_v38 = vmul.f32 %v5379_v35, %v1650_v18  ;;  %v3491_v24 = vpop.f32.mrb[91].mxu0  ;;  %v8737_v35 = vld [vmem:[#allocation45_spill] sm:$0xff] }
 0x3e9   : > { %v3896_v23 = vmul.f32 %v3491_v24, %v1645_v12  ;;  %v3968_v63 = vadd.f32 %v3967_v32, %v3895_v28  ;;  %v1710_v12 = vadd.f32 %v8736_v3, %v8246_v48 }
 0x3eb   : > { %v3969_v36 = vadd.f32 %v3968_v63, %v3896_v23  ;;  %v5382_v55 = vpop.f32.mrb[92].mxu0 }
 0x3ec   : > { %v3899_v8 = vmul.f32 %v5382_v55, %v1660_v53  ;;  %v3501_v40 = vpop.f32.mrb[93].mxu0  ;;  %v8738_v53 = vld [vmem:[#allocation47_spill] sm:$0xff] }
 0x3ed   : > { %v3898_v41 = vmul.f32 %v3501_v40, %v1655_v47  ;;  %v3970_v15 = vadd.f32 %v3969_v36, %v3897_v38  ;;  %v1705_v38 = vadd.f32 %v8246_v48, %v8737_v35  ;;  %v1720_v14 = vadd.f32 %v8738_v53, %v8246_v48  ;;  %v8739_v47 = vld [vmem:[#allocation49_spill] sm:$0xff] }
 0x3ee   : > { %v1715_v36 = vadd.f32 %v8246_v48, %v8739_v47 }
 0x3ef   : > { %v3971_v37 = vadd.f32 %v3970_v15, %v3898_v41 }
 0x3f1   : > { %v8304_v39 = vadd.f32 %v3971_v37, %v3899_v8  ;;  %v1725_v37 = vadd.f32 %v8246_v48, %v8741_v11 }
 0x3f3   : > { %v5385_v20 = vpop.f32.mrb[94].mxu0 }
 0x3f4   : > { %v3901_v34 = vmul.f32 %v5385_v20, %v1670_v22  ;;  %v3511_v42 = vpop.f32.mrb[95].mxu0 }
 0x3f5   : > { %v3900_v58 = vmul.f32 %v3511_v42, %v1665_v13  ;;  %v8742_v42 = vld [vmem:[#allocation51_spill] sm:$0xff] }
 0x3f7   : > { %v3979_v52 = vadd.f32 %v3901_v34, %v3900_v58  ;;  %v5388_v1 = vpop.f32.mrb[96].mxu0  ;;  %v1740_v58 = vadd.f32 %v8742_v42, %v8246_v48  ;;  %v8754_v42 = vld [vmem:[#allocation63_spill] sm:$0xff] }
 0x3f8   : > { %v3903_v25 = vmul.f32 %v5388_v1, %v1680_v44  ;;  %v3521_v27 = vpop.f32.mrb[97].mxu0  ;;  %v1735_v44 = vadd.f32 %v8246_v48, %v8743_v46  ;;  %v8755_v46 = vld [vmem:[#allocation64_spill] sm:$0xff] }
 0x3f9   : > { %v3902_v43 = vmul.f32 %v3521_v27, %v1675_v33 }
 0x3fb   : > { %v3980_v57 = vadd.f32 %v3979_v52, %v3902_v43  ;;  %v5391_v26 = vpop.f32.mrb[98].mxu0  ;;  %v8744_v43 = vld [vmem:[#allocation33_spill] sm:$0xff] }
 0x3fc   : > { %v3905_v51 = vmul.f32 %v5391_v26, %v1690_v49  ;;  %v3531_v21 = vpop.f32.mrb[99].mxu0  ;;  %v1750_v9 = vadd.f32 %v8744_v43, %v8246_v48  ;;  %v8745_v49 = vld [vmem:[#allocation53_spill] sm:$0xff] }
 0x3fd   : > { %v3904_v0 = vmul.f32 %v3531_v21, %v1685_v54  ;;  %v3981_v29 = vadd.f32 %v3980_v57, %v3903_v25  ;;  %v1745_v17 = vadd.f32 %v8246_v48, %v8745_v49 }
 0x3ff   : > { %v3982_v10 = vadd.f32 %v3981_v29, %v3904_v0  ;;  %v5394_v61 = vpop.f32.mrb[100].mxu0  ;;  %v8746_v29 = vld [vmem:[#allocation54_spill] sm:$0xff] }
 0x400   : > { %v3907_v28 = vmul.f32 %v5394_v61, %v1700_v4  ;;  %v3541_v50 = vpop.f32.mrb[101].mxu0  ;;  %v1760_v30 = vadd.f32 %v8746_v29, %v8246_v48  ;;  %v8747_v4 = vld [vmem:[#allocation43_spill] sm:$0xff] }
 0x401   : > { %v3906_v5 = vmul.f32 %v3541_v50, %v1695_v16  ;;  %v3983_v60 = vadd.f32 %v3982_v10, %v3905_v51  ;;  %v1755_v6 = vadd.f32 %v8246_v48, %v8747_v4  ;;  %v8758_v29 = vld [vmem:[#allocation67_spill] sm:$0xff]  ;;  %v8759_v4 = vld [vmem:[#allocation68_spill] sm:$0xff] }
 0x403   : > { %v3984_v18 = vadd.f32 %v3983_v60, %v3906_v5  ;;  %v8748_v5 = vld [vmem:[#allocation57_spill] sm:$0xff] }
 0x404   : > { %v1770_v60 = vadd.f32 %v8748_v5, %v8246_v48 }
 0x405   : > { %v8324_v32 = vadd.f32 %v3984_v18, %v3907_v28  ;;  %v5397_v24 = vpop.f32.mrb[102].mxu0  ;;  %v8749_v18 = vld [vmem:[#allocation58_spill] sm:$0xff] }
 0x406   : > { %v3909_v23 = vmul.f32 %v5397_v24, %v1710_v12  ;;  %v3551_v63 = vpop.f32.mrb[103].mxu0  ;;  %v1765_v3 = vadd.f32 %v8246_v48, %v8749_v18  ;;  %v3960_v18 = vrot.slane %v8284_v7, 4 }
 0x407   : > { %v3908_v59 = vmul.f32 %v3551_v63, %v1705_v38 }
 0x409   : > { %v3992_v55 = vadd.f32 %v3909_v23, %v3908_v59  ;;  %v5400_v8 = vpop.f32.mrb[104].mxu0  ;;  %v8750_v59 = vld [vmem:[#allocation59_spill] sm:$0xff] }
 0x40a   : > { %v3911_v40 = vmul.f32 %v5400_v8, %v1720_v14  ;;  %v3561_v41 = vpop.f32.mrb[105].mxu0  ;;  %v1780_v53 = vadd.f32 %v8750_v59, %v8246_v48  ;;  %v8751_v14 = vld [vmem:[#allocation60_spill] sm:$0xff] }
 0x40b   : > { %v3910_v15 = vmul.f32 %v3561_v41, %v1715_v36  ;;  %v1775_v47 = vadd.f32 %v8246_v48, %v8751_v14 }
 0x40d   : > { %v3993_v62 = vadd.f32 %v3992_v55, %v3910_v15  ;;  %v5403_v22 = vpop.f32.mrb[106].mxu0 }
 0x40e   : > { %v3913_v31 = vmul.f32 %v5403_v22, %v1730_v56  ;;  %v3571_v13 = vpop.f32.mrb[107].mxu0  ;;  %v8752_v56 = vld [vmem:[#allocation61_spill] sm:$0xff] }
 0x40f   : > { %v3912_v20 = vmul.f32 %v3571_v13, %v1725_v37  ;;  %v3994_v34 = vadd.f32 %v3993_v62, %v3911_v40  ;;  %v1790_v11 = vadd.f32 %v8752_v56, %v8246_v48  ;;  %v8753_v62 = vld [vmem:[#allocation62_spill] sm:$0xff] }
 0x410   : > { %v1785_v22 = vadd.f32 %v8246_v48, %v8753_v62 }
 0x411   : > { %v3995_v2 = vadd.f32 %v3994_v34, %v3912_v20  ;;  %v5406_v33 = vpop.f32.mrb[108].mxu0 }
 0x412   : > { %v3915_v52 = vmul.f32 %v5406_v33, %v1740_v58  ;;  %v3581_v1 = vpop.f32.mrb[109].mxu0  ;;  %v1800_v58 = vadd.f32 %v8754_v42, %v8246_v48 }
 0x413   : > { %v3914_v25 = vmul.f32 %v3581_v1, %v1735_v44  ;;  %v3996_v27 = vadd.f32 %v3995_v2, %v3913_v31  ;;  %v1795_v44 = vadd.f32 %v8246_v48, %v8755_v46 }
 0x415   : > { %v3997_v54 = vadd.f32 %v3996_v27, %v3914_v25  ;;  %v5409_v57 = vpop.f32.mrb[110].mxu0  ;;  %v8756_v27 = vld [vmem:[#allocation65_spill] sm:$0xff] }
 0x416   : > { %v3917_v26 = vmul.f32 %v5409_v57, %v1750_v9  ;;  %v3591_v51 = vpop.f32.mrb[111].mxu0  ;;  %v1810_v43 = vadd.f32 %v8756_v27, %v8246_v48  ;;  %v8757_v9 = vld [vmem:[#allocation66_spill] sm:$0xff] }
 0x417   : > { %v8344_v21 = vadd.f32 %v3997_v54, %v3915_v52  ;;  %v3916_v0 = vmul.f32 %v3591_v51, %v1745_v17  ;;  %v1805_v49 = vadd.f32 %v8246_v48, %v8757_v9 }
 0x419   : > { %v4005_v16 = vadd.f32 %v3917_v26, %v3916_v0  ;;  %v5412_v10 = vpop.f32.mrb[112].mxu0 }
 0x41a   : > { %v3919_v61 = vmul.f32 %v5412_v10, %v1760_v30  ;;  %v3601_v28 = vpop.f32.mrb[113].mxu0  ;;  %v1820_v30 = vadd.f32 %v8758_v29, %v8246_v48 }
 0x41b   : > { %v3918_v50 = vmul.f32 %v3601_v28, %v1755_v6  ;;  %v1815_v6 = vadd.f32 %v8246_v48, %v8759_v4 }
 0x41d   : > { %v4006_v12 = vadd.f32 %v4005_v16, %v3918_v50  ;;  %v5415_v35 = vpop.f32.mrb[114].mxu0 }
 0x41e   : > { %v3921_v38 = vmul.f32 %v5415_v35, %v1770_v60  ;;  %v3611_v24 = vpop.f32.mrb[115].mxu0  ;;  %v3947_v60 = vrot.slane %v8265_v45, 4  ;;  %v3999_v35 = vrot.slane %v8344_v21, 4 }
 0x41f   : > { %v3920_v23 = vmul.f32 %v3611_v24, %v1765_v3  ;;  %v4007_v63 = vadd.f32 %v4006_v12, %v3919_v61  ;;  %v3973_v3 = vrot.slane %v8304_v39, 4  ;;  %v3986_v12 = vrot.slane %v8324_v32, 4 }
 0x421   : > { %v4008_v36 = vadd.f32 %v4007_v63, %v3920_v23  ;;  %v5418_v55 = vpop.f32.mrb[116].mxu0  ;;  %v8760_v23 = vld [vmem:[#allocation69_spill] sm:$0xff] }
 0x422   : > { %v3923_v8 = vmul.f32 %v5418_v55, %v1780_v53  ;;  %v3621_v40 = vpop.f32.mrb[117].mxu0  ;;  %v1830_v63 = vadd.f32 %v8760_v23, %v8246_v48  ;;  %v8761_v53 = vld [vmem:[#allocation70_spill] sm:$0xff]  ;;  %v3974_v55 = vadd.f32 %v3973_v3, %v8304_v39 }
 0x423   : > { %v3922_v41 = vmul.f32 %v3621_v40, %v1775_v47  ;;  %v4009_v15 = vadd.f32 %v4008_v36, %v3921_v38  ;;  %v1825_v14 = vadd.f32 %v8246_v48, %v8761_v53  ;;  %v3948_v47 = vadd.f32 %v3947_v60, %v8265_v45 }
 0x424   : > { %v3961_v36 = vadd.f32 %v3960_v18, %v8284_v7  ;;  %v3987_v40 = vadd.f32 %v3986_v12, %v8324_v32 }
 0x425   : > { %v4010_v19 = vadd.f32 %v4009_v15, %v3922_v41  ;;  %v4000_v41 = vadd.f32 %v3999_v35, %v8344_v21  ;;  %v3949_v7 = vrot.slane %v3948_v47, 2 }
 0x426   : > { %v5421_v31 = vpop.f32.mrb[118].mxu0  ;;  %v3988_v32 = vrot.slane %v3987_v40, 2 }
 0x427   : > { %v4011_v37 = vadd.f32 %v4010_v19, %v3923_v8  ;;  %v3925_v13 = vmul.f32 %v5421_v31, %v1790_v11  ;;  %v3631_v20 = vpop.f32.mrb[119].mxu0  ;;  %v4001_v46 = vrot.slane %v4000_v41, 2 }
 0x428   : > { %v3924_v34 = vmul.f32 %v3631_v20, %v1785_v22  ;;  %v8762_v22 = vld [vmem:[#allocation71_spill] sm:$0xff]  ;;  %v8763_v20 = vld [vmem:[#allocation72_spill] sm:$0xff] }
 0x429   : > { %v4012_v24 = vrot.slane %v4011_v37, 4  ;;  %v1840_v31 = vadd.f32 %v8762_v22, %v8246_v48  ;;  %v1835_v45 = vadd.f32 %v8246_v48, %v8763_v20 }
 0x42a   : > { %v4018_v2 = vadd.f32 %v3925_v13, %v3924_v34  ;;  %v5424_v33 = vpop.f32.mrb[120].mxu0  ;;  %v3962_v34 = vrot.slane %v3961_v36, 2 }
 0x42b   : > { %v3927_v52 = vmul.f32 %v5424_v33, %v1800_v58  ;;  %v3641_v1 = vpop.f32.mrb[121].mxu0  ;;  %v4013_v11 = vadd.f32 %v4012_v24, %v4011_v37  ;;  %v3975_v58 = vrot.slane %v3974_v55, 2 }
 0x42c   : > { %v3926_v25 = vmul.f32 %v3641_v1, %v1795_v44  ;;  %v3963_v9 = vadd.f32 %v3962_v34, %v3961_v36 }
 0x42e   : > { %v4019_v17 = vadd.f32 %v4018_v2, %v3926_v25  ;;  %v5427_v54 = vpop.f32.mrb[122].mxu0  ;;  %v4014_v2 = vrot.slane %v4013_v11, 2  ;;  %v8765_v25 = vld [vmem:[#allocation74_spill] sm:$0xff] }
 0x42f   : > { %v3929_v57 = vmul.f32 %v5427_v54, %v1810_v43  ;;  %v3651_v26 = vpop.f32.mrb[123].mxu0  ;;  %v1845_v27 = vadd.f32 %v8246_v48, %v8765_v25  ;;  %v3950_v43 = vadd.f32 %v3949_v7, %v3948_v47  ;;  %v3976_v54 = vadd.f32 %v3975_v58, %v3974_v55 }
 0x430   : > { %v3928_v51 = vmul.f32 %v3651_v26, %v1805_v49  ;;  %v4020_v0 = vadd.f32 %v4019_v17, %v3927_v52  ;;  %v8764_v52 = vld [vmem:[#allocation73_spill] sm:$0xff]  ;;  %v4002_v26 = vadd.f32 %v4001_v46, %v4000_v41  ;;  %v4015_v29 = vadd.f32 %v4014_v2, %v4013_v11 }
 0x431   : > { %v1850_v1 = vadd.f32 %v8764_v52, %v8246_v48  ;;  %v3977_v3 = vrot.slane %v3976_v54, 1 }
 0x432   : > { %v4021_v16 = vadd.f32 %v4020_v0, %v3928_v51  ;;  %v5430_v10 = vpop.f32.mrb[124].mxu0  ;;  %v4003_v35 = vrot.slane %v4002_v26, 1  ;;  %v4016_v23 = vrot.slane %v4015_v29, 1 }
 0x433   : > { %v3931_v61 = vmul.f32 %v5430_v10, %v1820_v30  ;;  %v3661_v28 = vpop.f32.mrb[125].mxu0  ;;  %v3978_v41 = vadd.f32 %v3977_v3, %v3976_v54 }
 0x434   : > { %v3930_v50 = vmul.f32 %v3661_v28, %v1815_v6  ;;  %v4022_v5 = vadd.f32 %v4021_v16, %v3929_v57  ;;  %v3989_v57 = vadd.f32 %v3988_v32, %v3987_v40  ;;  %v8766_v16 = vld [vmem:[#allocation75_spill] sm:$0xff]  ;;  %v4004_v11 = vadd.f32 %v4003_v35, %v4002_v26 }
 0x435   : > { %v1860_v10 = vadd.f32 %v8766_v16, %v8246_v48 }
 0x436   : > { %v4023_v38 = vadd.f32 %v4022_v5, %v3930_v50  ;;  %v3951_v50 = vrot.slane %v3950_v43, 1  ;;  %v3964_v5 = vrot.slane %v3963_v9, 1  ;;  %v3990_v12 = vrot.slane %v3989_v57, 1 }
 0x437   : > { %v5433_v8 = vpop.f32.mrb[130].mxu1 }
 0x438   : > { %v4024_v59 = vadd.f32 %v4023_v38, %v3931_v61  ;;  %v3933_v19 = vmul.f32 %v5433_v8, %v1830_v63  ;;  %v3671_v56 = vpop.f32.mrb[131].mxu1  ;;  %v8767_v61 = vld [vmem:[#allocation76_spill] sm:$0xff]  ;;  %v3952_v36 = vadd.f32 %v3951_v50, %v3950_v43  ;;  %v3965_v40 = vadd.f32 %v3964_v5, %v3963_v9 }
 0x439   : > { %v3932_v62 = vmul.f32 %v3671_v56, %v1825_v14  ;;  %v1855_v28 = vadd.f32 %v8246_v48, %v8767_v61  ;;  %v8768_v14 = vld [vmem:[#allocation55_spill] sm:$0xff] }
 0x43a   : > { %v4025_v15 = vrot.slane %v4024_v59, 4  ;;  %v1090_v47 = vadd.f32 %v8246_v48, %v8768_v14 }
 0x43b   : > { %v4031_v39 = vadd.f32 %v3933_v19, %v3932_v62  ;;  %v5436_v42 = vpop.f32.mrb[132].mxu1  ;;  %v4017_v62 = vadd.f32 %v4016_v23, %v4015_v29 }
 0x43c   : > { %v4026_v13 = vadd.f32 %v4025_v15, %v4024_v59  ;;  %v3935_v21 = vmul.f32 %v5436_v42, %v1840_v31  ;;  %v3681_v44 = vpop.f32.mrb[133].mxu1  ;;  %v3991_v15 = vadd.f32 %v3990_v12, %v3989_v57 }
 0x43d   : > { %v3934_v37 = vmul.f32 %v3681_v44, %v1835_v45 }
 0x43e   : > { %v4027_v33 = vrot.slane %v4026_v13, 2 }
 0x43f   : > { %v4032_v49 = vadd.f32 %v4031_v39, %v3934_v37  ;;  %v5439_v17 = vpop.f32.mrb[134].mxu1 }
 0x440   : > { %v3937_v51 = vmul.f32 %v5439_v17, %v1850_v1  ;;  %v3691_v0 = vpop.f32.mrb[135].mxu1  ;;  %v4028_v30 = vadd.f32 %v4027_v33, %v4026_v13 }
 0x441   : > { %v3936_v4 = vmul.f32 %v3691_v0, %v1845_v27  ;;  %v4033_v6 = vadd.f32 %v4032_v49, %v3935_v21 }
 0x442   : > { %v4029_v63 = vrot.slane %v4028_v30, 1 }
 0x443   : > { %v4034_v60 = vadd.f32 %v4033_v6, %v3936_v4  ;;  %v5442_v18 = vpop.f32.mrb[136].mxu1 }
 0x444   : > { %v3939_v38 = vmul.f32 %v5442_v18, %v1860_v10  ;;  %v3701_v24 = vpop.f32.mrb[137].mxu1  ;;  %v4030_v22 = vadd.f32 %v4029_v63, %v4028_v30 }
 0x445   : > { %v3938_v59 = vmul.f32 %v3701_v24, %v1855_v28  ;;  %v4035_v53 = vadd.f32 %v4034_v60, %v3937_v51 }
 0x447   : > { %v4036_v55 = vadd.f32 %v4035_v53, %v3938_v59  ;;  %v3778_v8 = vpop.f32.mrb[138].mxu1 }
 0x448   : > { %v4044_v19 = vmul.f32 %v3778_v8, %v1090_v47  ;;  %v5447_v56 = vpop.f32.mrb[139].mxu1 }
 0x449   : > { %v4037_v31 = vadd.f32 %v4036_v55, %v3939_v38 }
 0x44a   : > { %v4046_v13 = vrot.slane %v4044_v19, 1  ;;  %v4047_v20 = vrot.slane %v4044_v19, 2  ;;  %v4061_v45 = vadd.f32 %v4044_v19, %v3952_v36  ;;  %v4048_v7 = vrot.slane %v4044_v19, 3  ;;  %v4420_v36 = vld [vmem:[%s8769_s14] ss:$0 sm:$0xff] }
 0x44b   : > { %v4038_v34 = vrot.slane %v4037_v31, 4  ;;  %v4049_v39 = vrot.slane %v4044_v19, 4  ;;  %v4050_v42 = vrot.slane %v4044_v19, 5  ;;  %v4051_v48 = vrot.slane %v4044_v19, 6 }
 0x44c   : > { %v4062_v58 = vadd.f32 %v4046_v13, %v3965_v40  ;;  %v4063_v32 = vadd.f32 %v4047_v20, %v3978_v41  ;;  %v4064_v46 = vadd.f32 %v4048_v7, %v3991_v15  ;;  %v4052_v27 = vrot.slane %v4044_v19, 7 }
 0x44d   : > { %v4039_v21 = vadd.f32 %v4038_v34, %v4037_v31  ;;  %v4065_v44 = vadd.f32 %v4049_v39, %v4004_v11  ;;  %v4066_v2 = vadd.f32 %v4050_v42, %v4017_v62  ;;  %v4067_v33 = vadd.f32 %v4051_v48, %v4030_v22 }
 0x44f   : > { %v4040_v37 = vrot.slane %v4039_v21, 2 }
 0x451   : > { %v4041_v52 = vadd.f32 %v4040_v37, %v4039_v21 }
 0x453   : > { %v4042_v1 = vrot.slane %v4041_v52, 1 }
 0x455   : > { %v4043_v25 = vadd.f32 %v4042_v1, %v4041_v52 }
 0x457   : > { %v4068_v43 = vadd.f32 %v4052_v27, %v4043_v25 }
 0x462   : > { %v3872_v9 = vpop.f32.mrb[140].mxu1 }
 0x463   : > { %v4070_v49 = vrot.slane %v3872_v9, 1  ;;  %v4071_v17 = vrot.slane %v3872_v9, 2  ;;  %v4072_v54 = vrot.slane %v3872_v9, 3  ;;  %v4085_v57 = vmul.f32 %v4061_v45, %v3872_v9  ;;  %v5452_v26 = vpop.f32.mrb[141].mxu1 }
 0x464   : > { %v4073_v51 = vrot.slane %v3872_v9, 4  ;;  %v4074_v0 = vrot.slane %v3872_v9, 5  ;;  %v4075_v29 = vrot.slane %v3872_v9, 6  ;;  %v4076_v30 = vrot.slane %v3872_v9, 7 }
 0x465   : > { %v4086_v4 = vmul.f32 %v4070_v49, %v4062_v58  ;;  %v4087_v6 = vmul.f32 %v4071_v17, %v4063_v32  ;;  %v4088_v16 = vmul.f32 %v4072_v54, %v4064_v46 }
 0x466   : > { %v4089_v10 = vmul.f32 %v4073_v51, %v4065_v44  ;;  %v4090_v61 = vmul.f32 %v4074_v0, %v4066_v2  ;;  %v4091_v28 = vmul.f32 %v4075_v29, %v4067_v33  ;;  %v4092_v50 = vmul.f32 %v4076_v30, %v4068_v43 }
 0x467   : > { %v4124_v5 = vrot.slane %v4086_v4, 7  ;;  %v4126_v60 = vrot.slane %v4087_v6, 6  ;;  %v4128_v3 = vrot.slane %v4088_v16, 5 }
 0x468   : > { %v4130_v35 = vrot.slane %v4089_v10, 4  ;;  %v4132_v24 = vrot.slane %v4090_v61, 3  ;;  %v4134_v63 = vrot.slane %v4091_v28, 2  ;;  %v4136_v53 = vrot.slane %v4092_v50, 1 }
 0x469   : > { %v4125_v18 = vsel %vm815_vm1, %v4124_v5, %v4085_v57 }
 0x46a   : > { %v4127_v12 = vsel %vm818_vm2, %v4126_v60, %v4125_v18 }
 0x46b   : > { %v4129_v38 = vsel %vm821_vm3, %v4128_v3, %v4127_v12 }
 0x46c   : > { %v4131_v23 = vsel %vm824_vm4, %v4130_v35, %v4129_v38 }
 0x46d   : > { %v4133_v59 = vsel %vm827_vm5, %v4132_v24, %v4131_v23 }
 0x46e   : > { %v4135_v14 = vsel %vm830_vm6, %v4134_v63, %v4133_v59 }
 0x46f   : > { %v4137_v47 = vsel %vm833_vm7, %v4136_v53, %v4135_v14 }
 0x470   : > { %5486 = vmatmul.mubr.f32.vlgmr.msra.gmra.mrb[126].mxu0 %v4137_v47 }
 0x543   : > { %v4205_v55 = vpop.f32.mrb[126].mxu0 }
 0x544   : > { %v4206_v8 = vadd.f32 %v4420_v36, %v4205_v55  ;;  %v5487_v40 = vpop.f32.mrb[127].mxu0 }
 0x546   : > { %4209 = vst [vmem:[%s517_s15] sm:$0xff] %v4206_v8 }
 0x547   : > { %6101 = shalt.err (!%p6098_p13)
}
 0x548   : > { %s6102_s8 = scalar_lea.hbm %s8417_s17, 128  ;;  %s6106_s16 = scalar_lea.hbm %s8770_s19, 256 }
 0x549   : > { %p6103_p9 = scmp.ne.s32.totalorder %s8417_s17, %s6102_s8  ;;  %p6107_p4 = scmp.lt.u32.totalorder %s8417_s17, %s8770_s19 }
 0x54a   : > { %p6108_p8 = scmp.lt.u32.totalorder %s6106_s16, %s6102_s8  ;;  %p6110_p3 = scmp.lt.u32.totalorder %s6102_s8, %s8417_s17 }
 0x54b   : > { %p6104_p0 = pnand %p6103_p9, %p6417_p10 }
 0x54c   : > { %p6109_p6 = por %p6108_p8, %p6107_p4 }
 0x54d   : > { %p6105_p11 = pneg %p6104_p0 }
 0x54e   : > { %p6111_p5 = por %p6110_p3, %p6109_p6 }
 0x550   : > { %p6112_p7 = pnand %p6111_p5, %p6105_p11 }
 0x552   : > { %6115 = shalt.err (!%p6112_p7)
}
 0x553   : > { %5724 = dma.vmem_to_hbm [thread:$0]  (%p6417_p10), %s8419_s24, 128, %s8417_s17, %s4211_s20  }
 0x554 PF: > { %s8771_s4 = sld [smem:[#allocation16_spill]]  ;;  %s8772_s10 = sld [smem:[#allocation17_spill]] }
 0x555   : > { %p8774_p1 = scmp.ge.s32.totalorder %s6162_s28, 2 }
 0x55a   : > { %s4236_s29 = sand.u32 1, %s8771_s4   ;;  %p8773_p12 = scmp.ne.s32.totalorder %s8772_s10, 0 }
 0x55b   : > { %s4237_s25 = scalar_lea.sflag [#allocation4], %s4236_s29 }
 0x55c   : > { %p5744_p2 = pnand %p8774_p1, %p8773_p12 }
 0x55e   : > { %6145 = dma.done.wait (!%p5744_p2), %s4237_s25, 128  }
 0x55f   : > { %6147 = vsyncadd (!%p5744_p2), %s4237_s25, 4294967168  ;;  %p28_p13 = scmp.ge.s32.totalorder %s6407_s13, 4   ;;  %s8775_s25 = smov %s6154_s26 }
 0x560   : > { %s8776_s26 = smov %s6158_s27  ;;  %s8777_s27 = smov %s6423_s30 }
 0x561   : > { %s8778_s28 = smov %s6407_s13  ;;  %30 = sbr.rel (!%p28_p13) target bundleno = 13 (0xd), region = 133 }
 0x568   :  { %4242 = vsyncpa [#allocation3], 1 }
 0x569   :  { %4244 = vsyncpa [#allocation3 + $0x1], 1 }
 0x56a   :  { %4245 = vsyncpa [#allocation6], 1 }
 0x56b   :  { %4246 = vsyncpa [#allocation9], 1 }
 0x56c   :  { %4247 = vsyncpa [#allocation4], 1 }
 0x56d   :  { %4249 = vsyncpa [#allocation4 + $0x1], 1 }

</bundles_post_ra>
